<compile_context>
chip_gen: v7x
topology: tpu7x:2x2x1
jax: 0.10.0
libtpu: 0.0.40
codegen_flags: <defaults>
</compile_context>

<pallas_src>
import functools

import jax
import jax.numpy as jnp
from jax.experimental import pallas as pl
from jax.experimental.pallas import tpu as pltpu  # noqa: F401  (kept for TPU-specific tuning hooks)

NEG_SLOPE = 0.2      # PyG GATConv leaky_relu default negative slope
NEG_INF = -1e30      # additive mask for non-edges (avoids inf arithmetic)


def _gat_kernel(num_heads, head_dim,
                x_ref, xT_ref, w1_ref, asrc1_ref, adst1T_ref, b1_ref,
                w2_ref, asrc2_col_ref, adst2_row_ref, b2_ref,
                maskb_ref, out_ref):
    f32 = jnp.float32

    # Hoisted loads — reused across all heads and both layers.
    mask_bias = maskb_ref[...]        # (N, N): 0 where edge src->dst (incl. self loop), -1e30 else
    x = x_ref[...]                    # (N, F)
    xT = xT_ref[...]                  # (F, N)

    # ---------------- Layer 1: GATConv(F -> head_dim, heads=num_heads, concat=True)
    # h^T for all heads, lane-dense: (heads*head_dim, N)
    hT = jnp.dot(w1_ref[...], xT, preferred_element_type=f32)
    # Per-node attention logits, one matmul per side (att vectors pre-folded through W1).
    asrc_cols = jnp.dot(x, asrc1_ref[...], preferred_element_type=f32)      # (N, heads)  src logits
    adst_rows = jnp.dot(adst1T_ref[...], xT, preferred_element_type=f32)    # (heads, N)  dst logits

    head_outs = []
    for k in range(num_heads):                      # static, fully unrolled
        hT_k = hT[k * head_dim:(k + 1) * head_dim, :]            # (head_dim, N)
        # scores[j, i] = leaky_relu(alpha_src[j] + alpha_dst[i])  (src rows, dst cols)
        s = asrc_cols[:, k:k + 1] + adst_rows[k:k + 1, :]         # (N, N)
        s = jnp.where(s > 0, s, NEG_SLOPE * s)
        s = s + mask_bias                                          # restrict softmax to edges
        m = jnp.max(s, axis=0, keepdims=True)                      # (1, N) per-dst max
        p = jnp.exp(s - m)                                         # (N, N) unnormalized attn
        denom = jnp.sum(p, axis=0, keepdims=True)                  # (1, N)
        o = jnp.dot(hT_k, p, preferred_element_type=f32)           # (head_dim, N)
        head_outs.append(o * pl.reciprocal(denom, approx=True))
    x1T = jnp.concatenate(head_outs, axis=0)                       # (heads*head_dim, N)  == concat
    x1T = x1T + b1_ref[...]                                        # bias (heads*head_dim, 1)
    x1T = jnp.where(x1T > 0, x1T, jnp.exp(x1T) - 1.0)              # ELU

    # ---------------- Layer 2: GATConv(heads*head_dim -> C, heads=1, concat=False)
    h2T = jnp.dot(w2_ref[...], x1T, preferred_element_type=f32)    # (C, N)
    h2 = jnp.transpose(h2T)                                        # (N, C) — single small transpose
    asrc2 = jnp.dot(h2, asrc2_col_ref[...], preferred_element_type=f32)     # (N, 1)
    adst2 = jnp.dot(adst2_row_ref[...], h2T, preferred_element_type=f32)    # (1, N)
    s2 = asrc2 + adst2
    s2 = jnp.where(s2 > 0, s2, NEG_SLOPE * s2) + mask_bias
    m2 = jnp.max(s2, axis=0, keepdims=True)
    p2 = jnp.exp(s2 - m2)
    d2 = jnp.sum(p2, axis=0, keepdims=True)
    o2T = jnp.dot(h2T, p2, preferred_element_type=f32) * pl.reciprocal(d2, approx=True)
    o2T = o2T + b2_ref[...]                                        # (C, N) + (C, 1); heads=1 mean == identity

    # log_softmax over the class axis (axis 0 in transposed layout).
    mz = jnp.max(o2T, axis=0, keepdims=True)
    z = o2T - mz
    lse = jnp.log(jnp.sum(jnp.exp(z), axis=0, keepdims=True))
    out_ref[...] = z - lse                                         # (C, N) lane-dense store


@jax.jit
def gat_forward(x, edge_index, params):
    """GAT forward (eval mode). Returns (N, num_classes) log-probabilities."""
    n, f = x.shape
    w1 = params["w1"]              # (heads*nhid, F)    — PyTorch Linear layout
    att_src1 = params["att_src1"]  # (heads, nhid)
    att_dst1 = params["att_dst1"]  # (heads, nhid)
    b1 = params["b1"]              # (heads*nhid,)
    w2 = params["w2"]              # (C, heads*nhid)
    att_src2 = params["att_src2"]  # (1, C)
    att_dst2 = params["att_dst2"]  # (1, C)
    b2 = params["b2"]              # (C,)

    heads, hd = att_src1.shape
    c = w2.shape[0]

    # Dense edge mask in (src, dst) orientation with self loops (PyG GATConv
    # removes existing self loops and re-adds them, so the diagonal is 1).
    # If the graph is static across calls, hoist this block out of the
    # per-call path and pass mask_bias in directly.
    # TODO(synk): duplicate edges in edge_index collapse to a single edge in
    # the dense mask; PyG's edge-wise softmax would count each duplicate.
    src, dst = edge_index[0], edge_index[1]
    adj = jnp.zeros((n, n), jnp.float32).at[src, dst].set(1.0)
    adj = jnp.maximum(adj, jnp.eye(n, dtype=jnp.float32))
    mask_bias = jnp.where(adj > 0.0, 0.0, NEG_INF)

    # Fold per-head attention vectors through W1 so layer-1 attention logits
    # are produced by single matmuls in both (node-major / feature-major) layouts.
    w1r = w1.reshape(heads, hd, f)
    asrc1 = jnp.einsum("khf,kh->fk", w1r, att_src1)    # (F, heads)
    adst1T = jnp.einsum("khf,kh->kf", w1r, att_dst1)   # (heads, F)

    kern = functools.partial(_gat_kernel, heads, hd)
    full = lambda shape: pl.BlockSpec(shape, lambda: (0,) * len(shape))

    args = (
        x,                              # (N, F)
        x.T,                            # (F, N)
        w1,                             # (heads*hd, F)
        asrc1,                          # (F, heads)
        adst1T,                         # (heads, F)
        b1.reshape(-1, 1),              # (heads*hd, 1)
        w2,                             # (C, heads*hd)
        att_src2.reshape(c, 1),         # (C, 1)
        att_dst2.reshape(1, c),         # (1, C)
        b2.reshape(-1, 1),              # (C, 1)
        mask_bias,                      # (N, N)
    )

    out_t = pl.pallas_call(
        kern,
        out_shape=jax.ShapeDtypeStruct((c, n), jnp.float32),
        grid=(),
        in_specs=[full(a.shape) for a in args],
        out_specs=full((c, n)),
    )(*args)
    return out_t.T                      # (N, C)


if __name__ == "__main__":
    # Small synthetic graph consistent with the module:
    #   N nodes, num_features=32, nhid=8, first_heads=8 (-> 64 hidden),
    #   num_classes=8, output_heads=1.
    N, NUM_FEATURES, NHID, FIRST_HEADS, NUM_CLASSES, NUM_EDGES = 128, 32, 8, 8, 8, 256

    key = jax.random.PRNGKey(0)
    keys = jax.random.split(key, 8)

    x = jax.random.normal(keys[0], (N, NUM_FEATURES), jnp.float32)
    edge_index = jax.random.randint(keys[1], (2, NUM_EDGES), 0, N, dtype=jnp.int32)

    def glorot(k, shape):
        fan = shape[-1] + shape[-2] if len(shape) > 1 else shape[0]
        lim = jnp.sqrt(jnp.float32(6.0 / fan))
        return jax.random.uniform(k, shape, jnp.float32, -lim, lim)

    params = {
        "w1": glorot(keys[2], (FIRST_HEADS * NHID, NUM_FEATURES)),
        "att_src1": glorot(keys[3], (FIRST_HEADS, NHID)),
        "att_dst1": glorot(keys[4], (FIRST_HEADS, NHID)),
        "b1": jnp.zeros((FIRST_HEADS * NHID,), jnp.float32),
        "w2": glorot(keys[5], (NUM_CLASSES, FIRST_HEADS * NHID)),
        "att_src2": glorot(keys[6], (1, NUM_CLASSES)),
        "att_dst2": glorot(keys[7], (1, NUM_CLASSES)),
        "b2": jnp.zeros((NUM_CLASSES,), jnp.float32),
    }

    out = gat_forward(x, edge_index, params)
    jax.block_until_ready(out)

    assert out.shape == (N, NUM_CLASSES)
    assert bool(jnp.all(jnp.isfinite(out)))
    # log_softmax rows should exp-sum to 1
    assert jnp.allclose(jnp.sum(jnp.exp(out), axis=1), 1.0, atol=1e-4)
    print("KERNEL_OK")
</pallas_src>

<mosaic_0001>
module attributes {stable_mosaic.version = 11 : i64} {
  func.func @_gat_kernel(%arg0: memref<128x32xf32, #tpu.memory_space<vmem>>, %arg1: memref<32x128xf32, #tpu.memory_space<vmem>>, %arg2: memref<64x32xf32, #tpu.memory_space<vmem>>, %arg3: memref<32x8xf32, #tpu.memory_space<vmem>>, %arg4: memref<8x32xf32, #tpu.memory_space<vmem>>, %arg5: memref<64x1xf32, #tpu.memory_space<vmem>>, %arg6: memref<8x64xf32, #tpu.memory_space<vmem>>, %arg7: memref<8x1xf32, #tpu.memory_space<vmem>>, %arg8: memref<1x8xf32, #tpu.memory_space<vmem>>, %arg9: memref<8x1xf32, #tpu.memory_space<vmem>>, %arg10: memref<128x128xf32, #tpu.memory_space<vmem>>, %arg11: memref<8x128xf32, #tpu.memory_space<vmem>>) attributes {dimension_semantics = [], scalar_prefetch = 0 : i64, scratch_operands = 0 : i64, tpu.core_type = #tpu.core_type<tc>} {
    %c0 = arith.constant 0 : index
    %c0_0 = arith.constant 0 : index
    %0 = vector.load %arg10[%c0, %c0_0] : memref<128x128xf32, #tpu.memory_space<vmem>>, vector<128x128xf32>
    %1 = vector.shape_cast %0 : vector<128x128xf32> to vector<128x128xf32>
    %c0_1 = arith.constant 0 : index
    %c0_2 = arith.constant 0 : index
    %2 = vector.load %arg0[%c0_1, %c0_2] : memref<128x32xf32, #tpu.memory_space<vmem>>, vector<128x32xf32>
    %c0_3 = arith.constant 0 : index
    %c0_4 = arith.constant 0 : index
    %3 = vector.load %arg1[%c0_3, %c0_4] : memref<32x128xf32, #tpu.memory_space<vmem>>, vector<32x128xf32>
    %c0_5 = arith.constant 0 : index
    %c0_6 = arith.constant 0 : index
    %4 = vector.load %arg2[%c0_5, %c0_6] : memref<64x32xf32, #tpu.memory_space<vmem>>, vector<64x32xf32>
    %cst = arith.constant dense<0.000000e+00> : vector<64x128xf32>
    %5 = tpu.matmul %4, %3, %cst {dimension_numbers = #tpu.dot_dimension_numbers<[1], [0], [0], [1], [0, 0, 1, 1], [], []>} : vector<64x32xf32>, vector<32x128xf32>, vector<64x128xf32> -> vector<64x128xf32>
    %c0_7 = arith.constant 0 : index
    %c0_8 = arith.constant 0 : index
    %6 = vector.load %arg3[%c0_7, %c0_8] : memref<32x8xf32, #tpu.memory_space<vmem>>, vector<32x8xf32>
    %cst_9 = arith.constant dense<0.000000e+00> : vector<128x8xf32>
    %7 = tpu.matmul %2, %6, %cst_9 {dimension_numbers = #tpu.dot_dimension_numbers<[1], [0], [0], [1], [0, 0, 1, 1], [], []>} : vector<128x32xf32>, vector<32x8xf32>, vector<128x8xf32> -> vector<128x8xf32>
    %c0_10 = arith.constant 0 : index
    %c0_11 = arith.constant 0 : index
    %8 = vector.load %arg4[%c0_10, %c0_11] : memref<8x32xf32, #tpu.memory_space<vmem>>, vector<8x32xf32>
    %cst_12 = arith.constant dense<0.000000e+00> : vector<8x128xf32>
    %9 = tpu.matmul %8, %3, %cst_12 {dimension_numbers = #tpu.dot_dimension_numbers<[1], [0], [0], [1], [0, 0, 1, 1], [], []>} : vector<8x32xf32>, vector<32x128xf32>, vector<8x128xf32> -> vector<8x128xf32>
    %10 = vector.extract_strided_slice %5 {offsets = [0, 0], sizes = [8, 128], strides = [1, 1]} : vector<64x128xf32> to vector<8x128xf32>
    %11 = vector.extract_strided_slice %7 {offsets = [0, 0], sizes = [128, 1], strides = [1, 1]} : vector<128x8xf32> to vector<128x1xf32>
    %12 = vector.extract_strided_slice %9 {offsets = [0, 0], sizes = [1, 128], strides = [1, 1]} : vector<8x128xf32> to vector<1x128xf32>
    %13 = vector.broadcast %11 : vector<128x1xf32> to vector<128x128xf32>
    %14 = vector.broadcast %12 : vector<1x128xf32> to vector<128x128xf32>
    %15 = arith.addf %13, %14 : vector<128x128xf32>
    %cst_13 = arith.constant 0.000000e+00 : f32
    %16 = vector.broadcast %cst_13 : f32 to vector<128x128xf32>
    %17 = arith.cmpf ogt, %15, %16 : vector<128x128xf32>
    %cst_14 = arith.constant 2.000000e-01 : f32
    %18 = vector.broadcast %cst_14 : f32 to vector<128x128xf32>
    %19 = arith.mulf %18, %15 : vector<128x128xf32>
    %20 = arith.select %17, %15, %19 : vector<128x128xi1>, vector<128x128xf32>
    %21 = arith.addf %20, %1 : vector<128x128xf32>
    %cst_15 = arith.constant dense<0xFF800000> : vector<128xf32>
    %22 = vector.multi_reduction <maximumf>, %21, %cst_15 [0] : vector<128x128xf32> to vector<128xf32>
    %23 = vector.shape_cast %22 : vector<128xf32> to vector<1x128xf32>
    %24 = vector.broadcast %23 : vector<1x128xf32> to vector<128x128xf32>
    %25 = arith.subf %21, %24 : vector<128x128xf32>
    %26 = math.exp %25 : vector<128x128xf32>
    %cst_16 = arith.constant dense<0.000000e+00> : vector<128xf32>
    %27 = vector.multi_reduction <add>, %26, %cst_16 [0] : vector<128x128xf32> to vector<128xf32>
    %28 = vector.shape_cast %27 : vector<128xf32> to vector<1x128xf32>
    %cst_17 = arith.constant dense<0.000000e+00> : vector<8x128xf32>
    %29 = tpu.matmul %10, %26, %cst_17 {dimension_numbers = #tpu.dot_dimension_numbers<[1], [0], [0], [1], [0, 0, 1, 1], [], []>} : vector<8x128xf32>, vector<128x128xf32>, vector<8x128xf32> -> vector<8x128xf32>
    %30 = tpu.reciprocal %28 {approx = true} : vector<1x128xf32> -> vector<1x128xf32>
    %31 = vector.broadcast %30 : vector<1x128xf32> to vector<8x128xf32>
    %32 = arith.mulf %29, %31 : vector<8x128xf32>
    %33 = vector.extract_strided_slice %5 {offsets = [8, 0], sizes = [8, 128], strides = [1, 1]} : vector<64x128xf32> to vector<8x128xf32>
    %34 = vector.extract_strided_slice %7 {offsets = [0, 1], sizes = [128, 1], strides = [1, 1]} : vector<128x8xf32> to vector<128x1xf32>
    %35 = vector.extract_strided_slice %9 {offsets = [1, 0], sizes = [1, 128], strides = [1, 1]} : vector<8x128xf32> to vector<1x128xf32>
    %36 = vector.broadcast %34 : vector<128x1xf32> to vector<128x128xf32>
    %37 = vector.broadcast %35 : vector<1x128xf32> to vector<128x128xf32>
    %38 = arith.addf %36, %37 : vector<128x128xf32>
    %cst_18 = arith.constant 0.000000e+00 : f32
    %39 = vector.broadcast %cst_18 : f32 to vector<128x128xf32>
    %40 = arith.cmpf ogt, %38, %39 : vector<128x128xf32>
    %cst_19 = arith.constant 2.000000e-01 : f32
    %41 = vector.broadcast %cst_19 : f32 to vector<128x128xf32>
    %42 = arith.mulf %41, %38 : vector<128x128xf32>
    %43 = arith.select %40, %38, %42 : vector<128x128xi1>, vector<128x128xf32>
    %44 = arith.addf %43, %1 : vector<128x128xf32>
    %cst_20 = arith.constant dense<0xFF800000> : vector<128xf32>
    %45 = vector.multi_reduction <maximumf>, %44, %cst_20 [0] : vector<128x128xf32> to vector<128xf32>
    %46 = vector.shape_cast %45 : vector<128xf32> to vector<1x128xf32>
    %47 = vector.broadcast %46 : vector<1x128xf32> to vector<128x128xf32>
    %48 = arith.subf %44, %47 : vector<128x128xf32>
    %49 = math.exp %48 : vector<128x128xf32>
    %cst_21 = arith.constant dense<0.000000e+00> : vector<128xf32>
    %50 = vector.multi_reduction <add>, %49, %cst_21 [0] : vector<128x128xf32> to vector<128xf32>
    %51 = vector.shape_cast %50 : vector<128xf32> to vector<1x128xf32>
    %cst_22 = arith.constant dense<0.000000e+00> : vector<8x128xf32>
    %52 = tpu.matmul %33, %49, %cst_22 {dimension_numbers = #tpu.dot_dimension_numbers<[1], [0], [0], [1], [0, 0, 1, 1], [], []>} : vector<8x128xf32>, vector<128x128xf32>, vector<8x128xf32> -> vector<8x128xf32>
    %53 = tpu.reciprocal %51 {approx = true} : vector<1x128xf32> -> vector<1x128xf32>
    %54 = vector.broadcast %53 : vector<1x128xf32> to vector<8x128xf32>
    %55 = arith.mulf %52, %54 : vector<8x128xf32>
    %56 = vector.extract_strided_slice %5 {offsets = [16, 0], sizes = [8, 128], strides = [1, 1]} : vector<64x128xf32> to vector<8x128xf32>
    %57 = vector.extract_strided_slice %7 {offsets = [0, 2], sizes = [128, 1], strides = [1, 1]} : vector<128x8xf32> to vector<128x1xf32>
    %58 = vector.extract_strided_slice %9 {offsets = [2, 0], sizes = [1, 128], strides = [1, 1]} : vector<8x128xf32> to vector<1x128xf32>
    %59 = vector.broadcast %57 : vector<128x1xf32> to vector<128x128xf32>
    %60 = vector.broadcast %58 : vector<1x128xf32> to vector<128x128xf32>
    %61 = arith.addf %59, %60 : vector<128x128xf32>
    %cst_23 = arith.constant 0.000000e+00 : f32
    %62 = vector.broadcast %cst_23 : f32 to vector<128x128xf32>
    %63 = arith.cmpf ogt, %61, %62 : vector<128x128xf32>
    %cst_24 = arith.constant 2.000000e-01 : f32
    %64 = vector.broadcast %cst_24 : f32 to vector<128x128xf32>
    %65 = arith.mulf %64, %61 : vector<128x128xf32>
    %66 = arith.select %63, %61, %65 : vector<128x128xi1>, vector<128x128xf32>
    %67 = arith.addf %66, %1 : vector<128x128xf32>
    %cst_25 = arith.constant dense<0xFF800000> : vector<128xf32>
    %68 = vector.multi_reduction <maximumf>, %67, %cst_25 [0] : vector<128x128xf32> to vector<128xf32>
    %69 = vector.shape_cast %68 : vector<128xf32> to vector<1x128xf32>
    %70 = vector.broadcast %69 : vector<1x128xf32> to vector<128x128xf32>
    %71 = arith.subf %67, %70 : vector<128x128xf32>
    %72 = math.exp %71 : vector<128x128xf32>
    %cst_26 = arith.constant dense<0.000000e+00> : vector<128xf32>
    %73 = vector.multi_reduction <add>, %72, %cst_26 [0] : vector<128x128xf32> to vector<128xf32>
    %74 = vector.shape_cast %73 : vector<128xf32> to vector<1x128xf32>
    %cst_27 = arith.constant dense<0.000000e+00> : vector<8x128xf32>
    %75 = tpu.matmul %56, %72, %cst_27 {dimension_numbers = #tpu.dot_dimension_numbers<[1], [0], [0], [1], [0, 0, 1, 1], [], []>} : vector<8x128xf32>, vector<128x128xf32>, vector<8x128xf32> -> vector<8x128xf32>
    %76 = tpu.reciprocal %74 {approx = true} : vector<1x128xf32> -> vector<1x128xf32>
    %77 = vector.broadcast %76 : vector<1x128xf32> to vector<8x128xf32>
    %78 = arith.mulf %75, %77 : vector<8x128xf32>
    %79 = vector.extract_strided_slice %5 {offsets = [24, 0], sizes = [8, 128], strides = [1, 1]} : vector<64x128xf32> to vector<8x128xf32>
    %80 = vector.extract_strided_slice %7 {offsets = [0, 3], sizes = [128, 1], strides = [1, 1]} : vector<128x8xf32> to vector<128x1xf32>
    %81 = vector.extract_strided_slice %9 {offsets = [3, 0], sizes = [1, 128], strides = [1, 1]} : vector<8x128xf32> to vector<1x128xf32>
    %82 = vector.broadcast %80 : vector<128x1xf32> to vector<128x128xf32>
    %83 = vector.broadcast %81 : vector<1x128xf32> to vector<128x128xf32>
    %84 = arith.addf %82, %83 : vector<128x128xf32>
    %cst_28 = arith.constant 0.000000e+00 : f32
    %85 = vector.broadcast %cst_28 : f32 to vector<128x128xf32>
    %86 = arith.cmpf ogt, %84, %85 : vector<128x128xf32>
    %cst_29 = arith.constant 2.000000e-01 : f32
    %87 = vector.broadcast %cst_29 : f32 to vector<128x128xf32>
    %88 = arith.mulf %87, %84 : vector<128x128xf32>
    %89 = arith.select %86, %84, %88 : vector<128x128xi1>, vector<128x128xf32>
    %90 = arith.addf %89, %1 : vector<128x128xf32>
    %cst_30 = arith.constant dense<0xFF800000> : vector<128xf32>
    %91 = vector.multi_reduction <maximumf>, %90, %cst_30 [0] : vector<128x128xf32> to vector<128xf32>
    %92 = vector.shape_cast %91 : vector<128xf32> to vector<1x128xf32>
    %93 = vector.broadcast %92 : vector<1x128xf32> to vector<128x128xf32>
    %94 = arith.subf %90, %93 : vector<128x128xf32>
    %95 = math.exp %94 : vector<128x128xf32>
    %cst_31 = arith.constant dense<0.000000e+00> : vector<128xf32>
    %96 = vector.multi_reduction <add>, %95, %cst_31 [0] : vector<128x128xf32> to vector<128xf32>
    %97 = vector.shape_cast %96 : vector<128xf32> to vector<1x128xf32>
    %cst_32 = arith.constant dense<0.000000e+00> : vector<8x128xf32>
    %98 = tpu.matmul %79, %95, %cst_32 {dimension_numbers = #tpu.dot_dimension_numbers<[1], [0], [0], [1], [0, 0, 1, 1], [], []>} : vector<8x128xf32>, vector<128x128xf32>, vector<8x128xf32> -> vector<8x128xf32>
    %99 = tpu.reciprocal %97 {approx = true} : vector<1x128xf32> -> vector<1x128xf32>
    %100 = vector.broadcast %99 : vector<1x128xf32> to vector<8x128xf32>
    %101 = arith.mulf %98, %100 : vector<8x128xf32>
    %102 = vector.extract_strided_slice %5 {offsets = [32, 0], sizes = [8, 128], strides = [1, 1]} : vector<64x128xf32> to vector<8x128xf32>
    %103 = vector.extract_strided_slice %7 {offsets = [0, 4], sizes = [128, 1], strides = [1, 1]} : vector<128x8xf32> to vector<128x1xf32>
    %104 = vector.extract_strided_slice %9 {offsets = [4, 0], sizes = [1, 128], strides = [1, 1]} : vector<8x128xf32> to vector<1x128xf32>
    %105 = vector.broadcast %103 : vector<128x1xf32> to vector<128x128xf32>
    %106 = vector.broadcast %104 : vector<1x128xf32> to vector<128x128xf32>
    %107 = arith.addf %105, %106 : vector<128x128xf32>
    %cst_33 = arith.constant 0.000000e+00 : f32
    %108 = vector.broadcast %cst_33 : f32 to vector<128x128xf32>
    %109 = arith.cmpf ogt, %107, %108 : vector<128x128xf32>
    %cst_34 = arith.constant 2.000000e-01 : f32
    %110 = vector.broadcast %cst_34 : f32 to vector<128x128xf32>
    %111 = arith.mulf %110, %107 : vector<128x128xf32>
    %112 = arith.select %109, %107, %111 : vector<128x128xi1>, vector<128x128xf32>
    %113 = arith.addf %112, %1 : vector<128x128xf32>
    %cst_35 = arith.constant dense<0xFF800000> : vector<128xf32>
    %114 = vector.multi_reduction <maximumf>, %113, %cst_35 [0] : vector<128x128xf32> to vector<128xf32>
    %115 = vector.shape_cast %114 : vector<128xf32> to vector<1x128xf32>
    %116 = vector.broadcast %115 : vector<1x128xf32> to vector<128x128xf32>
    %117 = arith.subf %113, %116 : vector<128x128xf32>
    %118 = math.exp %117 : vector<128x128xf32>
    %cst_36 = arith.constant dense<0.000000e+00> : vector<128xf32>
    %119 = vector.multi_reduction <add>, %118, %cst_36 [0] : vector<128x128xf32> to vector<128xf32>
    %120 = vector.shape_cast %119 : vector<128xf32> to vector<1x128xf32>
    %cst_37 = arith.constant dense<0.000000e+00> : vector<8x128xf32>
    %121 = tpu.matmul %102, %118, %cst_37 {dimension_numbers = #tpu.dot_dimension_numbers<[1], [0], [0], [1], [0, 0, 1, 1], [], []>} : vector<8x128xf32>, vector<128x128xf32>, vector<8x128xf32> -> vector<8x128xf32>
    %122 = tpu.reciprocal %120 {approx = true} : vector<1x128xf32> -> vector<1x128xf32>
    %123 = vector.broadcast %122 : vector<1x128xf32> to vector<8x128xf32>
    %124 = arith.mulf %121, %123 : vector<8x128xf32>
    %125 = vector.extract_strided_slice %5 {offsets = [40, 0], sizes = [8, 128], strides = [1, 1]} : vector<64x128xf32> to vector<8x128xf32>
    %126 = vector.extract_strided_slice %7 {offsets = [0, 5], sizes = [128, 1], strides = [1, 1]} : vector<128x8xf32> to vector<128x1xf32>
    %127 = vector.extract_strided_slice %9 {offsets = [5, 0], sizes = [1, 128], strides = [1, 1]} : vector<8x128xf32> to vector<1x128xf32>
    %128 = vector.broadcast %126 : vector<128x1xf32> to vector<128x128xf32>
    %129 = vector.broadcast %127 : vector<1x128xf32> to vector<128x128xf32>
    %130 = arith.addf %128, %129 : vector<128x128xf32>
    %cst_38 = arith.constant 0.000000e+00 : f32
    %131 = vector.broadcast %cst_38 : f32 to vector<128x128xf32>
    %132 = arith.cmpf ogt, %130, %131 : vector<128x128xf32>
    %cst_39 = arith.constant 2.000000e-01 : f32
    %133 = vector.broadcast %cst_39 : f32 to vector<128x128xf32>
    %134 = arith.mulf %133, %130 : vector<128x128xf32>
    %135 = arith.select %132, %130, %134 : vector<128x128xi1>, vector<128x128xf32>
    %136 = arith.addf %135, %1 : vector<128x128xf32>
    %cst_40 = arith.constant dense<0xFF800000> : vector<128xf32>
    %137 = vector.multi_reduction <maximumf>, %136, %cst_40 [0] : vector<128x128xf32> to vector<128xf32>
    %138 = vector.shape_cast %137 : vector<128xf32> to vector<1x128xf32>
    %139 = vector.broadcast %138 : vector<1x128xf32> to vector<128x128xf32>
    %140 = arith.subf %136, %139 : vector<128x128xf32>
    %141 = math.exp %140 : vector<128x128xf32>
    %cst_41 = arith.constant dense<0.000000e+00> : vector<128xf32>
    %142 = vector.multi_reduction <add>, %141, %cst_41 [0] : vector<128x128xf32> to vector<128xf32>
    %143 = vector.shape_cast %142 : vector<128xf32> to vector<1x128xf32>
    %cst_42 = arith.constant dense<0.000000e+00> : vector<8x128xf32>
    %144 = tpu.matmul %125, %141, %cst_42 {dimension_numbers = #tpu.dot_dimension_numbers<[1], [0], [0], [1], [0, 0, 1, 1], [], []>} : vector<8x128xf32>, vector<128x128xf32>, vector<8x128xf32> -> vector<8x128xf32>
    %145 = tpu.reciprocal %143 {approx = true} : vector<1x128xf32> -> vector<1x128xf32>
    %146 = vector.broadcast %145 : vector<1x128xf32> to vector<8x128xf32>
    %147 = arith.mulf %144, %146 : vector<8x128xf32>
    %148 = vector.extract_strided_slice %5 {offsets = [48, 0], sizes = [8, 128], strides = [1, 1]} : vector<64x128xf32> to vector<8x128xf32>
    %149 = vector.extract_strided_slice %7 {offsets = [0, 6], sizes = [128, 1], strides = [1, 1]} : vector<128x8xf32> to vector<128x1xf32>
    %150 = vector.extract_strided_slice %9 {offsets = [6, 0], sizes = [1, 128], strides = [1, 1]} : vector<8x128xf32> to vector<1x128xf32>
    %151 = vector.broadcast %149 : vector<128x1xf32> to vector<128x128xf32>
    %152 = vector.broadcast %150 : vector<1x128xf32> to vector<128x128xf32>
    %153 = arith.addf %151, %152 : vector<128x128xf32>
    %cst_43 = arith.constant 0.000000e+00 : f32
    %154 = vector.broadcast %cst_43 : f32 to vector<128x128xf32>
    %155 = arith.cmpf ogt, %153, %154 : vector<128x128xf32>
    %cst_44 = arith.constant 2.000000e-01 : f32
    %156 = vector.broadcast %cst_44 : f32 to vector<128x128xf32>
    %157 = arith.mulf %156, %153 : vector<128x128xf32>
    %158 = arith.select %155, %153, %157 : vector<128x128xi1>, vector<128x128xf32>
    %159 = arith.addf %158, %1 : vector<128x128xf32>
    %cst_45 = arith.constant dense<0xFF800000> : vector<128xf32>
    %160 = vector.multi_reduction <maximumf>, %159, %cst_45 [0] : vector<128x128xf32> to vector<128xf32>
    %161 = vector.shape_cast %160 : vector<128xf32> to vector<1x128xf32>
    %162 = vector.broadcast %161 : vector<1x128xf32> to vector<128x128xf32>
    %163 = arith.subf %159, %162 : vector<128x128xf32>
    %164 = math.exp %163 : vector<128x128xf32>
    %cst_46 = arith.constant dense<0.000000e+00> : vector<128xf32>
    %165 = vector.multi_reduction <add>, %164, %cst_46 [0] : vector<128x128xf32> to vector<128xf32>
    %166 = vector.shape_cast %165 : vector<128xf32> to vector<1x128xf32>
    %cst_47 = arith.constant dense<0.000000e+00> : vector<8x128xf32>
    %167 = tpu.matmul %148, %164, %cst_47 {dimension_numbers = #tpu.dot_dimension_numbers<[1], [0], [0], [1], [0, 0, 1, 1], [], []>} : vector<8x128xf32>, vector<128x128xf32>, vector<8x128xf32> -> vector<8x128xf32>
    %168 = tpu.reciprocal %166 {approx = true} : vector<1x128xf32> -> vector<1x128xf32>
    %169 = vector.broadcast %168 : vector<1x128xf32> to vector<8x128xf32>
    %170 = arith.mulf %167, %169 : vector<8x128xf32>
    %171 = vector.extract_strided_slice %5 {offsets = [56, 0], sizes = [8, 128], strides = [1, 1]} : vector<64x128xf32> to vector<8x128xf32>
    %172 = vector.extract_strided_slice %7 {offsets = [0, 7], sizes = [128, 1], strides = [1, 1]} : vector<128x8xf32> to vector<128x1xf32>
    %173 = vector.extract_strided_slice %9 {offsets = [7, 0], sizes = [1, 128], strides = [1, 1]} : vector<8x128xf32> to vector<1x128xf32>
    %174 = vector.broadcast %172 : vector<128x1xf32> to vector<128x128xf32>
    %175 = vector.broadcast %173 : vector<1x128xf32> to vector<128x128xf32>
    %176 = arith.addf %174, %175 : vector<128x128xf32>
    %cst_48 = arith.constant 0.000000e+00 : f32
    %177 = vector.broadcast %cst_48 : f32 to vector<128x128xf32>
    %178 = arith.cmpf ogt, %176, %177 : vector<128x128xf32>
    %cst_49 = arith.constant 2.000000e-01 : f32
    %179 = vector.broadcast %cst_49 : f32 to vector<128x128xf32>
    %180 = arith.mulf %179, %176 : vector<128x128xf32>
    %181 = arith.select %178, %176, %180 : vector<128x128xi1>, vector<128x128xf32>
    %182 = arith.addf %181, %1 : vector<128x128xf32>
    %cst_50 = arith.constant dense<0xFF800000> : vector<128xf32>
    %183 = vector.multi_reduction <maximumf>, %182, %cst_50 [0] : vector<128x128xf32> to vector<128xf32>
    %184 = vector.shape_cast %183 : vector<128xf32> to vector<1x128xf32>
    %185 = vector.broadcast %184 : vector<1x128xf32> to vector<128x128xf32>
    %186 = arith.subf %182, %185 : vector<128x128xf32>
    %187 = math.exp %186 : vector<128x128xf32>
    %cst_51 = arith.constant dense<0.000000e+00> : vector<128xf32>
    %188 = vector.multi_reduction <add>, %187, %cst_51 [0] : vector<128x128xf32> to vector<128xf32>
    %189 = vector.shape_cast %188 : vector<128xf32> to vector<1x128xf32>
    %cst_52 = arith.constant dense<0.000000e+00> : vector<8x128xf32>
    %190 = tpu.matmul %171, %187, %cst_52 {dimension_numbers = #tpu.dot_dimension_numbers<[1], [0], [0], [1], [0, 0, 1, 1], [], []>} : vector<8x128xf32>, vector<128x128xf32>, vector<8x128xf32> -> vector<8x128xf32>
    %191 = tpu.reciprocal %189 {approx = true} : vector<1x128xf32> -> vector<1x128xf32>
    %192 = vector.broadcast %191 : vector<1x128xf32> to vector<8x128xf32>
    %193 = arith.mulf %190, %192 : vector<8x128xf32>
    %194 = tpu.concatenate %32, %55, %78, %101, %124, %147, %170, %193 in 0 : vector<8x128xf32>, vector<8x128xf32>, vector<8x128xf32>, vector<8x128xf32>, vector<8x128xf32>, vector<8x128xf32>, vector<8x128xf32>, vector<8x128xf32> -> vector<64x128xf32>
    %c0_53 = arith.constant 0 : index
    %c0_54 = arith.constant 0 : index
    %195 = vector.load %arg5[%c0_53, %c0_54] : memref<64x1xf32, #tpu.memory_space<vmem>>, vector<64x1xf32>
    %196 = vector.broadcast %195 : vector<64x1xf32> to vector<64x128xf32>
    %197 = arith.addf %194, %196 : vector<64x128xf32>
    %cst_55 = arith.constant 0.000000e+00 : f32
    %198 = vector.broadcast %cst_55 : f32 to vector<64x128xf32>
    %199 = arith.cmpf ogt, %197, %198 : vector<64x128xf32>
    %200 = math.exp %197 : vector<64x128xf32>
    %cst_56 = arith.constant 1.000000e+00 : f32
    %201 = vector.broadcast %cst_56 : f32 to vector<64x128xf32>
    %202 = arith.subf %200, %201 : vector<64x128xf32>
    %203 = arith.select %199, %197, %202 : vector<64x128xi1>, vector<64x128xf32>
    %c0_57 = arith.constant 0 : index
    %c0_58 = arith.constant 0 : index
    %204 = vector.load %arg6[%c0_57, %c0_58] : memref<8x64xf32, #tpu.memory_space<vmem>>, vector<8x64xf32>
    %cst_59 = arith.constant dense<0.000000e+00> : vector<8x128xf32>
    %205 = tpu.matmul %204, %203, %cst_59 {dimension_numbers = #tpu.dot_dimension_numbers<[1], [0], [0], [1], [0, 0, 1, 1], [], []>} : vector<8x64xf32>, vector<64x128xf32>, vector<8x128xf32> -> vector<8x128xf32>
    %206 = tpu.transpose %205, [1, 0] : vector<8x128xf32> -> vector<128x8xf32>
    %c0_60 = arith.constant 0 : index
    %c0_61 = arith.constant 0 : index
    %207 = vector.load %arg7[%c0_60, %c0_61] : memref<8x1xf32, #tpu.memory_space<vmem>>, vector<8x1xf32>
    %cst_62 = arith.constant dense<0.000000e+00> : vector<128x1xf32>
    %208 = tpu.matmul %206, %207, %cst_62 {dimension_numbers = #tpu.dot_dimension_numbers<[1], [0], [0], [1], [0, 0, 1, 1], [], []>} : vector<128x8xf32>, vector<8x1xf32>, vector<128x1xf32> -> vector<128x1xf32>
    %c0_63 = arith.constant 0 : index
    %c0_64 = arith.constant 0 : index
    %209 = vector.load %arg8[%c0_63, %c0_64] : memref<1x8xf32, #tpu.memory_space<vmem>>, vector<1x8xf32>
    %cst_65 = arith.constant dense<0.000000e+00> : vector<1x128xf32>
    %210 = tpu.matmul %209, %205, %cst_65 {dimension_numbers = #tpu.dot_dimension_numbers<[1], [0], [0], [1], [0, 0, 1, 1], [], []>} : vector<1x8xf32>, vector<8x128xf32>, vector<1x128xf32> -> vector<1x128xf32>
    %211 = vector.broadcast %208 : vector<128x1xf32> to vector<128x128xf32>
    %212 = vector.broadcast %210 : vector<1x128xf32> to vector<128x128xf32>
    %213 = arith.addf %211, %212 : vector<128x128xf32>
    %cst_66 = arith.constant 0.000000e+00 : f32
    %214 = vector.broadcast %cst_66 : f32 to vector<128x128xf32>
    %215 = arith.cmpf ogt, %213, %214 : vector<128x128xf32>
    %cst_67 = arith.constant 2.000000e-01 : f32
    %216 = vector.broadcast %cst_67 : f32 to vector<128x128xf32>
    %217 = arith.mulf %216, %213 : vector<128x128xf32>
    %218 = arith.select %215, %213, %217 : vector<128x128xi1>, vector<128x128xf32>
    %219 = arith.addf %218, %1 : vector<128x128xf32>
    %cst_68 = arith.constant dense<0xFF800000> : vector<128xf32>
    %220 = vector.multi_reduction <maximumf>, %219, %cst_68 [0] : vector<128x128xf32> to vector<128xf32>
    %221 = vector.shape_cast %220 : vector<128xf32> to vector<1x128xf32>
    %222 = vector.broadcast %221 : vector<1x128xf32> to vector<128x128xf32>
    %223 = arith.subf %219, %222 : vector<128x128xf32>
    %224 = math.exp %223 : vector<128x128xf32>
    %cst_69 = arith.constant dense<0.000000e+00> : vector<128xf32>
    %225 = vector.multi_reduction <add>, %224, %cst_69 [0] : vector<128x128xf32> to vector<128xf32>
    %226 = vector.shape_cast %225 : vector<128xf32> to vector<1x128xf32>
    %cst_70 = arith.constant dense<0.000000e+00> : vector<8x128xf32>
    %227 = tpu.matmul %205, %224, %cst_70 {dimension_numbers = #tpu.dot_dimension_numbers<[1], [0], [0], [1], [0, 0, 1, 1], [], []>} : vector<8x128xf32>, vector<128x128xf32>, vector<8x128xf32> -> vector<8x128xf32>
    %228 = tpu.reciprocal %226 {approx = true} : vector<1x128xf32> -> vector<1x128xf32>
    %229 = vector.broadcast %228 : vector<1x128xf32> to vector<8x128xf32>
    %230 = arith.mulf %227, %229 : vector<8x128xf32>
    %c0_71 = arith.constant 0 : index
    %c0_72 = arith.constant 0 : index
    %231 = vector.load %arg9[%c0_71, %c0_72] : memref<8x1xf32, #tpu.memory_space<vmem>>, vector<8x1xf32>
    %232 = vector.broadcast %231 : vector<8x1xf32> to vector<8x128xf32>
    %233 = arith.addf %230, %232 : vector<8x128xf32>
    %cst_73 = arith.constant dense<0xFF800000> : vector<128xf32>
    %234 = vector.multi_reduction <maximumf>, %233, %cst_73 [0] : vector<8x128xf32> to vector<128xf32>
    %235 = vector.shape_cast %234 : vector<128xf32> to vector<1x128xf32>
    %236 = vector.broadcast %235 : vector<1x128xf32> to vector<8x128xf32>
    %237 = arith.subf %233, %236 : vector<8x128xf32>
    %238 = math.exp %237 : vector<8x128xf32>
    %cst_74 = arith.constant dense<0.000000e+00> : vector<128xf32>
    %239 = vector.multi_reduction <add>, %238, %cst_74 [0] : vector<8x128xf32> to vector<128xf32>
    %240 = vector.shape_cast %239 : vector<128xf32> to vector<1x128xf32>
    %241 = math.log %240 : vector<1x128xf32>
    %242 = vector.broadcast %241 : vector<1x128xf32> to vector<8x128xf32>
    %243 = arith.subf %237, %242 : vector<8x128xf32>
    %c0_75 = arith.constant 0 : index
    %c0_76 = arith.constant 0 : index
    %244 = vector.load %arg11[%c0_75, %c0_76] : memref<8x128xf32, #tpu.memory_space<vmem>>, vector<8x128xf32>
    tpu.vector_store %arg11[%c0_75, %c0_76], %243 {strides = array<i32>} : memref<8x128xf32, #tpu.memory_space<vmem>>, vector<8x128xf32>,
    return
  }
}

</mosaic_0001>

<bundles_post_ra>
// kernel: gat_forward.1
= control target key start
LH: loop header
LB: loop body
LE: loop exit
PB: predicated region body
PF: predicated region fallthrough
CT: control target
= control target key end

     0   :  { %vm83_vm0 = vcmask 261120   ;;  %v7607_v6 = vmov 0.0|0.0   ;;  %vm5262_vm1 = vmmov 0   ;;  %v7605_v10 = vmov 0.0   ;;  %s7593_s0 = inlined_call_operand.vmem [shape: f32[128,32], index: 0, kind: input, shape index: {}]   ;;  %s7594_s1 = inlined_call_operand.vmem [shape: f32[32,128], index: 1, kind: input, shape index: {}]   ;;  %s7595_s2 = inlined_call_operand.vmem [shape: f32[64,32], index: 2, kind: input, shape index: {}]   ;;  %s7596_s3 = inlined_call_operand.vmem [shape: f32[32,8], index: 3, kind: input, shape index: {}]   ;;  %s7597_s4 = inlined_call_operand.vmem [shape: f32[8,32], index: 4, kind: input, shape index: {}]   ;;  %s7598_s5 = inlined_call_operand.vmem [shape: f32[64,1], index: 5, kind: input, shape index: {}]   ;;  %s7599_s6 = inlined_call_operand.vmem [shape: f32[8,64], index: 6, kind: input, shape index: {}]   ;;  %s7600_s7 = inlined_call_operand.vmem [shape: f32[8,1], index: 7, kind: input, shape index: {}]   ;;  %s7601_s8 = inlined_call_operand.vmem [shape: f32[1,8], index: 8, kind: input, shape index: {}]   ;;  %s7602_s9 = inlined_call_operand.vmem [shape: f32[8,1], index: 9, kind: input, shape index: {}]   ;;  %s7603_s10 = inlined_call_operand.vmem [shape: f32[128,128], index: 10, kind: input, shape index: {}]   ;;  %s7604_s11 = inlined_call_operand.hbm [shape: f32[8,128], index: 11, kind: output, shape index: {}]  }
   0x1   :  { %v71_v0 = vld [vmem:[%s7594_s1] sm:$0xff]  ;;  %v72_v1 = vld [vmem:[%s7594_s1 + $0x8] sm:$0xff]  ;;  %v73_v2 = vld [vmem:[%s7594_s1 + $0x10] sm:$0xff]  ;;  %4531 = vmatprep.subr.bf16.mxu0 %v7607_v6  ;;  %4147 = vmatprep.mubr.msk.f32.mxu0 %vm5262_vm1, %v7605_v10 }
   0x2   :  { %v4515_v3 = vpack.c.bf16 %v72_v1, %v71_v0  ;;  %v74_v4 = vld [vmem:[%s7594_s1 + $0x18] sm:$0xff]  ;;  %v75_v5 = vld [vmem:[%s7595_s2] sm:$0xff]  ;;  %v214_v9 = vld [vmem:[%s7596_s3 + $0x8] sm:$0xff] }
   0x3   :  { %v4519_v7 = vpack.c.bf16 %v74_v4, %v73_v2  ;;  %4095 = vmatprep.mubr.msk.f32.mxu1 %vm83_vm0, %v75_v5  ;;  %v213_v8 = vld [vmem:[%s7596_s3] sm:$0xff]  ;;  %v215_v12 = vld [vmem:[%s7596_s3 + $0x10] sm:$0xff]  ;;  %v216_v13 = vld [vmem:[%s7596_s3 + $0x18] sm:$0xff] }
   0x4   :  { %4516 = vmatprep.subr.bf16.mxu1 %v4515_v3  ;;  %4533 = vmatpush3.bf16.msra.mxu0 %v4515_v3  ;;  %v4523_v11 = vpack.c.bf16 %v214_v9, %v213_v8  ;;  %v76_v14 = vld [vmem:[%s7595_s2 + $0x8] sm:$0xff]  ;;  %v77_v15 = vld [vmem:[%s7595_s2 + $0x10] sm:$0xff]  ;;  %v4527_v16 = vpack.c.bf16 %v216_v13, %v215_v12  ;;  %v410_v17 = vld [vmem:[%s7597_s4] sm:$0xff] }
   0x5   :  { %4518 = vmatpush3.bf16.msra.mxu1 %v4515_v3  ;;  %4534 = vmatprep.subr.bf16.mxu0 %v7607_v6 }
   0x6   :  { %4520 = vmatprep.subr.bf16.mxu1 %v4519_v7 }
   0x8   :  { %4536 = vmatpush3.bf16.msra.mxu0 %v4519_v7 }
   0x9   :  { %4522 = vmatpush3.bf16.msra.mxu1 %v4519_v7  ;;  %4561 = vmatprep.subr.bf16.mxu0 %v7607_v6 }
   0xa   :  { %4524 = vmatprep.subr.bf16.mxu1 %v4523_v11 }
   0xb   :  { %4148 = vmatmul.mubr.msk.f32.vlgmr.msra.gmra.mrb[0].mxu0 %vm83_vm0, %v410_v17 }
   0xc   :  { %4096 = vmatmul.mubr.msk.f32.vlgmr.msra.gmra.mrb[0].mxu1 %vm83_vm0, %v76_v14  ;;  %4217 = vmatprep.mubr.msk.f32.mxu0 %vm5262_vm1, %v7605_v10 }
   0xd   :  { %16 = vsyncpa [#allocation3], 0  ;;  %4526 = vmatpush3.bf16.msra.mxu1 %v4523_v11  ;;  %4098 = vmatprep.mubr.msk.f32.mxu1 %vm83_vm0, %v77_v15  ;;  %v78_v18 = vld [vmem:[%s7595_s2 + $0x18] sm:$0xff]  ;;  %v79_v19 = vld [vmem:[%s7595_s2 + $0x20] sm:$0xff]  ;;  %v7615_v39 = vmov 1   ;;  %v7617_v40 = vmov 0   ;;  %v564_v47 = vlaneseq }
   0xe   :  { %4528 = vmatprep.subr.bf16.mxu1 %v4527_v16  ;;  %v80_v20 = vld [vmem:[%s7595_s2 + $0x28] sm:$0xff]  ;;  %v81_v21 = vld [vmem:[%s7595_s2 + $0x30] sm:$0xff]  ;;  %v82_v22 = vld [vmem:[%s7595_s2 + $0x38] sm:$0xff]  ;;  %4778 = vset.pattern.permute.xlu1 %v7615_v39  ;;  %v7611_v0 = vmov 3   ;;  %v7613_v1 = vmov 2   ;;  %v7609_v5 = vmov 5  }
   0xf   :  { %v55_v23 = vld [vmem:[%s7593_s0] sm:$0xff]  ;;  %v56_v24 = vld [vmem:[%s7593_s0 + $0x8] sm:$0xff]  ;;  %v57_v25 = vld [vmem:[%s7593_s0 + $0x10] sm:$0xff]  ;;  %4777 = vset.pattern.permute.xlu0 %v7617_v40  ;;  %v5483_v49 = vshrl.u32 %v564_v47, 7  ;;  %v7619_v7 = vmov 4  }
  0x10   :  { %4099 = vmatmul.mubr.msk.f32.gmra.mrb[2].mxu1 %vm83_vm0, %v78_v18  ;;  %v58_v26 = vld [vmem:[%s7593_s0 + $0x18] sm:$0xff]  ;;  %v59_v27 = vld [vmem:[%s7593_s0 + $0x20] sm:$0xff]  ;;  %v60_v28 = vld [vmem:[%s7593_s0 + $0x28] sm:$0xff] }
  0x11   :  { %4101 = vmatprep.mubr.msk.f32.mxu1 %vm83_vm0, %v79_v19  ;;  %4530 = vmatpush3.bf16.msra.mxu1 %v4527_v16  ;;  %v61_v29 = vld [vmem:[%s7593_s0 + $0x30] sm:$0xff]  ;;  %v62_v30 = vld [vmem:[%s7593_s0 + $0x38] sm:$0xff]  ;;  %v63_v31 = vld [vmem:[%s7593_s0 + $0x40] sm:$0xff]  ;;  %7742 = vst [vmem:[#allocation12_spill] sm:$0xff] %v5483_v49  ;;  %v1806_v52 = vsub.s32 4, %v5483_v49  ;;  %v2116_v53 = vsub.s32 5, %v5483_v49 }
  0x12   :  { %4537 = vmatprep.subr.bf16.mxu1 %v7607_v6  ;;  %v64_v32 = vld [vmem:[%s7593_s0 + $0x48] sm:$0xff]  ;;  %v65_v33 = vld [vmem:[%s7593_s0 + $0x50] sm:$0xff]  ;;  %v66_v34 = vld [vmem:[%s7593_s0 + $0x58] sm:$0xff]  ;;  %v2426_v54 = vsub.s32 6, %v5483_v49  ;;  %v2736_v55 = vsub.s32 7, %v5483_v49 }
  0x13   :  { %v67_v35 = vld [vmem:[%s7593_s0 + $0x60] sm:$0xff]  ;;  %v68_v36 = vld [vmem:[%s7593_s0 + $0x68] sm:$0xff]  ;;  %v69_v37 = vld [vmem:[%s7593_s0 + $0x70] sm:$0xff] }
  0x14   :  { %4102 = vmatmul.mubr.msk.f32.gmra.mrb[4].mxu1 %vm83_vm0, %v80_v20  ;;  %v70_v38 = vld [vmem:[%s7593_s0 + $0x78] sm:$0xff] }
  0x15   :  { %4104 = vmatprep.mubr.msk.f32.mxu1 %vm83_vm0, %v81_v21 }
  0x18   :  { %4105 = vmatmul.mubr.msk.f32.gmra.mrb[6].mxu1 %vm83_vm0, %v82_v22 }
  0x19   :  { %4115 = vmatprep.mubr.msk.f32.mxu1 %vm83_vm0, %v55_v23 }
  0x1c   :  { %4116 = vmatmul.mubr.msk.f32.vlgmr.msra.gmra.mrb[8].mxu1 %vm83_vm0, %v56_v24 }
  0x1d   :  { %4118 = vmatprep.mubr.msk.f32.mxu1 %vm83_vm0, %v57_v25 }
  0x20   :  { %4119 = vmatmul.mubr.msk.f32.gmra.mrb[10].mxu1 %vm83_vm0, %v58_v26 }
  0x21   :  { %4121 = vmatprep.mubr.msk.f32.mxu1 %vm83_vm0, %v59_v27  ;;  %v876_v27 = vsub.s32 1, %v5483_v49 }
  0x24   :  { %4122 = vmatmul.mubr.msk.f32.gmra.mrb[12].mxu1 %vm83_vm0, %v60_v28 }
  0x25   :  { %4124 = vmatprep.mubr.msk.f32.mxu1 %vm83_vm0, %v61_v29 }
  0x28   :  { %4125 = vmatmul.mubr.msk.f32.gmra.mrb[14].mxu1 %vm83_vm0, %v62_v30 }
  0x29   :  { %4127 = vmatprep.mubr.msk.f32.mxu1 %vm83_vm0, %v63_v31  ;;  %v1496_v31 = vsub.s32 3, %v5483_v49 }
  0x2c   :  { %4128 = vmatmul.mubr.msk.f32.gmra.mrb[16].mxu1 %vm83_vm0, %v64_v32 }
  0x2d   :  { %4130 = vmatprep.mubr.msk.f32.mxu1 %vm83_vm0, %v65_v33 }
  0x30   :  { %4131 = vmatmul.mubr.msk.f32.gmra.mrb[18].mxu1 %vm83_vm0, %v66_v34 }
  0x31   :  { %4133 = vmatprep.mubr.msk.f32.mxu1 %vm83_vm0, %v67_v35 }
  0x34   :  { %4134 = vmatmul.mubr.msk.f32.gmra.mrb[20].mxu1 %vm83_vm0, %v68_v36 }
  0x35   :  { %4136 = vmatprep.mubr.msk.f32.mxu1 %vm83_vm0, %v69_v37 }
  0x38   :  { %4137 = vmatmul.mubr.msk.f32.gmra.mrb[22].mxu1 %vm83_vm0, %v70_v38 }
  0x39   :  { %4182 = vmatprep.mubr.msk.f32.mxu1 %vm5262_vm1, %v7605_v10  ;;  %v5706_v10 = vld [vmem:[%s7603_s10] sm:$0xff] }
  0xde   :  { %v5487_v51 = vpop.f32.mrb[0].mxu0 }
  0xdf   :  { %v5469_v41 = vpop.f32.mrb[0].mxu1  ;;  %v4149_v56 = vpop.f32.mrb[1].mxu0  ;;  %v5496_v58 = vrot.slane %v5487_v51, %v1806_v52  ;;  %v5499_v59 = vrot.slane %v5487_v51, %v2116_v53  ;;  %v5502_v60 = vrot.slane %v5487_v51, %v2426_v54  ;;  %v5505_v61 = vrot.slane %v5487_v51, %v2736_v55 }
  0xe0   :  { %7735 = vst [vmem:[#allocation5_spill] sm:$0xff] %v5469_v41  ;;  %v5471_v42 = vpop.f32.mrb[1].mxu1  ;;  %v5671_v30 = vrot.slane %v5487_v51, %v876_v27  ;;  %v5680_v35 = vrot.slane %v5487_v51, %v1496_v31 }
  0xe1   :  { %7736 = vst [vmem:[#allocation6_spill] sm:$0xff] %v5471_v42  ;;  %7744 = vst [vmem:[#allocation14_spill] sm:$0xff] %v5502_v60 }
  0xe2   :  { %7745 = vst [vmem:[#allocation15_spill] sm:$0xff] %v5505_v61  ;;  %7747 = vst [vmem:[#allocation17_spill] sm:$0xff] %v5680_v35 }
  0xe3   :  { %v5473_v43 = vpop.f32.mrb[2].mxu1 }
  0xe4   :  { %7737 = vst [vmem:[#allocation7_spill] sm:$0xff] %v5473_v43  ;;  %v5475_v44 = vpop.f32.mrb[3].mxu1 }
  0xe5   :  { %7738 = vst [vmem:[#allocation8_spill] sm:$0xff] %v5475_v44 }
  0xe7   :  { %v5477_v45 = vpop.f32.mrb[4].mxu1 }
  0xe8   :  { %7739 = vst [vmem:[#allocation9_spill] sm:$0xff] %v5477_v45  ;;  %v5479_v46 = vpop.f32.mrb[5].mxu1 }
  0xe9   :  { %7740 = vst [vmem:[#allocation10_spill] sm:$0xff] %v5479_v46 }
  0xeb   :  { %v5481_v48 = vpop.f32.mrb[6].mxu1 }
  0xec   :  { %7741 = vst [vmem:[#allocation11_spill] sm:$0xff] %v5481_v48  ;;  %v5485_v50 = vpop.f32.mrb[7].mxu1 }
  0xed   :  { %7743 = vst [vmem:[#allocation13_spill] sm:$0xff] %v5485_v50 }
  0xef   :  { %v5493_v57 = vpop.f32.mrb[8].mxu1 }
  0xf0   :  { %815 = vperm.xlu1 %4778, %v5493_v57   ;;  %491 = vperm.xlu0 %4777, %v5493_v57   ;;  %v5509_v62 = vpop.f32.mrb[9].mxu1 }
  0xf3   :  { %v5511_v63 = vpop.f32.mrb[10].mxu1 }
  0xf4   :  { %4780 = vset.pattern.permute.xlu1 %v7611_v0  ;;  %4779 = vset.pattern.permute.xlu0 %v7613_v1  ;;  %v5515_v2 = vpop.f32.mrb[11].mxu1 }
  0xf5   :  { %1435 = vperm.xlu1 %4780, %v5493_v57   ;;  %1125 = vperm.xlu0 %4779, %v5493_v57  }
  0xf7   :  { %v5519_v3 = vpop.f32.mrb[12].mxu1 }
  0xf8   :  { %v5521_v4 = vpop.f32.mrb[13].mxu1 }
  0xf9   :  { %4782 = vset.pattern.permute.xlu1 %v7609_v5  ;;  %4781 = vset.pattern.permute.xlu0 %v7619_v7 }
  0xfa   :  { %2055 = vperm.xlu1 %4782, %v5493_v57   ;;  %1745 = vperm.xlu0 %4781, %v5493_v57  }
  0xfb   :  { %v5527_v8 = vpop.f32.mrb[14].mxu1 }
  0xfc   :  { %v5529_v9 = vpop.f32.mrb[15].mxu1 }
  0xfe   :  { %4785 = vset.pattern.permute.xlu1 %v7613_v1  ;;  %4783 = vset.pattern.permute.xlu0 %v7617_v40 }
  0xff   :  { %1121 = vperm.xlu1 %4785, %v5509_v62   ;;  %486 = vperm.xlu0 %4783, %v5509_v62   ;;  %v5535_v11 = vpop.f32.mrb[16].mxu1 }
 0x100   :  { %v5537_v12 = vpop.f32.mrb[17].mxu1 }
 0x103   :  { %4787 = vset.pattern.permute.xlu1 %v7619_v7  ;;  %4784 = vset.pattern.permute.xlu0 %v7615_v39  ;;  %v5541_v13 = vpop.f32.mrb[18].mxu1 }
 0x104   :  { %1741 = vperm.xlu1 %4787, %v5509_v62   ;;  %811 = vperm.xlu0 %4784, %v5509_v62   ;;  %v5545_v14 = vpop.f32.mrb[19].mxu1 }
 0x107   :  { %v5547_v15 = vpop.f32.mrb[20].mxu1 }
 0x108   :  { %4789 = vset.pattern.permute.xlu1 %v7617_v40  ;;  %4786 = vset.pattern.permute.xlu0 %v7611_v0  ;;  %v5551_v16 = vpop.f32.mrb[21].mxu1 }
 0x109   :  { %1431 = vperm.xlu0 %4786, %v5509_v62   ;;  %501 = vperm.xlu1 %4789, %v5511_v63  }
 0x10b   :  { %v5559_v17 = vpop.f32.mrb[22].mxu1 }
 0x10c   :  { %v5617_v18 = vpop.f32.mrb[23].mxu1 }
 0x10d   :  { %4788 = vset.pattern.permute.xlu0 %v7609_v5  ;;  %4791 = vset.pattern.permute.xlu1 %v7613_v1 }
 0x10e   :  { %2051 = vperm.xlu0 %4788, %v5509_v62   ;;  %1133 = vperm.xlu1 %4791, %v5511_v63  }
 0x112   :  { %4790 = vset.pattern.permute.xlu0 %v7615_v39  ;;  %4793 = vset.pattern.permute.xlu1 %v7619_v7 }
 0x113   :  { %823 = vperm.xlu0 %4790, %v5511_v63   ;;  %1753 = vperm.xlu1 %4793, %v5511_v63  }
 0x117   :  { %4792 = vset.pattern.permute.xlu0 %v7611_v0  ;;  %4795 = vset.pattern.permute.xlu1 %v7617_v40 }
 0x118   :  { %1443 = vperm.xlu0 %4792, %v5511_v63   ;;  %496 = vperm.xlu1 %4795, %v5515_v2  }
 0x11c   :  { %4794 = vset.pattern.permute.xlu0 %v7609_v5  ;;  %4796 = vset.pattern.permute.xlu1 %v7615_v39 }
 0x11d   :  { %2063 = vperm.xlu0 %4794, %v5511_v63   ;;  %819 = vperm.xlu1 %4796, %v5515_v2  }
 0x121   :  { %4802 = vset.pattern.permute.xlu0 %v7615_v39  ;;  %4797 = vset.pattern.permute.xlu1 %v7613_v1 }
 0x122   :  { %1129 = vperm.xlu1 %4797, %v5515_v2   ;;  %831 = vperm.xlu0 %4802, %v5519_v3  }
 0x126   :  { %4798 = vset.pattern.permute.xlu1 %v7611_v0  ;;  %4805 = vset.pattern.permute.xlu0 %v7609_v5 }
 0x127   :  { %1439 = vperm.xlu1 %4798, %v5515_v2   ;;  %2071 = vperm.xlu0 %4805, %v5519_v3  }
 0x12b   :  { %4799 = vset.pattern.permute.xlu1 %v7619_v7  ;;  %4806 = vset.pattern.permute.xlu0 %v7617_v40 }
 0x12c   :  { %1749 = vperm.xlu1 %4799, %v5515_v2   ;;  %506 = vperm.xlu0 %4806, %v5521_v4  }
 0x130   :  { %4800 = vset.pattern.permute.xlu1 %v7609_v5  ;;  %4808 = vset.pattern.permute.xlu0 %v7613_v1 }
 0x131   :  { %2059 = vperm.xlu1 %4800, %v5515_v2   ;;  %1137 = vperm.xlu0 %4808, %v5521_v4  }
 0x135   :  { %4801 = vset.pattern.permute.xlu1 %v7617_v40  ;;  %4810 = vset.pattern.permute.xlu0 %v7619_v7 }
 0x136   :  { %511 = vperm.xlu1 %4801, %v5519_v3   ;;  %1757 = vperm.xlu0 %4810, %v5521_v4  }
 0x13a   :  { %4803 = vset.pattern.permute.xlu1 %v7613_v1  ;;  %4813 = vset.pattern.permute.xlu0 %v7615_v39 }
 0x13b   :  { %1141 = vperm.xlu1 %4803, %v5519_v3   ;;  %839 = vperm.xlu0 %4813, %v5527_v8  }
 0x13f   :  { %4804 = vset.pattern.permute.xlu1 %v7619_v7  ;;  %4816 = vset.pattern.permute.xlu0 %v7609_v5 }
 0x140   :  { %1761 = vperm.xlu1 %4804, %v5519_v3   ;;  %2079 = vperm.xlu0 %4816, %v5527_v8  }
 0x144   :  { %4807 = vset.pattern.permute.xlu1 %v7615_v39  ;;  %4817 = vset.pattern.permute.xlu0 %v7617_v40 }
 0x145   :  { %827 = vperm.xlu1 %4807, %v5521_v4   ;;  %516 = vperm.xlu0 %4817, %v5529_v9  }
 0x149   :  { %4809 = vset.pattern.permute.xlu1 %v7611_v0  ;;  %4819 = vset.pattern.permute.xlu0 %v7613_v1 }
 0x14a   :  { %1447 = vperm.xlu1 %4809, %v5521_v4   ;;  %1145 = vperm.xlu0 %4819, %v5529_v9  }
 0x14e   :  { %4811 = vset.pattern.permute.xlu1 %v7609_v5  ;;  %4821 = vset.pattern.permute.xlu0 %v7619_v7 }
 0x14f   :  { %2067 = vperm.xlu1 %4811, %v5521_v4   ;;  %1765 = vperm.xlu0 %4821, %v5529_v9  }
 0x153   :  { %4812 = vset.pattern.permute.xlu1 %v7617_v40  ;;  %4823 = vset.pattern.permute.xlu0 %v7617_v40 }
 0x154   :  { %521 = vperm.xlu1 %4812, %v5527_v8   ;;  %531 = vperm.xlu0 %4823, %v5535_v11  }
 0x158   :  { %4814 = vset.pattern.permute.xlu1 %v7613_v1  ;;  %4825 = vset.pattern.permute.xlu0 %v7613_v1 }
 0x159   :  { %1149 = vperm.xlu1 %4814, %v5527_v8   ;;  %1157 = vperm.xlu0 %4825, %v5535_v11  }
 0x15d   :  { %4815 = vset.pattern.permute.xlu1 %v7619_v7  ;;  %4827 = vset.pattern.permute.xlu0 %v7619_v7 }
 0x15e   :  { %1769 = vperm.xlu1 %4815, %v5527_v8   ;;  %1777 = vperm.xlu0 %4827, %v5535_v11  }
 0x162   :  { %4818 = vset.pattern.permute.xlu1 %v7615_v39  ;;  %4830 = vset.pattern.permute.xlu0 %v7615_v39 }
 0x163   :  { %835 = vperm.xlu1 %4818, %v5529_v9   ;;  %843 = vperm.xlu0 %4830, %v5537_v12  }
 0x167   :  { %4820 = vset.pattern.permute.xlu1 %v7611_v0  ;;  %4833 = vset.pattern.permute.xlu0 %v7609_v5 }
 0x168   :  { %1455 = vperm.xlu1 %4820, %v5529_v9   ;;  %2083 = vperm.xlu0 %4833, %v5537_v12  }
 0x16c   :  { %4822 = vset.pattern.permute.xlu1 %v7609_v5  ;;  %4835 = vset.pattern.permute.xlu0 %v7615_v39 }
 0x16d   :  { %2075 = vperm.xlu1 %4822, %v5529_v9   ;;  %855 = vperm.xlu0 %4835, %v5541_v13  }
 0x16f   :  { %v816_v19 = vpop.permute.xlu1 %815  ;;  %v5639_v20 = vpop.permute.xlu0 %491 }
 0x170   :  { %v879_v36 = vadd.f32 %v5671_v30, %v816_v19 }
 0x171   :  { %4824 = vset.pattern.permute.xlu1 %v7615_v39  ;;  %4838 = vset.pattern.permute.xlu0 %v7609_v5 }
 0x172   :  { %847 = vperm.xlu1 %4824, %v5535_v11   ;;  %2095 = vperm.xlu0 %4838, %v5541_v13   ;;  %v911_v52 = vmul.f32 0.2, %v879_v36  ;;  %vm895_vm3 = vcmp.gt.f32.partialorder %v879_v36, 0.0 }
 0x174   :  { %v1436_v21 = vpop.permute.xlu1 %1435  ;;  %v5645_v22 = vpop.permute.xlu0 %1125  ;;  %v927_v56 = vsel %vm895_vm3, %v879_v36, %v911_v52  ;;  %v1186_v52 = vsub.s32 2, %v5483_v49 }
 0x175   :  { %v1499_v53 = vadd.f32 %v5680_v35, %v1436_v21  ;;  %v5700_v21 = vld [vmem:[%s7603_s10 + $0x8] sm:$0xff] }
 0x176   :  { %4826 = vset.pattern.permute.xlu1 %v7611_v0  ;;  %4845 = vset.pattern.permute.xlu0 %v7617_v40 }
 0x177   :  { %1467 = vperm.xlu1 %4826, %v5535_v11   ;;  %551 = vperm.xlu0 %4845, %v5547_v15   ;;  %v1531_v19 = vmul.f32 0.2, %v1499_v53  ;;  %vm1515_vm5 = vcmp.gt.f32.partialorder %v1499_v53, 0.0 }
 0x179   :  { %v2056_v23 = vpop.permute.xlu1 %2055  ;;  %v5651_v24 = vpop.permute.xlu0 %1745  ;;  %v1547_v6 = vsel %vm1515_vm5, %v1499_v53, %v1531_v19  ;;  %v7753_v19 = vmov 4  }
 0x17b   :  { %4828 = vset.pattern.permute.xlu1 %v7609_v5  ;;  %4847 = vset.pattern.permute.xlu0 %v7613_v1 }
 0x17c   :  { %2087 = vperm.xlu1 %4828, %v5535_v11   ;;  %1173 = vperm.xlu0 %4847, %v5547_v15  }
 0x17e   :  { %v5657_v25 = vpop.permute.xlu1 %1121  ;;  %v5659_v26 = vpop.permute.xlu0 %486 }
 0x180   :  { %4829 = vset.pattern.permute.xlu1 %v7617_v40  ;;  %4849 = vset.pattern.permute.xlu0 %v7619_v7 }
 0x181   :  { %526 = vperm.xlu1 %4829, %v5537_v12   ;;  %1793 = vperm.xlu0 %4849, %v5547_v15  }
 0x183   :  { %v5666_v28 = vpop.permute.xlu1 %1741  ;;  %v812_v29 = vpop.permute.xlu0 %811 }
 0x184   :  { %v878_v34 = vadd.f32 %v5671_v30, %v812_v29 }
 0x185   :  { %4831 = vset.pattern.permute.xlu1 %v7613_v1  ;;  %4851 = vset.pattern.permute.xlu0 %v7615_v39 }
 0x186   :  { %1153 = vperm.xlu1 %4831, %v5537_v12   ;;  %859 = vperm.xlu0 %4851, %v5551_v16   ;;  %v910_v37 = vmul.f32 0.2, %v878_v34  ;;  %vm894_vm2 = vcmp.gt.f32.partialorder %v878_v34, 0.0 }
 0x188   :  { %v1432_v32 = vpop.permute.xlu0 %1431  ;;  %v5676_v33 = vpop.permute.xlu1 %501  ;;  %v926_v55 = vsel %vm894_vm2, %v878_v34, %v910_v37 }
 0x189   :  { %7746 = vst [vmem:[#allocation16_spill] sm:$0xff] %v5676_v33  ;;  %v1498_v54 = vadd.f32 %v5680_v35, %v1432_v32  ;;  %v2119_v32 = vadd.f32 %v5499_v59, %v2056_v23  ;;  %v5711_v37 = vadd.f32 %v926_v55, %v5706_v10  ;;  %v5724_v55 = vld [vmem:[%s7603_s10 + $0x18] sm:$0xff] }
 0x18a   :  { %4832 = vset.pattern.permute.xlu1 %v7619_v7  ;;  %4854 = vset.pattern.permute.xlu0 %v7609_v5 }
 0x18b   :  { %1773 = vperm.xlu1 %4832, %v5537_v12   ;;  %2099 = vperm.xlu0 %4854, %v5551_v16   ;;  %v1530_v27 = vmul.f32 0.2, %v1498_v54  ;;  %vm1514_vm4 = vcmp.gt.f32.partialorder %v1498_v54, 0.0  ;;  %7748 = vst [vmem:[#allocation18_spill] sm:$0xff] %v5711_v37  ;;  %v2151_v5 = vmul.f32 0.2, %v2119_v32 }
 0x18c   :  { %vm2135_vm8 = vcmp.gt.f32.partialorder %v2119_v32, 0.0 }
 0x18d   :  { %v2052_v38 = vpop.permute.xlu0 %2051  ;;  %v5687_v47 = vpop.permute.xlu1 %1133 }
 0x18e   :  { %v2118_v34 = vadd.f32 %v5499_v59, %v2052_v38  ;;  %v5719_v38 = vadd.f32 %v927_v56, %v5700_v21 }
 0x18f   :  { %4834 = vset.pattern.permute.xlu1 %v7617_v40  ;;  %4856 = vset.pattern.permute.xlu0 %v7615_v39 }
 0x190   :  { %541 = vperm.xlu1 %4834, %v5541_v13   ;;  %871 = vperm.xlu0 %4856, %v5559_v17   ;;  %7749 = vst [vmem:[#allocation19_spill] sm:$0xff] %v5719_v38  ;;  %v959_v7 = vmax.f32 %v5719_v38, %v5711_v37  ;;  %vm2134_vm7 = vcmp.gt.f32.partialorder %v2118_v34, 0.0 }
 0x192   :  { %v824_v29 = vpop.permute.xlu0 %823  ;;  %v5695_v31 = vpop.permute.xlu1 %1753 }
 0x193   :  { %v881_v36 = vadd.f32 %v5671_v30, %v824_v29  ;;  %v1546_v29 = vsel %vm1514_vm4, %v1498_v54, %v1530_v27 }
 0x194   :  { %4836 = vset.pattern.permute.xlu1 %v7613_v1  ;;  %4857 = vset.pattern.permute.xlu0 %v7611_v0  ;;  %v2150_v0 = vmul.f32 0.2, %v2118_v34  ;;  %v5735_v54 = vadd.f32 %v1546_v29, %v5706_v10  ;;  %v2167_v29 = vsel %vm2135_vm8, %v2119_v32, %v2151_v5 }
 0x195   :  { %vm897_vm6 = vcmp.gt.f32.partialorder %v881_v36, 0.0  ;;  %v913_v23 = vmul.f32 0.2, %v881_v36  ;;  %1165 = vperm.xlu1 %4836, %v5541_v13   ;;  %1451 = vperm.xlu0 %4857, %v5519_v3  }
 0x196   :  { %7752 = vst [vmem:[#allocation22_spill] sm:$0xff] %v5735_v54 }
 0x197   :  { %v929_v1 = vsel %vm897_vm6, %v881_v36, %v913_v23  ;;  %v1444_v39 = vpop.permute.xlu0 %1443  ;;  %v5726_v40 = vpop.permute.xlu1 %496  ;;  %v2166_v23 = vsel %vm2134_vm7, %v2118_v34, %v2150_v0  ;;  %v7757_v0 = vmov 0  }
 0x198   :  { %7750 = vst [vmem:[#allocation20_spill] sm:$0xff] %v5726_v40  ;;  %v5731_v56 = vadd.f32 %v929_v1, %v5724_v55  ;;  %v1501_v53 = vadd.f32 %v5680_v35, %v1444_v39  ;;  %v5744_v1 = vadd.f32 %v1547_v6, %v5700_v21  ;;  %v5747_v39 = vrot.slane %v5487_v51, %v1186_v52 }
 0x199   :  { %4837 = vset.pattern.permute.xlu1 %v7753_v19  ;;  %1459 = vperm.xlu0 %4857, %v5527_v8   ;;  %v5758_v6 = vadd.f32 %v2166_v23, %v5706_v10 }
 0x19a   :  { %7751 = vst [vmem:[#allocation21_spill] sm:$0xff] %v5731_v56  ;;  %v5740_v27 = vmax.f32 %v5731_v56, %v959_v7  ;;  %vm1517_vm9 = vcmp.gt.f32.partialorder %v1501_v53, 0.0  ;;  %v1533_v36 = vmul.f32 0.2, %v1501_v53  ;;  %1785 = vperm.xlu1 %4837, %v5541_v13   ;;  %7754 = vst [vmem:[#allocation23_spill] sm:$0xff] %v5744_v1  ;;  %v1578_v46 = vmax.f32 %v5735_v54, %v5744_v1 }
 0x19b   :  { %7756 = vst [vmem:[#allocation25_spill] sm:$0xff] %v5758_v6  ;;  %v1808_v1 = vadd.f32 %v5496_v58, %v5666_v28 }
 0x19c   :  { %v1549_v48 = vsel %vm1517_vm9, %v1501_v53, %v1533_v36  ;;  %v2064_v50 = vpop.permute.xlu0 %2063  ;;  %v820_v45 = vpop.permute.xlu1 %819  ;;  %v5776_v36 = vld [vmem:[%s7603_s10 + $0x10] sm:$0xff] }
 0x19d   :  { %v5752_v7 = vadd.f32 %v1549_v48, %v5724_v55  ;;  %v2121_v43 = vadd.f32 %v5499_v59, %v2064_v50  ;;  %v880_v44 = vadd.f32 %v5671_v30, %v820_v45  ;;  %1463 = vperm.xlu0 %4857, %v5537_v12   ;;  %v5766_v48 = vadd.f32 %v2167_v29, %v5700_v21 }
 0x19e   :  { %4839 = vset.pattern.permute.xlu1 %v7757_v0  ;;  %v1189_v45 = vadd.f32 %v5747_v39, %v5645_v22  ;;  %v1840_v38 = vmul.f32 0.2, %v1808_v1  ;;  %vm1824_vm3 = vcmp.gt.f32.partialorder %v1808_v1, 0.0 }
 0x19f   :  { %7755 = vst [vmem:[#allocation24_spill] sm:$0xff] %v5752_v7  ;;  %v5762_v5 = vmax.f32 %v5752_v7, %v1578_v46  ;;  %vm2137_vm10 = vcmp.gt.f32.partialorder %v2121_v43, 0.0  ;;  %v2153_v32 = vmul.f32 0.2, %v2121_v43  ;;  %vm896_vm11 = vcmp.gt.f32.partialorder %v880_v44, 0.0  ;;  %536 = vperm.xlu1 %4839, %v5545_v14   ;;  %7758 = vst [vmem:[#allocation26_spill] sm:$0xff] %v5766_v48 }
 0x1a0   :  { %v912_v50 = vmul.f32 0.2, %v880_v44  ;;  %v2199_v46 = vmax.f32 %v5766_v48, %v5758_v6  ;;  %v1221_v6 = vmul.f32 0.2, %v1189_v45  ;;  %vm1205_vm13 = vcmp.gt.f32.partialorder %v1189_v45, 0.0 }
 0x1a1   :  { %v2169_v34 = vsel %vm2137_vm10, %v2121_v43, %v2153_v32  ;;  %v1130_v52 = vpop.permute.xlu1 %1129  ;;  %v832_v53 = vpop.permute.xlu0 %831  ;;  %1475 = vperm.xlu0 %4857, %v5541_v13   ;;  %v1188_v43 = vadd.f32 %v5747_v39, %v5657_v25  ;;  %v7761_v32 = vmov 1  }
 0x1a2   :  { %v5779_v23 = vadd.f32 %v2169_v34, %v5724_v55  ;;  %v928_v29 = vsel %vm896_vm11, %v880_v44, %v912_v50  ;;  %v883_v41 = vadd.f32 %v5671_v30, %v832_v53  ;;  %v5797_v50 = vld [vmem:[%s7603_s10 + $0x28] sm:$0xff]  ;;  %v1809_v34 = vadd.f32 %v5496_v58, %v5651_v24 }
 0x1a3   :  { %v5785_v22 = vadd.f32 %v928_v29, %v5776_v36  ;;  %4840 = vset.pattern.permute.xlu1 %v7761_v32  ;;  %v1191_v53 = vadd.f32 %v5747_v39, %v5687_v47  ;;  %vm1204_vm14 = vcmp.gt.f32.partialorder %v1188_v43, 0.0  ;;  %v1190_v54 = vadd.f32 %v5747_v39, %v1130_v52 }
 0x1a4   :  { %7759 = vst [vmem:[#allocation27_spill] sm:$0xff] %v5779_v23  ;;  %v5789_v48 = vmax.f32 %v5779_v23, %v2199_v46  ;;  %vm899_vm12 = vcmp.gt.f32.partialorder %v883_v41, 0.0  ;;  %851 = vperm.xlu1 %4840, %v5545_v14   ;;  %v915_v25 = vmul.f32 0.2, %v883_v41  ;;  %v1220_v23 = vmul.f32 0.2, %v1188_v43 }
 0x1a5   :  { %7760 = vst [vmem:[#allocation28_spill] sm:$0xff] %v5785_v22  ;;  %v958_v44 = vmax.f32 %v5785_v22, %v5740_v27  ;;  %1479 = vperm.xlu0 %4857, %v5551_v16   ;;  %v7763_v24 = vmov 2   ;;  %v1237_v47 = vsel %vm1205_vm13, %v1189_v45, %v1221_v6  ;;  %vm1207_vm2 = vcmp.gt.f32.partialorder %v1191_v53, 0.0 }
 0x1a6   :  { %v1440_v46 = vpop.permute.xlu1 %1439  ;;  %v2072_v29 = vpop.permute.xlu0 %2071  ;;  %v931_v42 = vsel %vm899_vm12, %v883_v41, %v915_v25  ;;  %v1223_v41 = vmul.f32 0.2, %v1191_v53  ;;  %v1811_v25 = vadd.f32 %v5496_v58, %v5695_v31  ;;  %v1222_v37 = vmul.f32 0.2, %v1190_v54 }
 0x1a7   :  { %v1500_v27 = vadd.f32 %v5680_v35, %v1440_v46  ;;  %v2123_v7 = vadd.f32 %v5499_v59, %v2072_v29  ;;  %v5810_v56 = vadd.f32 %v931_v42, %v5797_v50  ;;  %v1841_v42 = vmul.f32 0.2, %v1809_v34 }
 0x1a8   :  { %4841 = vset.pattern.permute.xlu1 %v7763_v24  ;;  %v1236_v46 = vsel %vm1204_vm14, %v1188_v43, %v1220_v23  ;;  %vm1206_vm4 = vcmp.gt.f32.partialorder %v1190_v54, 0.0  ;;  %v7767_v23 = vmov 3   ;;  %v7768_v43 = vmov 5  }
 0x1a9   :  { %7762 = vst [vmem:[#allocation29_spill] sm:$0xff] %v5810_v56  ;;  %vm1516_vm15 = vcmp.gt.f32.partialorder %v1500_v27, 0.0  ;;  %v1532_v22 = vmul.f32 0.2, %v1500_v27  ;;  %vm2139_vm0 = vcmp.gt.f32.partialorder %v2123_v7, 0.0  ;;  %1161 = vperm.xlu1 %4841, %v5545_v14   ;;  %1491 = vperm.xlu0 %4857, %v5559_v17   ;;  %v5818_v28 = vmax.f32 %v5810_v56, %v958_v44 }
 0x1aa   :  { %v2155_v52 = vmul.f32 0.2, %v2123_v7  ;;  %v1843_v56 = vmul.f32 0.2, %v1811_v25  ;;  %vm1825_vm5 = vcmp.gt.f32.partialorder %v1809_v34, 0.0  ;;  %vm1827_vm6 = vcmp.gt.f32.partialorder %v1811_v25, 0.0 }
 0x1ab   :  { %v1548_v6 = vsel %vm1516_vm15, %v1500_v27, %v1532_v22  ;;  %v1750_v45 = vpop.permute.xlu1 %1749  ;;  %v5821_v29 = vpop.permute.xlu0 %506  ;;  %v5834_v22 = vadd.f32 %v1236_v46, %v5706_v10  ;;  %v1239_v27 = vsel %vm1207_vm2, %v1191_v53, %v1223_v41  ;;  %v1238_v53 = vsel %vm1206_vm4, %v1190_v54, %v1222_v37 }
 0x1ac   :  { %7764 = vst [vmem:[#allocation30_spill] sm:$0xff] %v5821_v29  ;;  %v5824_v61 = vadd.f32 %v1548_v6, %v5776_v36  ;;  %v2171_v60 = vsel %vm2139_vm0, %v2123_v7, %v2155_v52  ;;  %v1810_v44 = vadd.f32 %v5496_v58, %v1750_v45  ;;  %v5843_v7 = vadd.f32 %v1237_v47, %v5700_v21 }
 0x1ad   :  { %v5828_v31 = vadd.f32 %v2171_v60, %v5797_v50  ;;  %4842 = vset.pattern.permute.xlu1 %v7767_v23  ;;  %4863 = vset.pattern.permute.xlu0 %v7768_v43  ;;  %7769 = vst [vmem:[#allocation33_spill] sm:$0xff] %v5834_v22  ;;  %v1856_v52 = vsel %vm1824_vm3, %v1808_v1, %v1840_v38  ;;  %v7634_v38 = vmov 6  }
 0x1ae   :  { %7765 = vst [vmem:[#allocation31_spill] sm:$0xff] %v5824_v61  ;;  %1471 = vperm.xlu1 %4842, %v5545_v14   ;;  %2111 = vperm.xlu0 %4863, %v5559_v17   ;;  %7770 = vst [vmem:[#allocation34_spill] sm:$0xff] %v5843_v7  ;;  %v5848_v45 = vadd.f32 %v1239_v27, %v5724_v55  ;;  %v1842_v6 = vmul.f32 0.2, %v1810_v44  ;;  %v1857_v33 = vsel %vm1825_vm5, %v1809_v34, %v1841_v42 }
 0x1af   :  { %7766 = vst [vmem:[#allocation32_spill] sm:$0xff] %v5828_v31  ;;  %v2198_v60 = vmax.f32 %v5828_v31, %v5789_v48  ;;  %v1268_v48 = vmax.f32 %v5834_v22, %v5843_v7  ;;  %v1859_v47 = vsel %vm1827_vm6, %v1811_v25, %v1843_v56  ;;  %vm1826_vm7 = vcmp.gt.f32.partialorder %v1810_v44, 0.0 }
 0x1b0   :  { %v2060_v41 = vpop.permute.xlu1 %2059  ;;  %v1138_v46 = vpop.permute.xlu0 %1137  ;;  %7771 = vst [vmem:[#allocation35_spill] sm:$0xff] %v5848_v45  ;;  %v5857_v37 = vadd.f32 %v1238_v53, %v5776_v36  ;;  %v5862_v1 = vadd.f32 %v1856_v52, %v5706_v10  ;;  %v5865_v34 = vadd.f32 %v1857_v33, %v5700_v21  ;;  %v1858_v42 = vsel %vm1826_vm7, %v1810_v44, %v1842_v6 }
 0x1b1   :  { %v2120_v29 = vadd.f32 %v5499_v59, %v2060_v41  ;;  %v1192_v40 = vadd.f32 %v5747_v39, %v1138_v46  ;;  %v1269_v25 = vmax.f32 %v5848_v45, %v1268_v48  ;;  %v5871_v46 = vadd.f32 %v1859_v47, %v5724_v55 }
 0x1b2   :  { %4843 = vset.pattern.permute.xlu1 %v7753_v19  ;;  %4865 = vset.pattern.permute.xlu0 %v7634_v38  ;;  %7772 = vst [vmem:[#allocation36_spill] sm:$0xff] %v5857_v37  ;;  %7773 = vst [vmem:[#allocation37_spill] sm:$0xff] %v5862_v1  ;;  %v5876_v38 = vld [vmem:[%s7603_s10 + $0x20] sm:$0xff]  ;;  %v1888_v55 = vmax.f32 %v5862_v1, %v5865_v34  ;;  %v5891_v6 = vadd.f32 %v1858_v42, %v5776_v36 }
 0x1b3   :  { %vm2136_vm8 = vcmp.gt.f32.partialorder %v2120_v29, 0.0  ;;  %v2152_v54 = vmul.f32 0.2, %v2120_v29  ;;  %vm1208_vm9 = vcmp.gt.f32.partialorder %v1192_v40, 0.0  ;;  %1781 = vperm.xlu1 %4843, %v5545_v14   ;;  %2365 = vperm.xlu0 %4865, %v5493_v57   ;;  %v1224_v56 = vmul.f32 0.2, %v1192_v40 }
 0x1b4   :  { %7774 = vst [vmem:[#allocation38_spill] sm:$0xff] %v5865_v34  ;;  %7775 = vst [vmem:[#allocation39_spill] sm:$0xff] %v5871_v46  ;;  %v1270_v44 = vmax.f32 %v5857_v37, %v1269_v25  ;;  %v1889_v47 = vmax.f32 %v5871_v46, %v1888_v55 }
 0x1b5   :  { %v2168_v27 = vsel %vm2136_vm8, %v2120_v29, %v2152_v54  ;;  %v5868_v53 = vpop.permute.xlu1 %511  ;;  %v1758_v41 = vpop.permute.xlu0 %1757  ;;  %v1240_v33 = vsel %vm1208_vm9, %v1192_v40, %v1224_v56  ;;  %7778 = vst [vmem:[#allocation42_spill] sm:$0xff] %v5891_v6 }
 0x1b6   :  { %v5879_v10 = vadd.f32 %v2168_v27, %v5776_v36  ;;  %v1812_v21 = vadd.f32 %v5496_v58, %v1758_v41  ;;  %v5884_v29 = vadd.f32 %v1240_v33, %v5876_v38 }
 0x1b7   :  { %4844 = vset.pattern.permute.xlu1 %v7768_v43  ;;  %2377 = vperm.xlu0 %4865, %v5521_v4  }
 0x1b8   :  { %7776 = vst [vmem:[#allocation40_spill] sm:$0xff] %v5879_v10  ;;  %7777 = vst [vmem:[#allocation41_spill] sm:$0xff] %v5884_v29  ;;  %v5894_v52 = vmax.f32 %v2198_v60, %v5879_v10  ;;  %vm1828_vm10 = vcmp.gt.f32.partialorder %v1812_v21, 0.0  ;;  %2091 = vperm.xlu1 %4844, %v5545_v14   ;;  %v5898_v40 = vmax.f32 %v5884_v29, %v1270_v44  ;;  %v1844_v48 = vmul.f32 0.2, %v1812_v21 }
 0x1b9   :  { %v1890_v60 = vmax.f32 %v5891_v6, %v1889_v47 }
 0x1ba   :  { %v1142_v54 = vpop.permute.xlu1 %1141  ;;  %v840_v56 = vpop.permute.xlu0 %839  ;;  %v1860_v25 = vsel %vm1828_vm10, %v1812_v21, %v1844_v48  ;;  %v5916_v21 = vld [vmem:[%s7603_s10 + $0x38] sm:$0xff] }
 0x1bb   :  { %v1193_v27 = vadd.f32 %v5747_v39, %v1142_v54  ;;  %v885_v36 = vadd.f32 %v5671_v30, %v840_v56  ;;  %2385 = vperm.xlu0 %4865, %v5529_v9   ;;  %v5906_v42 = vadd.f32 %v1860_v25, %v5876_v38 }
 0x1bc   :  { %4846 = vset.pattern.permute.xlu1 %v7761_v32 }
 0x1bd   :  { %7779 = vst [vmem:[#allocation43_spill] sm:$0xff] %v5906_v42  ;;  %vm1209_vm11 = vcmp.gt.f32.partialorder %v1193_v27, 0.0  ;;  %v1225_v41 = vmul.f32 0.2, %v1193_v27  ;;  %vm901_vm12 = vcmp.gt.f32.partialorder %v885_v36, 0.0  ;;  %863 = vperm.xlu1 %4846, %v5547_v15   ;;  %v5911_v33 = vmax.f32 %v5906_v42, %v1890_v60 }
 0x1be   :  { %v917_v44 = vmul.f32 0.2, %v885_v36 }
 0x1bf   :  { %v1241_v55 = vsel %vm1209_vm11, %v1193_v27, %v1225_v41  ;;  %v1762_v48 = vpop.permute.xlu1 %1761  ;;  %v2080_v47 = vpop.permute.xlu0 %2079  ;;  %2397 = vperm.xlu0 %4865, %v5535_v11  }
 0x1c0   :  { %v5920_v54 = vadd.f32 %v1241_v55, %v5797_v50  ;;  %v933_v56 = vsel %vm901_vm12, %v885_v36, %v917_v44  ;;  %v1813_v25 = vadd.f32 %v5496_v58, %v1762_v48  ;;  %v2125_v60 = vadd.f32 %v5499_v59, %v2080_v47 }
 0x1c1   :  { %v5925_v31 = vadd.f32 %v933_v56, %v5916_v21  ;;  %4848 = vset.pattern.permute.xlu1 %v7767_v23 }
 0x1c2   :  { %7780 = vst [vmem:[#allocation44_spill] sm:$0xff] %v5920_v54  ;;  %v1273_v27 = vmax.f32 %v5920_v54, %v5898_v40  ;;  %vm1829_vm13 = vcmp.gt.f32.partialorder %v1813_v25, 0.0  ;;  %v1845_v41 = vmul.f32 0.2, %v1813_v25  ;;  %vm2141_vm14 = vcmp.gt.f32.partialorder %v2125_v60, 0.0  ;;  %1483 = vperm.xlu1 %4848, %v5547_v15  }
 0x1c3   :  { %7781 = vst [vmem:[#allocation45_spill] sm:$0xff] %v5925_v31  ;;  %v962_v36 = vmax.f32 %v5925_v31, %v5818_v28  ;;  %v2157_v44 = vmul.f32 0.2, %v2125_v60  ;;  %2413 = vperm.xlu0 %4865, %v5547_v15  }
 0x1c4   :  { %v1861_v55 = vsel %vm1829_vm13, %v1813_v25, %v1845_v41  ;;  %v828_v48 = vpop.permute.xlu1 %827  ;;  %v5934_v47 = vpop.permute.xlu0 %516  ;;  %v7641_v25 = vmov 7  }
 0x1c5   :  { %v5937_v56 = vadd.f32 %v1861_v55, %v5797_v50  ;;  %v2173_v10 = vsel %vm2141_vm14, %v2125_v60, %v2157_v44  ;;  %v882_v40 = vadd.f32 %v5671_v30, %v828_v48 }
 0x1c6   :  { %v5941_v42 = vadd.f32 %v2173_v10, %v5916_v21  ;;  %4850 = vset.pattern.permute.xlu1 %v7757_v0 }
 0x1c7   :  { %7782 = vst [vmem:[#allocation46_spill] sm:$0xff] %v5937_v56  ;;  %v1893_v28 = vmax.f32 %v5937_v56, %v5911_v33  ;;  %vm898_vm15 = vcmp.gt.f32.partialorder %v882_v40, 0.0  ;;  %v914_v46 = vmul.f32 0.2, %v882_v40  ;;  %546 = vperm.xlu1 %4850, %v5551_v16   ;;  %4875 = vset.pattern.permute.xlu0 %v7641_v25 }
 0x1c8   :  { %7783 = vst [vmem:[#allocation47_spill] sm:$0xff] %v5941_v42  ;;  %v2200_v60 = vmax.f32 %v5941_v42, %v5894_v52  ;;  %2671 = vperm.xlu0 %4875, %v5509_v62  }
 0x1c9   :  { %v930_v41 = vsel %vm898_vm15, %v882_v40, %v914_v46  ;;  %v1448_v10 = vpop.permute.xlu1 %1447  ;;  %v1146_v44 = vpop.permute.xlu0 %1145 }
 0x1ca   :  { %v5952_v55 = vadd.f32 %v930_v41, %v5876_v38  ;;  %v1502_v33 = vadd.f32 %v5680_v35, %v1448_v10  ;;  %v1194_v48 = vadd.f32 %v5747_v39, %v1146_v44  ;;  %v5965_v10 = vld [vmem:[%s7603_s10 + $0x30] sm:$0xff] }
 0x1cb   :  { %4852 = vset.pattern.permute.xlu1 %v7763_v24 }
 0x1cc   :  { %7784 = vst [vmem:[#allocation48_spill] sm:$0xff] %v5952_v55  ;;  %v5958_v56 = vmax.f32 %v5952_v55, %v962_v36  ;;  %vm1518_vm0 = vcmp.gt.f32.partialorder %v1502_v33, 0.0  ;;  %v1534_v25 = vmul.f32 0.2, %v1502_v33  ;;  %vm1210_vm2 = vcmp.gt.f32.partialorder %v1194_v48, 0.0  ;;  %1169 = vperm.xlu1 %4852, %v5551_v16   ;;  %2683 = vperm.xlu0 %4875, %v5511_v63  }
 0x1cd   :  { %v1226_v46 = vmul.f32 0.2, %v1194_v48 }
 0x1ce   :  { %v1550_v52 = vsel %vm1518_vm0, %v1502_v33, %v1534_v25  ;;  %v2068_v40 = vpop.permute.xlu1 %2067  ;;  %v1766_v41 = vpop.permute.xlu0 %1765  ;;  %v7787_v25 = vmax.f32 %v5824_v61, %v5762_v5 }
 0x1cf   :  { %v5968_v44 = vadd.f32 %v1550_v52, %v5876_v38  ;;  %v1242_v36 = vsel %vm1210_vm2, %v1194_v48, %v1226_v46  ;;  %v2122_v42 = vadd.f32 %v5499_v59, %v2068_v40  ;;  %v1814_v6 = vadd.f32 %v5496_v58, %v1766_v41 }
 0x1d0   :  { %v5973_v34 = vadd.f32 %v1242_v36, %v5965_v10  ;;  %4853 = vset.pattern.permute.xlu1 %v7753_v19  ;;  %2691 = vperm.xlu0 %4875, %v5519_v3  }
 0x1d1   :  { %7785 = vst [vmem:[#allocation49_spill] sm:$0xff] %v5968_v44  ;;  %v5981_v33 = vmax.f32 %v7787_v25, %v5968_v44  ;;  %vm2138_vm3 = vcmp.gt.f32.partialorder %v2122_v42, 0.0  ;;  %v2154_v52 = vmul.f32 0.2, %v2122_v42  ;;  %vm1830_vm4 = vcmp.gt.f32.partialorder %v1814_v6, 0.0  ;;  %1789 = vperm.xlu1 %4853, %v5551_v16  }
 0x1d2   :  { %7786 = vst [vmem:[#allocation50_spill] sm:$0xff] %v5973_v34  ;;  %v1277_v48 = vmax.f32 %v1273_v27, %v5973_v34  ;;  %v1846_v46 = vmul.f32 0.2, %v1814_v6 }
 0x1d3   :  { %v2170_v40 = vsel %vm2138_vm3, %v2122_v42, %v2154_v52  ;;  %v5985_v41 = vpop.permute.xlu1 %521  ;;  %v5987_v36 = vpop.permute.xlu0 %531 }
 0x1d4   :  { %v5990_v1 = vadd.f32 %v2170_v40, %v5876_v38  ;;  %v1862_v54 = vsel %vm1830_vm4, %v1814_v6, %v1846_v46  ;;  %2699 = vperm.xlu0 %4875, %v5527_v8  }
 0x1d5   :  { %v5994_v5 = vadd.f32 %v1862_v54, %v5965_v10  ;;  %4855 = vset.pattern.permute.xlu1 %v7757_v0 }
 0x1d6   :  { %7788 = vst [vmem:[#allocation51_spill] sm:$0xff] %v5990_v1  ;;  %v5998_v25 = vmax.f32 %v5990_v1, %v2200_v60  ;;  %561 = vperm.xlu1 %4855, %v5559_v17  }
 0x1d7   :  { %7789 = vst [vmem:[#allocation52_spill] sm:$0xff] %v5994_v5  ;;  %v1897_v42 = vmax.f32 %v1893_v28, %v5994_v5  ;;  %v6011_v5 = vld [vmem:[%s7603_s10 + $0x48] sm:$0xff] }
 0x1d8   :  { %v1150_v27 = vpop.permute.xlu1 %1149  ;;  %v1158_v52 = vpop.permute.xlu0 %1157  ;;  %2703 = vperm.xlu0 %4875, %v5537_v12  }
 0x1d9   :  { %v1195_v6 = vadd.f32 %v5747_v39, %v1150_v27  ;;  %v1197_v46 = vadd.f32 %v5747_v39, %v1158_v52 }
 0x1da   :  { %4858 = vset.pattern.permute.xlu1 %v7763_v24 }
 0x1db   :  { %vm1211_vm5 = vcmp.gt.f32.partialorder %v1195_v6, 0.0  ;;  %v1227_v54 = vmul.f32 0.2, %v1195_v6  ;;  %vm1213_vm6 = vcmp.gt.f32.partialorder %v1197_v46, 0.0  ;;  %1181 = vperm.xlu1 %4858, %v5559_v17   ;;  %v1229_v60 = vmul.f32 0.2, %v1197_v46 }
 0x1dc   :  { %2715 = vperm.xlu0 %4875, %v5541_v13  }
 0x1dd   :  { %v1243_v40 = vsel %vm1211_vm5, %v1195_v6, %v1227_v54  ;;  %v1770_v28 = vpop.permute.xlu1 %1769  ;;  %v1778_v1 = vpop.permute.xlu0 %1777  ;;  %v1245_v52 = vsel %vm1213_vm6, %v1197_v46, %v1229_v60 }
 0x1de   :  { %v6014_v27 = vadd.f32 %v1243_v40, %v5916_v21  ;;  %v1815_v44 = vadd.f32 %v5496_v58, %v1770_v28  ;;  %v1817_v34 = vadd.f32 %v5496_v58, %v1778_v1  ;;  %v6019_v61 = vadd.f32 %v1245_v52, %v6011_v5 }
 0x1df   :  { %4859 = vset.pattern.permute.xlu1 %v7753_v19 }
 0x1e0   :  { %7790 = vst [vmem:[#allocation53_spill] sm:$0xff] %v6014_v27  ;;  %7791 = vst [vmem:[#allocation54_spill] sm:$0xff] %v6019_v61  ;;  %v1272_v6 = vmax.f32 %v6014_v27, %v1277_v48  ;;  %vm1831_vm7 = vcmp.gt.f32.partialorder %v1815_v44, 0.0  ;;  %v1847_v54 = vmul.f32 0.2, %v1815_v44  ;;  %vm1833_vm8 = vcmp.gt.f32.partialorder %v1817_v34, 0.0  ;;  %2719 = vperm.xlu0 %4875, %v5551_v16   ;;  %1801 = vperm.xlu1 %4859, %v5559_v17  }
 0x1e1   :  { %v1849_v40 = vmul.f32 0.2, %v1817_v34 }
 0x1e2   :  { %v6026_v46 = vmax.f32 %v6019_v61, %v1272_v6  ;;  %v1863_v60 = vsel %vm1831_vm7, %v1815_v44, %v1847_v54  ;;  %v836_v1 = vpop.permute.xlu1 %835  ;;  %v844_v28 = vpop.permute.xlu0 %843 }
 0x1e3   :  { %v6029_v52 = vadd.f32 %v1863_v60, %v5916_v21  ;;  %v1865_v29 = vsel %vm1833_vm8, %v1817_v34, %v1849_v40  ;;  %v884_v48 = vadd.f32 %v5671_v30, %v836_v1  ;;  %v886_v27 = vadd.f32 %v5671_v30, %v844_v28  ;;  %v6043_v34 = vld [vmem:[%s7603_s10 + $0x40] sm:$0xff] }
 0x1e4   :  { %v6034_v45 = vadd.f32 %v1865_v29, %v6011_v5  ;;  %2731 = vperm.xlu0 %4875, %v5559_v17   ;;  %4860 = vset.pattern.permute.xlu1 %v7757_v0 }
 0x1e5   :  { %7792 = vst [vmem:[#allocation55_spill] sm:$0xff] %v6029_v52  ;;  %v1892_v6 = vmax.f32 %v6029_v52, %v1897_v42  ;;  %vm900_vm9 = vcmp.gt.f32.partialorder %v884_v48, 0.0  ;;  %v916_v44 = vmul.f32 0.2, %v884_v48  ;;  %vm902_vm10 = vcmp.gt.f32.partialorder %v886_v27, 0.0  ;;  %556 = vperm.xlu1 %4860, %v5617_v18  }
 0x1e6   :  { %7793 = vst [vmem:[#allocation56_spill] sm:$0xff] %v6034_v45  ;;  %v918_v54 = vmul.f32 0.2, %v886_v27 }
 0x1e7   :  { %v6046_v29 = vmax.f32 %v6034_v45, %v1892_v6  ;;  %v932_v40 = vsel %vm900_vm9, %v884_v48, %v916_v44  ;;  %v1456_v60 = vpop.permute.xlu1 %1455  ;;  %v2084_v1 = vpop.permute.xlu0 %2083 }
 0x1e8   :  { %v6049_v28 = vadd.f32 %v932_v40, %v5965_v10  ;;  %v934_v42 = vsel %vm902_vm10, %v886_v27, %v918_v54  ;;  %v1504_v52 = vadd.f32 %v5680_v35, %v1456_v60  ;;  %v2126_v61 = vadd.f32 %v5499_v59, %v2084_v1  ;;  %4878 = vset.pattern.permute.xlu0 %v7757_v0 }
 0x1e9   :  { %v6055_v37 = vadd.f32 %v934_v42, %v6043_v34  ;;  %4861 = vset.pattern.permute.xlu1 %v7761_v32 }
 0x1ea   :  { %7794 = vst [vmem:[#allocation57_spill] sm:$0xff] %v6049_v28  ;;  %v963_v48 = vmax.f32 %v6049_v28, %v5958_v56  ;;  %vm1520_vm11 = vcmp.gt.f32.partialorder %v1504_v52, 0.0  ;;  %v1536_v6 = vmul.f32 0.2, %v1504_v52  ;;  %vm2142_vm12 = vcmp.gt.f32.partialorder %v2126_v61, 0.0  ;;  %867 = vperm.xlu1 %4861, %v5617_v18  }
 0x1eb   :  { %7795 = vst [vmem:[#allocation58_spill] sm:$0xff] %v6055_v37  ;;  %v2158_v27 = vmul.f32 0.2, %v2126_v61 }
 0x1ec   :  { %v966_v44 = vmax.f32 %v6055_v37, %v963_v48  ;;  %v1552_v54 = vsel %vm1520_vm11, %v1504_v52, %v1536_v6  ;;  %v2076_v40 = vpop.permute.xlu1 %2075  ;;  %v856_v60 = vpop.permute.xlu0 %855  ;;  %v6079_v48 = vld [vmem:[%s7603_s10 + $0x58] sm:$0xff] }
 0x1ed   :  { %v6063_v1 = vadd.f32 %v1552_v54, %v5965_v10  ;;  %v2174_v42 = vsel %vm2142_vm12, %v2126_v61, %v2158_v27  ;;  %v2124_v32 = vadd.f32 %v5499_v59, %v2076_v40  ;;  %v889_v45 = vadd.f32 %v5671_v30, %v856_v60 }
 0x1ee   :  { %v6068_v56 = vadd.f32 %v2174_v42, %v6043_v34  ;;  %4862 = vset.pattern.permute.xlu1 %v7768_v43 }
 0x1ef   :  { %7796 = vst [vmem:[#allocation59_spill] sm:$0xff] %v6063_v1  ;;  %v1581_v7 = vmax.f32 %v6063_v1, %v5981_v33  ;;  %vm2140_vm13 = vcmp.gt.f32.partialorder %v2124_v32, 0.0  ;;  %v2156_v52 = vmul.f32 0.2, %v2124_v32  ;;  %vm905_vm14 = vcmp.gt.f32.partialorder %v889_v45, 0.0  ;;  %2103 = vperm.xlu1 %4862, %v5547_v15  }
 0x1f0   :  { %7797 = vst [vmem:[#allocation60_spill] sm:$0xff] %v6068_v56  ;;  %v2203_v61 = vmax.f32 %v6068_v56, %v5998_v25  ;;  %v921_v6 = vmul.f32 0.2, %v889_v45  ;;  %v7800_v25 = vmov 6  }
 0x1f1   :  { %v2172_v27 = vsel %vm2140_vm13, %v2124_v32, %v2156_v52  ;;  %v848_v54 = vpop.permute.xlu1 %847  ;;  %v2096_v40 = vpop.permute.xlu0 %2095 }
 0x1f2   :  { %v6082_v60 = vadd.f32 %v2172_v27, %v5965_v10  ;;  %v937_v33 = vsel %vm905_vm14, %v889_v45, %v921_v6  ;;  %v887_v42 = vadd.f32 %v5671_v30, %v848_v54  ;;  %v2129_v1 = vadd.f32 %v5499_v59, %v2096_v40 }
 0x1f3   :  { %v6087_v22 = vadd.f32 %v937_v33, %v6079_v48  ;;  %4864 = vset.pattern.permute.xlu1 %v7800_v25 }
 0x1f4   :  { %7798 = vst [vmem:[#allocation61_spill] sm:$0xff] %v6082_v60  ;;  %v2206_v56 = vmax.f32 %v6082_v60, %v2203_v61  ;;  %vm903_vm15 = vcmp.gt.f32.partialorder %v887_v42, 0.0  ;;  %v919_v37 = vmul.f32 0.2, %v887_v42  ;;  %vm2145_vm0 = vcmp.gt.f32.partialorder %v2129_v1, 0.0  ;;  %2361 = vperm.xlu1 %4864, %v5509_v62  }
 0x1f5   :  { %7799 = vst [vmem:[#allocation62_spill] sm:$0xff] %v6087_v22  ;;  %v969_v32 = vmax.f32 %v6087_v22, %v966_v44  ;;  %v2161_v52 = vmul.f32 0.2, %v2129_v1 }
 0x1f6   :  { %v935_v45 = vsel %vm903_vm15, %v887_v42, %v919_v37  ;;  %v1468_v6 = vpop.permute.xlu1 %1467  ;;  %v6093_v27 = vpop.permute.xlu0 %551 }
 0x1f7   :  { %v6096_v54 = vadd.f32 %v935_v45, %v6011_v5  ;;  %v2177_v40 = vsel %vm2145_vm0, %v2129_v1, %v2161_v52  ;;  %v1507_v33 = vadd.f32 %v5680_v35, %v1468_v6 }
 0x1f8   :  { %v6100_v61 = vadd.f32 %v2177_v40, %v6079_v48  ;;  %2369 = vperm.xlu1 %4864, %v5515_v2  }
 0x1f9   :  { %7801 = vst [vmem:[#allocation63_spill] sm:$0xff] %v6096_v54  ;;  %v6104_v62 = vmax.f32 %v6096_v54, %v969_v32  ;;  %vm1523_vm2 = vcmp.gt.f32.partialorder %v1507_v33, 0.0  ;;  %v1539_v44 = vmul.f32 0.2, %v1507_v33 }
 0x1fa   :  { %7802 = vst [vmem:[#allocation64_spill] sm:$0xff] %v6100_v61  ;;  %v2209_v37 = vmax.f32 %v6100_v61, %v2206_v56 }
 0x1fb   :  { %v1555_v42 = vsel %vm1523_vm2, %v1507_v33, %v1539_v44  ;;  %v2088_v60 = vpop.permute.xlu1 %2087  ;;  %v1174_v22 = vpop.permute.xlu0 %1173 }
 0x1fc   :  { %v6108_v45 = vadd.f32 %v1555_v42, %v6011_v5  ;;  %v2127_v1 = vadd.f32 %v5499_v59, %v2088_v60  ;;  %v1201_v52 = vadd.f32 %v5747_v39, %v1174_v22  ;;  %2373 = vperm.xlu1 %4864, %v5511_v63   ;;  %v6122_v60 = vld [vmem:[%s7603_s10 + $0x68] sm:$0xff] }
 0x1fe   :  { %7803 = vst [vmem:[#allocation65_spill] sm:$0xff] %v6108_v45  ;;  %v6114_v6 = vmax.f32 %v6108_v45, %v1581_v7  ;;  %vm2143_vm3 = vcmp.gt.f32.partialorder %v2127_v1, 0.0  ;;  %v2159_v32 = vmul.f32 0.2, %v2127_v1  ;;  %vm1217_vm4 = vcmp.gt.f32.partialorder %v1201_v52, 0.0 }
 0x1ff   :  { %v1233_v40 = vmul.f32 0.2, %v1201_v52 }
 0x200   :  { %v2175_v56 = vsel %vm2143_vm3, %v2127_v1, %v2159_v32  ;;  %v6116_v33 = vpop.permute.xlu1 %526  ;;  %v1794_v44 = vpop.permute.xlu0 %1793  ;;  %2381 = vperm.xlu1 %4864, %v5519_v3  }
 0x201   :  { %v6125_v63 = vadd.f32 %v2175_v56, %v6011_v5  ;;  %v1249_v22 = vsel %vm1217_vm4, %v1201_v52, %v1233_v40  ;;  %v1821_v7 = vadd.f32 %v5496_v58, %v1794_v44 }
 0x202   :  { %v6129_v42 = vadd.f32 %v1249_v22, %v6122_v60 }
 0x203   :  { %7804 = vst [vmem:[#allocation66_spill] sm:$0xff] %v6125_v63  ;;  %v6132_v1 = vmax.f32 %v6125_v63, %v2209_v37  ;;  %vm1837_vm5 = vcmp.gt.f32.partialorder %v1821_v7, 0.0  ;;  %v1853_v32 = vmul.f32 0.2, %v1821_v7 }
 0x204   :  { %7805 = vst [vmem:[#allocation67_spill] sm:$0xff] %v6129_v42  ;;  %v1274_v3 = vmax.f32 %v6129_v42, %v6026_v46  ;;  %2389 = vperm.xlu1 %4864, %v5527_v8  }
 0x205   :  { %v1154_v61 = vpop.permute.xlu1 %1153  ;;  %v860_v45 = vpop.permute.xlu0 %859  ;;  %v1869_v56 = vsel %vm1837_vm5, %v1821_v7, %v1853_v32 }
 0x206   :  { %v1196_v52 = vadd.f32 %v5747_v39, %v1154_v61  ;;  %v6139_v40 = vadd.f32 %v1869_v56, %v6122_v60 }
 0x208   :  { %7806 = vst [vmem:[#allocation68_spill] sm:$0xff] %v6139_v40  ;;  %vm1212_vm6 = vcmp.gt.f32.partialorder %v1196_v52, 0.0  ;;  %v1228_v44 = vmul.f32 0.2, %v1196_v52  ;;  %4866 = vset.pattern.permute.xlu1 %v7763_v24  ;;  %v1894_v37 = vmax.f32 %v6139_v40, %v6046_v29  ;;  %v7810_v40 = vmov 7  }
 0x209   :  { %1177 = vperm.xlu1 %4866, %v5617_v18  }
 0x20a   :  { %v1244_v46 = vsel %vm1212_vm6, %v1196_v52, %v1228_v44  ;;  %v1774_v22 = vpop.permute.xlu1 %1773  ;;  %v2100_v8 = vpop.permute.xlu0 %2099 }
 0x20b   :  { %v6146_v63 = vadd.f32 %v1244_v46, %v6043_v34  ;;  %v1816_v61 = vadd.f32 %v5496_v58, %v1774_v22  ;;  %v2130_v7 = vadd.f32 %v5499_v59, %v2100_v8  ;;  %v6160_v46 = vld [vmem:[%s7603_s10 + $0x60] sm:$0xff] }
 0x20d   :  { %7807 = vst [vmem:[#allocation69_spill] sm:$0xff] %v6146_v63  ;;  %v6151_v32 = vmax.f32 %v6146_v63, %v1274_v3  ;;  %vm1832_vm7 = vcmp.gt.f32.partialorder %v1816_v61, 0.0  ;;  %v1848_v24 = vmul.f32 0.2, %v1816_v61  ;;  %vm2146_vm8 = vcmp.gt.f32.partialorder %v2130_v7, 0.0  ;;  %4867 = vset.pattern.permute.xlu1 %v7767_v23 }
 0x20e   :  { %v2162_v29 = vmul.f32 0.2, %v2130_v7  ;;  %1487 = vperm.xlu1 %4867, %v5617_v18  }
 0x20f   :  { %v1864_v56 = vsel %vm1832_vm7, %v1816_v61, %v1848_v24  ;;  %v6155_v52 = vpop.permute.xlu1 %541  ;;  %v872_v44 = vpop.permute.xlu0 %871 }
 0x210   :  { %v6163_v3 = vadd.f32 %v1864_v56, %v6043_v34  ;;  %v2178_v22 = vsel %vm2146_vm8, %v2130_v7, %v2162_v29 }
 0x211   :  { %v6166_v8 = vadd.f32 %v2178_v22, %v6160_v46  ;;  %v890_v22 = vadd.f32 %v5671_v30, %v860_v45 }
 0x212   :  { %7808 = vst [vmem:[#allocation70_spill] sm:$0xff] %v6163_v3  ;;  %v6169_v23 = vmax.f32 %v6163_v3, %v1894_v37  ;;  %4868 = vset.pattern.permute.xlu1 %v7810_v40 }
 0x213   :  { %7809 = vst [vmem:[#allocation71_spill] sm:$0xff] %v6166_v8  ;;  %2675 = vperm.xlu1 %4868, %v5493_v57   ;;  %vm906_vm13 = vcmp.gt.f32.partialorder %v890_v22, 0.0 }
 0x214   :  { %v1166_v24 = vpop.permute.xlu1 %1165  ;;  %v1452_v42 = vpop.permute.xlu0 %1451 }
 0x215   :  { %v1199_v63 = vadd.f32 %v5747_v39, %v1166_v24  ;;  %v1503_v56 = vadd.f32 %v5680_v35, %v1452_v42  ;;  %v893_v42 = vadd.f32 %v5671_v30, %v872_v44 }
 0x217   :  { %vm1215_vm9 = vcmp.gt.f32.partialorder %v1199_v63, 0.0  ;;  %v1231_v7 = vmul.f32 0.2, %v1199_v63  ;;  %vm1519_vm10 = vcmp.gt.f32.partialorder %v1503_v56, 0.0  ;;  %2679 = vperm.xlu1 %4868, %v5515_v2   ;;  %v1535_v37 = vmul.f32 0.2, %v1503_v56 }
 0x218   :  { %v1460_v29 = vpop.permute.xlu0 %1459  ;;  %vm909_vm15 = vcmp.gt.f32.partialorder %v893_v42, 0.0 }
 0x219   :  { %v1247_v3 = vsel %vm1215_vm9, %v1199_v63, %v1231_v7  ;;  %v1505_v61 = vadd.f32 %v5680_v35, %v1460_v29  ;;  %v1786_v54 = vpop.permute.xlu1 %1785  ;;  %v1551_v31 = vsel %vm1519_vm10, %v1503_v56, %v1535_v37 }
 0x21a   :  { %v6181_v57 = vadd.f32 %v1247_v3, %v6079_v48  ;;  %v1819_v24 = vadd.f32 %v5496_v58, %v1786_v54  ;;  %v6186_v28 = vadd.f32 %v1551_v31, %v5797_v50  ;;  %v922_v3 = vmul.f32 0.2, %v890_v22 }
 0x21b   :  { %vm1521_vm11 = vcmp.gt.f32.partialorder %v1505_v61, 0.0  ;;  %v1537_v2 = vmul.f32 0.2, %v1505_v61  ;;  %2687 = vperm.xlu1 %4868, %v5521_v4   ;;  %v925_v4 = vmul.f32 0.2, %v893_v42 }
 0x21c   :  { %7811 = vst [vmem:[#allocation72_spill] sm:$0xff] %v6181_v57  ;;  %7812 = vst [vmem:[#allocation73_spill] sm:$0xff] %v6186_v28  ;;  %vm1835_vm12 = vcmp.gt.f32.partialorder %v1819_v24, 0.0  ;;  %v1851_v63 = vmul.f32 0.2, %v1819_v24  ;;  %v1464_v7 = vpop.permute.xlu0 %1463  ;;  %v1585_v56 = vmax.f32 %v6186_v28, %v6114_v6 }
 0x21d   :  { %v1553_v54 = vsel %vm1521_vm11, %v1505_v61, %v1537_v2  ;;  %v1506_v44 = vadd.f32 %v5680_v35, %v1464_v7  ;;  %v938_v2 = vsel %vm906_vm13, %v890_v22, %v922_v3 }
 0x21e   :  { %v6195_v50 = vadd.f32 %v1553_v54, %v5916_v21  ;;  %v1867_v31 = vsel %vm1835_vm12, %v1819_v24, %v1851_v63  ;;  %v6197_v37 = vpop.permute.xlu1 %536  ;;  %v6217_v22 = vadd.f32 %v938_v2, %v6160_v46 }
 0x21f   :  { %v6200_v29 = vadd.f32 %v1867_v31, %v6079_v48  ;;  %vm1522_vm14 = vcmp.gt.f32.partialorder %v1506_v44, 0.0  ;;  %v1538_v45 = vmul.f32 0.2, %v1506_v44  ;;  %2695 = vperm.xlu1 %4868, %v5529_v9   ;;  %v6213_v31 = vld [vmem:[%s7603_s10 + $0x78] sm:$0xff]  ;;  %v941_v9 = vsel %vm909_vm15, %v893_v42, %v925_v4 }
 0x220   :  { %7813 = vst [vmem:[#allocation74_spill] sm:$0xff] %v6195_v50  ;;  %v1586_v6 = vmax.f32 %v6195_v50, %v1585_v56  ;;  %v1476_v61 = vpop.permute.xlu0 %1475  ;;  %7816 = vst [vmem:[#allocation77_spill] sm:$0xff] %v6217_v22  ;;  %v967_v7 = vmax.f32 %v6217_v22, %v6104_v62 }
 0x221   :  { %7814 = vst [vmem:[#allocation75_spill] sm:$0xff] %v6200_v29  ;;  %v1554_v54 = vsel %vm1522_vm14, %v1506_v44, %v1538_v45  ;;  %v1509_v63 = vadd.f32 %v5680_v35, %v1476_v61 }
 0x222   :  { %v6207_v24 = vadd.f32 %v1554_v54, %v6043_v34  ;;  %v6224_v54 = vadd.f32 %v941_v9, %v6213_v31 }
 0x223   :  { %v852_v28 = vpop.permute.xlu1 %851  ;;  %4869 = vset.pattern.permute.xlu1 %v7800_v25  ;;  %vm1525_vm0 = vcmp.gt.f32.partialorder %v1509_v63, 0.0  ;;  %v1541_v45 = vmul.f32 0.2, %v1509_v63 }
 0x224   :  { %7815 = vst [vmem:[#allocation76_spill] sm:$0xff] %v6207_v24  ;;  %v1589_v3 = vmax.f32 %v6207_v24, %v1586_v6  ;;  %v1480_v56 = vpop.permute.xlu0 %1479  ;;  %2393 = vperm.xlu1 %4869, %v5537_v12   ;;  %v888_v44 = vadd.f32 %v5671_v30, %v852_v28  ;;  %7817 = vst [vmem:[#allocation78_spill] sm:$0xff] %v6224_v54  ;;  %v6242_v6 = vmax.f32 %v6224_v54, %v967_v7 }
 0x225   :  { %v1510_v61 = vadd.f32 %v5680_v35, %v1480_v56  ;;  %v1557_v42 = vsel %vm1525_vm0, %v1509_v63, %v1541_v45  ;;  %v6236_v63 = vld [vmem:[%s7603_s10 + $0x50] sm:$0xff] }
 0x226   :  { %v6227_v4 = vadd.f32 %v1557_v42, %v6079_v48  ;;  %vm904_vm2 = vcmp.gt.f32.partialorder %v888_v44, 0.0  ;;  %v920_v2 = vmul.f32 0.2, %v888_v44 }
 0x227   :  { %vm1526_vm3 = vcmp.gt.f32.partialorder %v1510_v61, 0.0  ;;  %v1542_v12 = vmul.f32 0.2, %v1510_v61 }
 0x228   :  { %7818 = vst [vmem:[#allocation79_spill] sm:$0xff] %v6227_v4  ;;  %v1162_v24 = vpop.permute.xlu1 %1161  ;;  %v1492_v28 = vpop.permute.xlu0 %1491  ;;  %2401 = vperm.xlu1 %4869, %v5545_v14   ;;  %v1584_v9 = vmax.f32 %v6227_v4, %v1589_v3  ;;  %v936_v45 = vsel %vm904_vm2, %v888_v44, %v920_v2 }
 0x229   :  { %v1198_v56 = vadd.f32 %v5747_v39, %v1162_v24  ;;  %v1513_v42 = vadd.f32 %v5680_v35, %v1492_v28  ;;  %v6245_v62 = vadd.f32 %v936_v45, %v6236_v63  ;;  %v1558_v50 = vsel %vm1526_vm3, %v1510_v61, %v1542_v12 }
 0x22a   :  { %v6248_v22 = vadd.f32 %v1558_v50, %v6160_v46  ;;  %v7821_v24 = vsub.s32 0, %v5483_v49 }
 0x22b   :  { %7819 = vst [vmem:[#allocation80_spill] sm:$0xff] %v6245_v62  ;;  %vm1214_vm4 = vcmp.gt.f32.partialorder %v1198_v56, 0.0  ;;  %v1230_v55 = vmul.f32 0.2, %v1198_v56  ;;  %vm1529_vm5 = vcmp.gt.f32.partialorder %v1513_v42, 0.0 }
 0x22c   :  { %7820 = vst [vmem:[#allocation81_spill] sm:$0xff] %v6248_v22  ;;  %v1545_v44 = vmul.f32 0.2, %v1513_v42  ;;  %4870 = vset.pattern.permute.xlu1 %v7753_v19  ;;  %v6256_v7 = vrot.slane %v5487_v51, %v7821_v24  ;;  %v1587_v2 = vmax.f32 %v6248_v22, %v1584_v9  ;;  %v7824_v51 = vmax.f32 %v6151_v32, %v6181_v57 }
 0x22d   :  { %v1246_v61 = vsel %vm1214_vm4, %v1198_v56, %v1230_v55  ;;  %v1472_v12 = vpop.permute.xlu1 %1471  ;;  %v2112_v50 = vpop.permute.xlu0 %2111  ;;  %1797 = vperm.xlu1 %4870, %v5617_v18  }
 0x22e   :  { %v6261_v28 = vadd.f32 %v1246_v61, %v6236_v63  ;;  %v1561_v45 = vsel %vm1529_vm5, %v1513_v42, %v1545_v44  ;;  %v1508_v3 = vadd.f32 %v5680_v35, %v1472_v12  ;;  %v2133_v19 = vadd.f32 %v5499_v59, %v2112_v50 }
 0x22f   :  { %v6266_v49 = vadd.f32 %v1561_v45, %v6213_v31  ;;  %v569_v44 = vadd.f32 %v6256_v7, %v5639_v20  ;;  %v568_v32 = vadd.f32 %v6256_v7, %v5659_v26  ;;  %v7828_v26 = vmax.f32 %v6166_v8, %v6132_v1 }
 0x230   :  { %7822 = vst [vmem:[#allocation82_spill] sm:$0xff] %v6261_v28  ;;  %v6272_v55 = vmax.f32 %v6261_v28, %v7824_v51  ;;  %vm1524_vm6 = vcmp.gt.f32.partialorder %v1508_v3, 0.0  ;;  %v1540_v9 = vmul.f32 0.2, %v1508_v3  ;;  %vm2149_vm7 = vcmp.gt.f32.partialorder %v2133_v19, 0.0  ;;  %v7827_v51 = vld [vmem:[#allocation16_spill] sm:$0xff] }
 0x231   :  { %7823 = vst [vmem:[#allocation83_spill] sm:$0xff] %v6266_v49  ;;  %v6275_v56 = vmax.f32 %v6266_v49, %v1587_v2  ;;  %v2165_v42 = vmul.f32 0.2, %v2133_v19  ;;  %4871 = vset.pattern.permute.xlu1 %v7768_v43  ;;  %v571_v20 = vadd.f32 %v6256_v7, %v7827_v51  ;;  %vm584_vm9 = vcmp.gt.f32.partialorder %v568_v32, 0.0  ;;  %v7830_v51 = vld [vmem:[#allocation20_spill] sm:$0xff] }
 0x232   :  { %v1556_v24 = vsel %vm1524_vm6, %v1508_v3, %v1540_v9  ;;  %v1782_v61 = vpop.permute.xlu1 %1781  ;;  %v6280_v12 = vpop.permute.xlu0 %2365  ;;  %2107 = vperm.xlu1 %4871, %v5617_v18   ;;  %v570_v3 = vadd.f32 %v6256_v7, %v7830_v51  ;;  %vm585_vm10 = vcmp.gt.f32.partialorder %v569_v44, 0.0  ;;  %v573_v57 = vadd.f32 %v6256_v7, %v5868_v53 }
 0x233   :  { %v6286_v50 = vadd.f32 %v1556_v24, %v6236_v63  ;;  %v2181_v2 = vsel %vm2149_vm7, %v2133_v19, %v2165_v42  ;;  %v1818_v45 = vadd.f32 %v5496_v58, %v1782_v61  ;;  %v601_v42 = vmul.f32 0.2, %v569_v44 }
 0x234   :  { %v6290_v43 = vadd.f32 %v2181_v2, %v6213_v31  ;;  %v600_v61 = vmul.f32 0.2, %v568_v32  ;;  %vm587_vm11 = vcmp.gt.f32.partialorder %v571_v20, 0.0  ;;  %v602_v4 = vmul.f32 0.2, %v570_v3 }
 0x235   :  { %7825 = vst [vmem:[#allocation84_spill] sm:$0xff] %v6286_v50  ;;  %vm1834_vm8 = vcmp.gt.f32.partialorder %v1818_v45, 0.0  ;;  %v1850_v9 = vmul.f32 0.2, %v1818_v45  ;;  %vm586_vm13 = vcmp.gt.f32.partialorder %v570_v3, 0.0  ;;  %vm589_vm0 = vcmp.gt.f32.partialorder %v573_v57, 0.0 }
 0x236   :  { %7826 = vst [vmem:[#allocation85_spill] sm:$0xff] %v6290_v43  ;;  %v6300_v24 = vmax.f32 %v6290_v43, %v7828_v26  ;;  %v6302_v19 = vpop.permute.xlu0 %2377  ;;  %4872 = vset.pattern.permute.xlu1 %v7800_v25  ;;  %v603_v26 = vmul.f32 0.2, %v571_v20  ;;  %v7832_v43 = vld [vmem:[#allocation30_spill] sm:$0xff] }
 0x237   :  { %v1866_v2 = vsel %vm1834_vm8, %v1818_v45, %v1850_v9  ;;  %v2092_v49 = vpop.permute.xlu1 %2091  ;;  %2405 = vperm.xlu1 %4872, %v5541_v13   ;;  %v572_v8 = vadd.f32 %v6256_v7, %v7832_v43  ;;  %v7833_v45 = vmax.f32 %v6169_v23, %v6200_v29 }
 0x238   :  { %7829 = vst [vmem:[#allocation16_spill] sm:$0xff] %v6300_v24  ;;  %v6309_v22 = vadd.f32 %v1866_v2, %v6236_v63  ;;  %v2128_v1 = vadd.f32 %v5499_v59, %v2092_v49  ;;  %v616_v2 = vsel %vm584_vm9, %v568_v32, %v600_v61  ;;  %v617_v49 = vsel %vm585_vm10, %v569_v44, %v601_v42  ;;  %v6333_v32 = vld [vmem:[%s7603_s10] sm:$0xff]  ;;  %v6347_v61 = vld [vmem:[%s7603_s10 + $0x8] sm:$0xff] }
 0x239   :  { %v619_v23 = vsel %vm587_vm11, %v571_v20, %v603_v26  ;;  %v6336_v44 = vadd.f32 %v6333_v32, %v616_v2  ;;  %v604_v53 = vmul.f32 0.2, %v572_v8  ;;  %v574_v42 = vadd.f32 %v6256_v7, %v5934_v47  ;;  %v6355_v47 = vld [vmem:[%s7603_s10 + $0x18] sm:$0xff] }
 0x23a   :  { %7831 = vst [vmem:[#allocation20_spill] sm:$0xff] %v6309_v22  ;;  %v6318_v13 = vmax.f32 %v6309_v22, %v7833_v45  ;;  %vm2144_vm12 = vcmp.gt.f32.partialorder %v2128_v1, 0.0  ;;  %v2160_v9 = vmul.f32 0.2, %v2128_v1  ;;  %v6320_v51 = vpop.permute.xlu0 %2385  ;;  %vm588_vm14 = vcmp.gt.f32.partialorder %v572_v8, 0.0 }
 0x23b   :  { %4873 = vset.pattern.permute.xlu1 %v7810_v40  ;;  %v6358_v26 = vadd.f32 %v6355_v47, %v619_v23  ;;  %v605_v2 = vmul.f32 0.2, %v573_v57  ;;  %v620_v54 = vsel %vm588_vm14, %v572_v8, %v604_v53  ;;  %v606_v24 = vmul.f32 0.2, %v574_v42 }
 0x23c   :  { %v2176_v28 = vsel %vm2144_vm12, %v2128_v1, %v2160_v9  ;;  %v864_v43 = vpop.permute.xlu1 %863  ;;  %2707 = vperm.xlu1 %4873, %v5535_v11   ;;  %v6350_v1 = vadd.f32 %v6347_v61, %v617_v49  ;;  %v618_v9 = vsel %vm586_vm13, %v570_v3, %v602_v4  ;;  %vm590_vm2 = vcmp.gt.f32.partialorder %v574_v42, 0.0 }
 0x23d   :  { %v6327_v45 = vadd.f32 %v2176_v28, %v6236_v63  ;;  %v891_v29 = vadd.f32 %v5671_v30, %v864_v43  ;;  %v575_v43 = vadd.f32 %v6256_v7, %v5985_v41  ;;  %v621_v8 = vsel %vm589_vm0, %v573_v57, %v605_v2 }
 0x23e   :  { %v6340_v11 = vpop.permute.xlu0 %2397  ;;  %v648_v22 = vmax.f32 %v6336_v44, %v6350_v1  ;;  %v577_v3 = vadd.f32 %v6256_v7, %v5987_v36  ;;  %v7836_v53 = vmax.f32 %v6245_v62, %v6242_v6  ;;  %v622_v57 = vsel %vm590_vm2, %v574_v42, %v606_v24  ;;  %v6401_v6 = vld [vmem:[%s7603_s10 + $0x28] sm:$0xff] }
 0x23f   :  { %7834 = vst [vmem:[#allocation30_spill] sm:$0xff] %v6327_v45  ;;  %vm907_vm15 = vcmp.gt.f32.partialorder %v891_v29, 0.0  ;;  %v923_v20 = vmul.f32 0.2, %v891_v29  ;;  %vm591_vm4 = vcmp.gt.f32.partialorder %v575_v43, 0.0  ;;  %v6413_v42 = vadd.f32 %v622_v57, %v5965_v10 }
 0x240   :  { %2711 = vperm.xlu1 %4873, %v5545_v14   ;;  %v6375_v14 = vld [vmem:[%s7603_s10 + $0x10] sm:$0xff]  ;;  %v649_v4 = vmax.f32 %v6358_v26, %v648_v22  ;;  %v609_v2 = vmul.f32 0.2, %v577_v3  ;;  %vm593_vm5 = vcmp.gt.f32.partialorder %v577_v3, 0.0 }
 0x241   :  { %v939_v28 = vsel %vm907_vm15, %v891_v29, %v923_v20  ;;  %v1484_v49 = vpop.permute.xlu1 %1483  ;;  %v6378_v41 = vadd.f32 %v6375_v14, %v618_v9  ;;  %v6392_v20 = vadd.f32 %v620_v54, %v5876_v38  ;;  %v607_v9 = vmul.f32 0.2, %v575_v43 }
 0x242   :  { %v6368_v23 = vadd.f32 %v939_v28, %v6122_v60  ;;  %v6370_v45 = vpop.permute.xlu0 %2413  ;;  %v1511_v29 = vadd.f32 %v5680_v35, %v1484_v49 }
 0x243   :  { %v650_v36 = vmax.f32 %v6378_v41, %v649_v4  ;;  %v623_v4 = vsel %vm591_vm4, %v575_v43, %v607_v9  ;;  %v625_v43 = vsel %vm593_vm5, %v577_v3, %v609_v2  ;;  %v576_v9 = vadd.f32 %v6256_v7, %v6116_v33  ;;  %v7841_v2 = vld [vmem:[#allocation14_spill] sm:$0xff] }
 0x244   :  { %7835 = vst [vmem:[#allocation86_spill] sm:$0xff] %v6368_v23  ;;  %v6388_v28 = vmax.f32 %v7836_v53, %v6368_v23  ;;  %4874 = vset.pattern.permute.xlu1 %v7800_v25  ;;  %vm1527_vm3 = vcmp.gt.f32.partialorder %v1511_v29, 0.0  ;;  %v1543_v49 = vmul.f32 0.2, %v1511_v29  ;;  %v6404_v25 = vadd.f32 %v6401_v6, %v621_v8 }
 0x245   :  { %2409 = vperm.xlu1 %4874, %v5551_v16   ;;  %v651_v24 = vmax.f32 %v6392_v20, %v650_v36  ;;  %v581_v8 = vadd.f32 %v6256_v7, %v6093_v27  ;;  %v6428_v57 = vadd.f32 %v623_v4, %v5916_v21  ;;  %v608_v3 = vmul.f32 0.2, %v576_v9 }
 0x246   :  { %v6395_v22 = vpop.permute.xlu1 %546  ;;  %v1559_v38 = vsel %vm1527_vm3, %v1511_v29, %v1543_v49  ;;  %v7838_v29 = vmax.f32 %v6286_v50, %v6275_v56  ;;  %v2432_v4 = vadd.f32 %v7841_v2, %v6302_v19  ;;  %vm592_vm8 = vcmp.gt.f32.partialorder %v576_v9, 0.0 }
 0x247   :  { %v6406_v54 = vpop.permute.xlu0 %2671  ;;  %v6409_v16 = vadd.f32 %v1559_v38, %v6122_v60  ;;  %v653_v49 = vmax.f32 %v6404_v25, %v651_v24  ;;  %7840 = vst [vmem:[#allocation89_spill] sm:$0xff] %v6428_v57  ;;  %v613_v56 = vmul.f32 0.2, %v581_v8  ;;  %v579_v24 = vadd.f32 %v6256_v7, %v6155_v52 }
 0x248   :  { %vm597_vm7 = vcmp.gt.f32.partialorder %v581_v8, 0.0  ;;  %v2429_v62 = vadd.f32 %v7841_v2, %v6280_v12  ;;  %v2464_v12 = vmul.f32 0.2, %v2432_v4  ;;  %vm2448_vm11 = vcmp.gt.f32.partialorder %v2432_v4, 0.0 }
 0x249   :  { %7837 = vst [vmem:[#allocation87_spill] sm:$0xff] %v6409_v16  ;;  %2417 = vperm.xlu1 %4874, %v5617_v18   ;;  %v6422_v53 = vmax.f32 %v7838_v29, %v6409_v16  ;;  %v657_v23 = vmax.f32 %v653_v49, %v6413_v42  ;;  %v6438_v16 = vadd.f32 %v625_v43, %v6011_v5  ;;  %v611_v50 = vmul.f32 0.2, %v579_v24 }
 0x24a   :  { %v629_v43 = vsel %vm597_vm7, %v581_v8, %v613_v56  ;;  %vm595_vm9 = vcmp.gt.f32.partialorder %v579_v24, 0.0  ;;  %v624_v8 = vsel %vm592_vm8, %v576_v9, %v608_v3  ;;  %v578_v56 = vadd.f32 %v6256_v7, %v6197_v37 }
 0x24b   :  { %7839 = vst [vmem:[#allocation88_spill] sm:$0xff] %v6422_v53  ;;  %v1170_v38 = vpop.permute.xlu1 %1169  ;;  %v6425_v36 = vpop.permute.xlu0 %2683  ;;  %v652_v33 = vmax.f32 %v6428_v57, %v657_v23  ;;  %v2434_v23 = vadd.f32 %v7841_v2, %v6320_v51  ;;  %v627_v19 = vsel %vm595_vm9, %v579_v24, %v611_v50  ;;  %v2461_v53 = vmul.f32 0.2, %v2429_v62 }
 0x24c   :  { %v1200_v27 = vadd.f32 %v5747_v39, %v1170_v38  ;;  %v6472_v37 = vadd.f32 %v624_v8, %v6043_v34  ;;  %vm2445_vm12 = vcmp.gt.f32.partialorder %v2429_v62, 0.0  ;;  %v580_v9 = vadd.f32 %v6256_v7, %v6395_v22 }
 0x24d   :  { %2421 = vperm.xlu1 %4874, %v5559_v17   ;;  %v2466_v35 = vmul.f32 0.2, %v2434_v23  ;;  %vm2450_vm13 = vcmp.gt.f32.partialorder %v2434_v23, 0.0  ;;  %v2480_v3 = vsel %vm2448_vm11, %v2432_v4, %v2464_v12  ;;  %vm594_vm14 = vcmp.gt.f32.partialorder %v578_v56, 0.0  ;;  %v6490_v12 = vld [vmem:[%s7603_s10 + $0x20] sm:$0xff] }
 0x24e   :  { %vm1216_vm6 = vcmp.gt.f32.partialorder %v1200_v27, 0.0  ;;  %v1232_v29 = vmul.f32 0.2, %v1200_v27  ;;  %vm596_vm0 = vcmp.gt.f32.partialorder %v580_v9, 0.0 }
 0x24f   :  { %v6440_v21 = vpop.permute.xlu0 %2691 }
 0x250   :  { %v1248_v49 = vsel %vm1216_vm6, %v1200_v27, %v1232_v29  ;;  %v1790_v17 = vpop.permute.xlu1 %1789 }
 0x251   :  { %v6446_v38 = vadd.f32 %v1248_v49, %v6160_v46  ;;  %v1820_v52 = vadd.f32 %v5496_v58, %v1790_v17  ;;  %4876 = vset.pattern.permute.xlu1 %v7810_v40  ;;  %v655_v40 = vmax.f32 %v6438_v16, %v652_v33  ;;  %v6463_v49 = vadd.f32 %v629_v43, %v6122_v60 }
 0x252   :  { %2723 = vperm.xlu1 %4876, %v5547_v15   ;;  %v2437_v15 = vadd.f32 %v7841_v2, %v6340_v11  ;;  %v610_v11 = vmul.f32 0.2, %v578_v56  ;;  %v2477_v43 = vsel %vm2445_vm12, %v2429_v62, %v2461_v53 }
 0x253   :  { %7842 = vst [vmem:[#allocation14_spill] sm:$0xff] %v6446_v38  ;;  %vm1836_vm10 = vcmp.gt.f32.partialorder %v1820_v52, 0.0  ;;  %v1852_v27 = vmul.f32 0.2, %v1820_v52  ;;  %v6457_v29 = vpop.permute.xlu0 %2699  ;;  %7843 = vst [vmem:[#allocation90_spill] sm:$0xff] %v6463_v49  ;;  %v654_v24 = vmax.f32 %v6463_v49, %v655_v40 }
 0x254   :  { %vm2453_vm15 = vcmp.gt.f32.partialorder %v2437_v15, 0.0  ;;  %v612_v40 = vmul.f32 0.2, %v580_v9  ;;  %v626_v62 = vsel %vm594_vm14, %v578_v56, %v610_v11 }
 0x255   :  { %v1868_v51 = vsel %vm1836_vm10, %v1820_v52, %v1852_v27  ;;  %v562_v17 = vpop.permute.xlu1 %561  ;;  %v6482_v52 = vadd.f32 %v627_v19, %v6079_v48  ;;  %v2482_v27 = vsel %vm2450_vm13, %v2434_v23, %v2466_v35  ;;  %v656_v4 = vmax.f32 %v6472_v37, %v654_v24  ;;  %v7848_v24 = vld [vmem:[#allocation15_spill] sm:$0xff] }
 0x256   :  { %v6468_v57 = vadd.f32 %v1868_v51, %v6160_v46  ;;  %2727 = vperm.xlu1 %4876, %v5617_v18   ;;  %v2469_v18 = vmul.f32 0.2, %v2437_v15  ;;  %v583_v8 = vadd.f32 %v6256_v7, %v562_v17  ;;  %v6493_v19 = vadd.f32 %v6490_v12, %v2480_v3 }
 0x257   :  { %v6476_v33 = vpop.permute.xlu0 %2703  ;;  %v2441_v35 = vadd.f32 %v7841_v2, %v6370_v45  ;;  %v6502_v23 = vadd.f32 %v2482_v27, %v5965_v10  ;;  %v2738_v3 = vadd.f32 %v7848_v24, %v6406_v54  ;;  %v660_v50 = vmax.f32 %v656_v4, %v6482_v52 }
 0x258   :  { %7844 = vst [vmem:[#allocation91_spill] sm:$0xff] %v6468_v57  ;;  %7845 = vst [vmem:[#allocation92_spill] sm:$0xff] %v6493_v19  ;;  %v2485_v17 = vsel %vm2453_vm15, %v2437_v15, %v2469_v18  ;;  %v615_v49 = vmul.f32 0.2, %v583_v8  ;;  %v6508_v45 = vadd.f32 %v626_v62, %v6236_v63  ;;  %vm599_vm3 = vcmp.gt.f32.partialorder %v583_v8, 0.0 }
 0x259   :  { %7847 = vst [vmem:[#allocation94_spill] sm:$0xff] %v6502_v23  ;;  %v6513_v10 = vadd.f32 %v2485_v17, %v6011_v5  ;;  %v2473_v15 = vmul.f32 0.2, %v2441_v35  ;;  %vm2457_vm4 = vcmp.gt.f32.partialorder %v2441_v35, 0.0  ;;  %v2770_v4 = vmul.f32 0.2, %v2738_v3 }
 0x25a   :  { %v1182_v22 = vpop.permute.xlu1 %1181  ;;  %4877 = vset.pattern.permute.xlu1 %v7757_v0  ;;  %v6499_v0 = vadd.f32 %v6347_v61, %v2477_v43  ;;  %v628_v43 = vsel %vm596_vm0, %v580_v9, %v612_v40  ;;  %v2741_v5 = vadd.f32 %v7848_v24, %v6425_v36  ;;  %v631_v40 = vsel %vm599_vm3, %v583_v8, %v615_v49 }
 0x25b   :  { %v2716_v51 = vpop.permute.xlu0 %2715  ;;  %v1203_v53 = vadd.f32 %v5747_v39, %v1182_v22  ;;  %v6523_v9 = vadd.f32 %v628_v43, %v6160_v46  ;;  %vm2754_vm6 = vcmp.gt.f32.partialorder %v2738_v3, 0.0  ;;  %v2489_v43 = vsel %vm2457_vm4, %v2441_v35, %v2473_v15 }
 0x25c   :  { %7846 = vst [vmem:[#allocation93_spill] sm:$0xff] %v6499_v0  ;;  %v2508_v11 = vmax.f32 %v6499_v0, %v6493_v19  ;;  %v2745_v49 = vadd.f32 %v7848_v24, %v6457_v29  ;;  %v6541_v8 = vadd.f32 %v631_v40, %v6213_v31  ;;  %vm2757_vm7 = vcmp.gt.f32.partialorder %v2741_v5, 0.0  ;;  %v6553_v29 = vld [vmem:[%s7603_s10 + $0x70] sm:$0xff] }
 0x25d   :  { %vm1219_vm2 = vcmp.gt.f32.partialorder %v1203_v53, 0.0  ;;  %v1235_v56 = vmul.f32 0.2, %v1203_v53  ;;  %v2773_v35 = vmul.f32 0.2, %v2741_v5 }
 0x25e   :  { %v6517_v27 = vmax.f32 %v2508_v11, %v6502_v23  ;;  %v659_v11 = vmax.f32 %v6508_v45, %v660_v50  ;;  %v2786_v50 = vsel %vm2754_vm6, %v2738_v3, %v2770_v4  ;;  %v2749_v3 = vadd.f32 %v7848_v24, %v2716_v51 }
 0x25f   :  { %v1802_v22 = vpop.permute.xlu1 %1801  ;;  %v1251_v18 = vsel %vm1219_vm2, %v1203_v53, %v1235_v56  ;;  %v2720_v62 = vpop.permute.xlu0 %2719  ;;  %v7850_v53 = vmax.f32 %v6446_v38, %v6272_v55  ;;  %v7852_v4 = vmax.f32 %v6468_v57, %v6318_v13  ;;  %vm2761_vm10 = vcmp.gt.f32.partialorder %v2745_v49, 0.0 }
 0x260   :  { %v1823_v54 = vadd.f32 %v5496_v58, %v1802_v22  ;;  %v6520_v63 = vadd.f32 %v1251_v18, %v6213_v31  ;;  %v2743_v18 = vadd.f32 %v7848_v24, %v6440_v21  ;;  %v658_v23 = vmax.f32 %v6523_v9, %v659_v11 }
 0x261   :  { %v2746_v21 = vadd.f32 %v7848_v24, %v6476_v33  ;;  %v2777_v33 = vmul.f32 0.2, %v2745_v49  ;;  %v6573_v13 = vadd.f32 %v6333_v32, %v2786_v50  ;;  %vm2765_vm13 = vcmp.gt.f32.partialorder %v2749_v3, 0.0 }
 0x262   :  { %7849 = vst [vmem:[#allocation15_spill] sm:$0xff] %v6520_v63  ;;  %vm1839_vm5 = vcmp.gt.f32.partialorder %v1823_v54, 0.0  ;;  %v6531_v17 = vmax.f32 %v7850_v53, %v6520_v63  ;;  %v1855_v56 = vmul.f32 0.2, %v1823_v54  ;;  %vm2759_vm9 = vcmp.gt.f32.partialorder %v2743_v18, 0.0 }
 0x263   :  { %v2732_v15 = vpop.permute.xlu0 %2731  ;;  %v6570_v63 = vadd.f32 %v2489_v43, %v6122_v60  ;;  %vm2762_vm12 = vcmp.gt.f32.partialorder %v2746_v21, 0.0 }
 0x264   :  { %v557_v36 = vpop.permute.xlu1 %556  ;;  %v1871_v55 = vsel %vm1839_vm5, %v1823_v54, %v1855_v56  ;;  %v661_v56 = vmax.f32 %v658_v23, %v6541_v8  ;;  %v2753_v19 = vadd.f32 %v7848_v24, %v2732_v15  ;;  %v2778_v23 = vmul.f32 0.2, %v2746_v21 }
 0x265   :  { %v582_v53 = vadd.f32 %v6256_v7, %v557_v36  ;;  %v6546_v22 = vadd.f32 %v1871_v55, %v6213_v31  ;;  %v2775_v7 = vmul.f32 0.2, %v2743_v18  ;;  %v2750_v55 = vadd.f32 %v7848_v24, %v2720_v62 }
 0x266   :  { %v2785_v43 = vmul.f32 0.2, %v2753_v19  ;;  %vm2769_vm15 = vcmp.gt.f32.partialorder %v2753_v19, 0.0 }
 0x267   :  { %7851 = vst [vmem:[#allocation95_spill] sm:$0xff] %v6546_v22  ;;  %vm598_vm8 = vcmp.gt.f32.partialorder %v582_v53, 0.0  ;;  %v614_v54 = vmul.f32 0.2, %v582_v53  ;;  %v6560_v40 = vmax.f32 %v7852_v4, %v6546_v22  ;;  %v2789_v4 = vsel %vm2757_vm7, %v2741_v5, %v2773_v35 }
 0x268   :  { %v2791_v15 = vsel %vm2759_vm9, %v2743_v18, %v2775_v7  ;;  %vm2766_vm14 = vcmp.gt.f32.partialorder %v2750_v55, 0.0  ;;  %v2794_v18 = vsel %vm2762_vm12, %v2746_v21, %v2778_v23  ;;  %v2801_v21 = vsel %vm2769_vm15, %v2753_v19, %v2785_v43  ;;  %v7855_v43 = vld [vmem:[#allocation30_spill] sm:$0xff] }
 0x269   :  { %v630_v11 = vsel %vm598_vm8, %v582_v53, %v614_v54  ;;  %v868_v36 = vpop.permute.xlu1 %867  ;;  %v2781_v53 = vmul.f32 0.2, %v2749_v3  ;;  %v6600_v23 = vadd.f32 %v2794_v18, %v6043_v34 }
 0x26a   :  { %v6566_v0 = vadd.f32 %v630_v11, %v6553_v29  ;;  %v892_v51 = vadd.f32 %v5671_v30, %v868_v36  ;;  %v2793_v11 = vsel %vm2761_vm10, %v2745_v49, %v2777_v33  ;;  %v2782_v30 = vmul.f32 0.2, %v2750_v55  ;;  %v6589_v33 = vld [vmem:[%s7603_s10 + $0x38] sm:$0xff] }
 0x26b   :  { %v2797_v7 = vsel %vm2765_vm13, %v2749_v3, %v2781_v53  ;;  %7853 = vst [vmem:[#allocation96_spill] sm:$0xff] %v6600_v23 }
 0x26c   :  { %v662_v54 = vmax.f32 %v6566_v0, %v661_v56  ;;  %vm908_vm11 = vcmp.gt.f32.partialorder %v892_v51, 0.0  ;;  %v924_v62 = vmul.f32 0.2, %v892_v51  ;;  %v6584_v56 = vadd.f32 %v6401_v6, %v2791_v15 }
 0x26d   :  { %v2798_v15 = vsel %vm2766_vm14, %v2750_v55, %v2782_v30  ;;  %v6603_v53 = vadd.f32 %v2797_v7, %v6079_v48  ;;  %v6617_v48 = vadd.f32 %v2801_v21, %v6213_v31  ;;  %v7858_v31 = vmax.f32 %v6513_v10, %v6517_v27 }
 0x26e   :  { %v663_v36 = vrot.slane %v662_v54, 4  ;;  %v940_v22 = vsel %vm908_vm11, %v892_v51, %v924_v62  ;;  %v2104_v50 = vpop.permute.xlu1 %2103  ;;  %v6592_v51 = vadd.f32 %v6589_v33, %v2793_v11  ;;  %v6614_v34 = vadd.f32 %v2798_v15, %v6160_v46 }
 0x26f   :  { %v6580_v5 = vadd.f32 %v940_v22, %v6553_v29  ;;  %v2131_v35 = vadd.f32 %v5499_v59, %v2104_v50  ;;  %v6597_v50 = vadd.f32 %v6355_v47, %v2789_v4  ;;  %7854 = vst [vmem:[#allocation97_spill] sm:$0xff] %v6603_v53 }
 0x270   :  { %v664_v49 = vmax.f32 %v662_v54, %v663_v36 }
 0x271   :  { %v972_v22 = vmax.f32 %v6580_v5, %v6388_v28  ;;  %vm2147_vm0 = vcmp.gt.f32.partialorder %v2131_v35, 0.0  ;;  %v2163_v62 = vmul.f32 0.2, %v2131_v35  ;;  %v2819_v28 = vmax.f32 %v6573_v13, %v6584_v56 }
 0x272   :  { %v665_v3 = vrot.slane %v664_v49, 2  ;;  %v2821_v19 = vmax.f32 %v6597_v50, %v6592_v51 }
 0x273   :  { %v973_v54 = vrot.slane %v972_v22, 4  ;;  %v2179_v11 = vsel %vm2147_vm0, %v2131_v35, %v2163_v62  ;;  %v2362_v36 = vpop.permute.xlu1 %2361  ;;  %v7856_v35 = vld [vmem:[#allocation16_spill] sm:$0xff] }
 0x274   :  { %v666_v57 = vmax.f32 %v664_v49, %v665_v3  ;;  %v6608_v38 = vadd.f32 %v2179_v11, %v6122_v60  ;;  %v2428_v55 = vadd.f32 %v7841_v2, %v2362_v36  ;;  %v7857_v18 = vmax.f32 %v7855_v43, %v7856_v35  ;;  %v7868_v11 = vld [vmem:[#allocation17_spill] sm:$0xff] }
 0x275   :  { %v974_v4 = vmax.f32 %v972_v22, %v973_v54  ;;  %v6626_v49 = vmax.f32 %v6600_v23, %v2819_v28  ;;  %v6629_v62 = vmax.f32 %v2821_v19, %v6603_v53  ;;  %v2513_v22 = vmax.f32 %v7858_v31, %v6570_v63 }
 0x276   :  { %v667_v30 = vrot.slane %v666_v57, 1  ;;  %v6623_v7 = vmax.f32 %v7857_v18, %v6608_v38  ;;  %vm2444_vm2 = vcmp.gt.f32.partialorder %v2428_v55, 0.0  ;;  %v2460_v60 = vmul.f32 0.2, %v2428_v55 }
 0x277   :  { %v975_v46 = vrot.slane %v974_v4, 2  ;;  %v2370_v15 = vpop.permute.xlu1 %2369 }
 0x278   :  { %v6635_v21 = vmax.f32 %v666_v57, %v667_v30  ;;  %v2476_v3 = vsel %vm2444_vm2, %v2428_v55, %v2460_v60  ;;  %v2430_v54 = vadd.f32 %v7841_v2, %v2370_v15 }
 0x279   :  { %v976_v28 = vmax.f32 %v974_v4, %v975_v46  ;;  %v6643_v19 = vadd.f32 %v6333_v32, %v2476_v3 }
 0x27a   :  { %v683_v35 = vsub.f32 %v6566_v0, %v6635_v21  ;;  %vm2446_vm3 = vcmp.gt.f32.partialorder %v2430_v54, 0.0  ;;  %v2462_v27 = vmul.f32 0.2, %v2430_v54  ;;  %v669_v57 = vsub.f32 %v6336_v44, %v6635_v21 }
 0x27b   :  { %v977_v55 = vrot.slane %v976_v28, 1  ;;  %v2512_v30 = vmax.f32 %v6643_v19, %v2513_v22  ;;  %v2374_v18 = vpop.permute.xlu1 %2373  ;;  %v670_v60 = vsub.f32 %v6350_v1, %v6635_v21  ;;  %v671_v4 = vsub.f32 %v6378_v41, %v6635_v21 }
 0x27c   :  { %v713_v32 = vmul.f32 1.442695, %v683_v35  ;;  %v2478_v46 = vsel %vm2446_vm3, %v2430_v54, %v2462_v27  ;;  %v2431_v15 = vadd.f32 %v7841_v2, %v2374_v18  ;;  %v685_v0 = vmul.f32 1.442695, %v669_v57 }
 0x27d   :  { %v6655_v31 = vmax.f32 %v976_v28, %v977_v55  ;;  %v6658_v3 = vadd.f32 %v6375_v14, %v2478_v46  ;;  %v687_v44 = vmul.f32 1.442695, %v670_v60  ;;  %v672_v22 = vsub.f32 %v6358_v26, %v6635_v21  ;;  %v7859_v55 = vld [vmem:[#allocation18_spill] sm:$0xff] }
 0x27e   :  { %4879 = vpow2.f32 %v713_v32  ;;  %vm2447_vm4 = vcmp.gt.f32.partialorder %v2431_v15, 0.0  ;;  %v2463_v1 = vmul.f32 0.2, %v2431_v15  ;;  %v689_v36 = vmul.f32 1.442695, %v671_v4 }
 0x27f   :  { %v993_v41 = vsub.f32 %v6580_v5, %v6655_v31  ;;  %v6665_v54 = vmax.f32 %v6658_v3, %v2512_v30  ;;  %v2382_v35 = vpop.permute.xlu1 %2381  ;;  %4881 = vpow2.f32 %v685_v0  ;;  %v691_v28 = vmul.f32 1.442695, %v672_v22  ;;  %v7860_v5 = vld [vmem:[#allocation19_spill] sm:$0xff] }
 0x280   :  { %v2479_v27 = vsel %vm2447_vm4, %v2431_v15, %v2463_v1  ;;  %v2433_v57 = vadd.f32 %v7841_v2, %v2382_v35  ;;  %4883 = vpow2.f32 %v687_v44  ;;  %v979_v26 = vsub.f32 %v7859_v55, %v6655_v31 }
 0x281   :  { %v1023_v18 = vmul.f32 1.442695, %v993_v41  ;;  %v6671_v60 = vadd.f32 %v6355_v47, %v2479_v27  ;;  %4885 = vpow2.f32 %v689_v36  ;;  %v980_v4 = vsub.f32 %v7860_v5, %v6655_v31  ;;  %v7861_v36 = vld [vmem:[#allocation28_spill] sm:$0xff] }
 0x282   :  { %vm2449_vm5 = vcmp.gt.f32.partialorder %v2433_v57, 0.0  ;;  %v2465_v30 = vmul.f32 0.2, %v2433_v57  ;;  %4887 = vpow2.f32 %v691_v28  ;;  %v995_v32 = vmul.f32 1.442695, %v979_v26 }
 0x283   :  { %4889 = vpow2.f32 %v1023_v18  ;;  %v2390_v46 = vpop.permute.xlu1 %2389  ;;  %v997_v15 = vmul.f32 1.442695, %v980_v4  ;;  %v673_v0 = vsub.f32 %v6392_v20, %v6635_v21  ;;  %v674_v44 = vsub.f32 %v6404_v25, %v6635_v21  ;;  %v7862_v20 = vld [vmem:[#allocation21_spill] sm:$0xff] }
 0x284   :  { %v2481_v22 = vsel %vm2449_vm5, %v2433_v57, %v2465_v30  ;;  %v2435_v47 = vadd.f32 %v7841_v2, %v2390_v46  ;;  %4891 = vpow2.f32 %v995_v32  ;;  %v981_v1 = vsub.f32 %v7861_v36, %v6655_v31  ;;  %v7863_v18 = vld [vmem:[#allocation89_spill] sm:$0xff]  ;;  %v7865_v46 = vld [vmem:[#allocation48_spill] sm:$0xff] }
 0x285   :  { %v6683_v41 = vadd.f32 %v6401_v6, %v2481_v22  ;;  %4893 = vpow2.f32 %v997_v15  ;;  %v693_v35 = vmul.f32 1.442695, %v673_v0  ;;  %v695_v28 = vmul.f32 1.442695, %v674_v44 }
 0x286   :  { %vm2451_vm6 = vcmp.gt.f32.partialorder %v2435_v47, 0.0  ;;  %v2467_v27 = vmul.f32 0.2, %v2435_v47  ;;  %v982_v55 = vsub.f32 %v7862_v20, %v6655_v31  ;;  %v999_v26 = vmul.f32 1.442695, %v981_v1  ;;  %v7866_v1 = vld [vmem:[#allocation29_spill] sm:$0xff] }
 0x287   :  { %v2515_v25 = vmax.f32 %v6683_v41, %v6665_v54  ;;  %4895 = vpow2.f32 %v693_v35  ;;  %v675_v57 = vsub.f32 %v6413_v42, %v6635_v21  ;;  %v676_v6 = vsub.f32 %v7863_v18, %v6635_v21 }
 0x288   :  { %v6693_v5 = vpop.eup %4879  ;;  %v2483_v4 = vsel %vm2451_vm6, %v2435_v47, %v2467_v27  ;;  %v1178_v30 = vpop.permute.xlu1 %1177  ;;  %4897 = vpow2.f32 %v695_v28  ;;  %v1001_v32 = vmul.f32 1.442695, %v982_v55  ;;  %v983_v15 = vsub.f32 %v7865_v46, %v6655_v31 }
 0x289   :  { %7864 = vst [vmem:[#allocation30_spill] sm:$0xff] %v6693_v5  ;;  %v4882_v0 = vpop.eup %4881  ;;  %v6698_v44 = vadd.f32 %v6589_v33, %v2483_v4  ;;  %v1202_v54 = vadd.f32 %v5747_v39, %v1178_v30  ;;  %4899 = vpow2.f32 %v999_v26  ;;  %v697_v42 = vmul.f32 1.442695, %v675_v57 }
 0x28a   :  { %v4884_v22 = vpop.eup %4883  ;;  %4901 = vpow2.f32 %v1001_v32  ;;  %v699_v36 = vmul.f32 1.442695, %v676_v6  ;;  %v984_v47 = vsub.f32 %v7866_v1, %v6655_v31  ;;  %v1003_v35 = vmul.f32 1.442695, %v983_v15 }
 0x28b   :  { %v4886_v28 = vpop.eup %4885  ;;  %v2511_v27 = vmax.f32 %v6671_v60, %v6698_v44  ;;  %vm1218_vm7 = vcmp.gt.f32.partialorder %v1202_v54, 0.0  ;;  %v1234_v20 = vmul.f32 0.2, %v1202_v54  ;;  %v717_v55 = vadd.f32 %v4884_v22, %v4882_v0 }
 0x28c   :  { %v4888_v33 = vpop.eup %4887  ;;  %v4538_v18 = vpack.c.bf16 %v4884_v22, %v4882_v0  ;;  %4903 = vpow2.f32 %v697_v42  ;;  %v1005_v39 = vmul.f32 1.442695, %v984_v47  ;;  %v677_v26 = vsub.f32 %v6472_v37, %v6635_v21  ;;  %v7870_v22 = vld [vmem:[#allocation57_spill] sm:$0xff] }
 0x28d   :  { %v6707_v57 = vpop.eup %4889  ;;  %v6709_v6 = vmax.f32 %v2511_v27, %v2515_v25  ;;  %v1250_v4 = vsel %vm1218_vm7, %v1202_v54, %v1234_v20  ;;  %v1488_v30 = vpop.permute.xlu1 %1487  ;;  %v718_v32 = vadd.f32 %v4886_v28, %v717_v55  ;;  %v4541_v46 = vpack.c.bf16 %v4888_v33, %v4886_v28 }
 0x28e   :  { %7867 = vst [vmem:[#allocation16_spill] sm:$0xff] %v6707_v57  ;;  %v4892_v15 = vpop.eup %4891  ;;  %v6712_v1 = vadd.f32 %v1250_v4, %v6553_v29  ;;  %v1512_v53 = vadd.f32 %v7868_v11, %v1488_v30  ;;  %4539 = vmatpush3.bf16.msra.mxu1 %v4538_v18  ;;  %4905 = vpow2.f32 %v699_v36  ;;  %v678_v0 = vsub.f32 %v6438_v16, %v6635_v21  ;;  %v7871_v16 = vld [vmem:[#allocation45_spill] sm:$0xff] }
 0x28f   :  { %v4894_v37 = vpop.eup %4893  ;;  %v7869_v42 = vmov 0.0|0.0   ;;  %v719_v25 = vadd.f32 %v4888_v33, %v718_v32  ;;  %4907 = vpow2.f32 %v1003_v35  ;;  %v701_v54 = vmul.f32 1.442695, %v677_v26 }
 0x290   :  { %4540 = vmatprep.subr.bf16.mxu1 %v7869_v42  ;;  %v985_v47 = vsub.f32 %v7870_v22, %v6655_v31  ;;  %v1282_v28 = vmax.f32 %v6712_v1, %v6531_v17  ;;  %vm1528_vm8 = vcmp.gt.f32.partialorder %v1512_v53, 0.0  ;;  %v1544_v27 = vmul.f32 0.2, %v1512_v53 }
 0x291   :  { %v1027_v11 = vadd.f32 %v4894_v37, %v4892_v15  ;;  %v4896_v20 = vpop.eup %4895  ;;  %v4562_v36 = vpack.c.bf16 %v4894_v37, %v4892_v15  ;;  %4909 = vpow2.f32 %v1005_v39  ;;  %v703_v55 = vmul.f32 1.442695, %v678_v0 }
 0x292   :  { %v986_v18 = vsub.f32 %v7871_v16, %v6655_v31  ;;  %v4898_v4 = vpop.eup %4897  ;;  %v1283_v33 = vrot.slane %v1282_v28, 4  ;;  %v1560_v35 = vsel %vm1528_vm8, %v1512_v53, %v1544_v27  ;;  %v2676_v26 = vpop.permute.xlu1 %2675  ;;  %4542 = vmatpush3.bf16.msra.mxu1 %v4541_v46  ;;  %v720_v30 = vadd.f32 %v4896_v20, %v719_v25  ;;  %v7872_v25 = vld [vmem:[#allocation88_spill] sm:$0xff] }
 0x293   :  { %4911 = vpow2.f32 %v701_v54  ;;  %v4900_v32 = vpop.eup %4899  ;;  %v6725_v17 = vadd.f32 %v1560_v35, %v6553_v29  ;;  %v2739_v22 = vadd.f32 %v7848_v24, %v2676_v26  ;;  %4563 = vmatpush3.bf16.msra.mxu0 %v4562_v36  ;;  %4543 = vmatprep.subr.bf16.mxu1 %v7869_v42  ;;  %v4544_v39 = vpack.c.bf16 %v4898_v4, %v4896_v20 }
 0x294   :  { %4913 = vpow2.f32 %v703_v55  ;;  %v4902_v15 = vpop.eup %4901  ;;  %v1284_v0 = vmax.f32 %v1282_v28, %v1283_v33  ;;  %v721_v37 = vadd.f32 %v4898_v4, %v720_v30  ;;  %4564 = vmatprep.subr.bf16.mxu0 %v7869_v42  ;;  %v1028_v53 = vadd.f32 %v4900_v32, %v1027_v11 }
 0x295   :  { %v1007_v46 = vmul.f32 1.442695, %v985_v47  ;;  %v1592_v54 = vmax.f32 %v6725_v17, %v7872_v25  ;;  %vm2755_vm9 = vcmp.gt.f32.partialorder %v2739_v22, 0.0  ;;  %v2771_v27 = vmul.f32 0.2, %v2739_v22 }
 0x296   :  { %v4565_v16 = vpack.c.bf16 %v4902_v15, %v4900_v32  ;;  %v4904_v35 = vpop.eup %4903  ;;  %v1285_v26 = vrot.slane %v1284_v0, 2  ;;  %v2680_v36 = vpop.permute.xlu1 %2679  ;;  %4545 = vmatpush3.bf16.msra.mxu1 %v4544_v39  ;;  %v1029_v23 = vadd.f32 %v4902_v15, %v1028_v53  ;;  %v1009_v20 = vmul.f32 1.442695, %v986_v18 }
 0x297   :  { %4915 = vpow2.f32 %v1007_v46  ;;  %v1593_v55 = vrot.slane %v1592_v54, 4  ;;  %v2787_v28 = vsel %vm2755_vm9, %v2739_v22, %v2771_v27  ;;  %v2740_v4 = vadd.f32 %v7848_v24, %v2680_v36  ;;  %4546 = vmatprep.subr.bf16.mxu1 %v7869_v42 }
 0x298   :  { %4566 = vmatpush3.bf16.msra.mxu0 %v4565_v16  ;;  %v722_v47 = vadd.f32 %v4904_v35, %v721_v37  ;;  %v4906_v11 = vpop.eup %4905  ;;  %v7873_v33 = vmax.f32 %v6626_v49, %v6614_v34  ;;  %v7874_v30 = vmax.f32 %v6629_v62, %v6617_v48  ;;  %v1286_v39 = vmax.f32 %v1284_v0, %v1285_v26 }
 0x299   :  { %v6743_v18 = vadd.f32 %v6347_v61, %v2787_v28  ;;  %4567 = vmatprep.subr.bf16.mxu0 %v7869_v42  ;;  %4917 = vpow2.f32 %v1009_v20  ;;  %v4908_v22 = vpop.eup %4907  ;;  %v1594_v15 = vmax.f32 %v1592_v54, %v1593_v55  ;;  %vm2756_vm10 = vcmp.gt.f32.partialorder %v2740_v4, 0.0 }
 0x29a   :  { %v6740_v32 = vmax.f32 %v7874_v30, %v7873_v33  ;;  %v2772_v37 = vmul.f32 0.2, %v2740_v4  ;;  %v723_v53 = vadd.f32 %v4906_v11, %v722_v47  ;;  %v1287_v46 = vrot.slane %v1286_v39, 1  ;;  %v2688_v25 = vpop.permute.xlu1 %2687 }
 0x29b   :  { %v4547_v49 = vpack.c.bf16 %v4906_v11, %v4904_v35  ;;  %v1030_v27 = vadd.f32 %v4908_v22, %v1029_v23  ;;  %v679_v62 = vsub.f32 %v6508_v45, %v6635_v21  ;;  %v4910_v16 = vpop.eup %4909  ;;  %v1595_v0 = vrot.slane %v1594_v15, 2 }
 0x29c   :  { %v2824_v61 = vmax.f32 %v6743_v18, %v6740_v32  ;;  %v2742_v26 = vadd.f32 %v7848_v24, %v2688_v25  ;;  %v680_v54 = vsub.f32 %v6482_v52, %v6635_v21  ;;  %v6753_v20 = vmax.f32 %v1286_v39, %v1287_v46 }
 0x29d   :  { %v4912_v36 = vpop.eup %4911  ;;  %v2788_v55 = vsel %vm2756_vm10, %v2740_v4, %v2772_v37  ;;  %4548 = vmatpush3.bf16.msra.mxu1 %v4547_v49  ;;  %v1031_v35 = vadd.f32 %v4910_v16, %v1030_v27  ;;  %v4568_v23 = vpack.c.bf16 %v4910_v16, %v4908_v22  ;;  %v1596_v47 = vmax.f32 %v1594_v15, %v1595_v0  ;;  %v2980_v0 = vld [vmem:[%s7598_s5] sm:$0xff] }
 0x29e   :  { %v4914_v28 = vpop.eup %4913  ;;  %vm2758_vm11 = vcmp.gt.f32.partialorder %v2742_v26, 0.0  ;;  %v2774_v45 = vmul.f32 0.2, %v2742_v26  ;;  %4549 = vmatprep.subr.bf16.mxu1 %v7869_v42  ;;  %v724_v11 = vadd.f32 %v4912_v36, %v723_v53  ;;  %v1303_v33 = vsub.f32 %v6712_v1, %v6753_v20  ;;  %v2696_v30 = vpop.permute.xlu1 %2695  ;;  %v7876_v1 = vld [vmem:[#allocation58_spill] sm:$0xff]  ;;  %2990 = vperm.xlu1 %4877, %v2980_v0  }
 0x29f   :  { %4569 = vmatpush3.bf16.msra.mxu0 %v4568_v23  ;;  %v4550_v52 = vpack.c.bf16 %v4914_v28, %v4912_v36  ;;  %v705_v32 = vmul.f32 1.442695, %v679_v62  ;;  %v707_v39 = vmul.f32 1.442695, %v680_v54  ;;  %v1597_v46 = vrot.slane %v1596_v47, 1  ;;  %v7877_v54 = vld [vmem:[#allocation63_spill] sm:$0xff] }
 0x2a0   :  { %v2790_v4 = vsel %vm2758_vm11, %v2742_v26, %v2774_v45  ;;  %v2744_v37 = vadd.f32 %v7848_v24, %v2696_v30  ;;  %v6759_v22 = vadd.f32 %v4914_v28, %v724_v11  ;;  %4570 = vmatprep.subr.bf16.mxu0 %v7869_v42  ;;  %v1333_v25 = vmul.f32 1.442695, %v1303_v33  ;;  %v5212_v33 = vld [vmem:[%s7603_s10 + $0x30] sm:$0xff] }
 0x2a1   :  { %v4916_v15 = vpop.eup %4915  ;;  %v6763_v53 = vadd.f32 %v6490_v12, %v2790_v4  ;;  %4551 = vmatpush3.bf16.msra.mxu1 %v4550_v52  ;;  %4919 = vpow2.f32 %v705_v32  ;;  %v987_v49 = vsub.f32 %v7876_v1, %v6655_v31  ;;  %v6767_v27 = vmax.f32 %v1596_v47, %v1597_v46  ;;  %v7878_v32 = vld [vmem:[#allocation90_spill] sm:$0xff]  ;;  %v2981_v4 = vld [vmem:[%s7598_s5 + $0x8] sm:$0xff]  ;;  %v7879_v1 = vld [vmem:[#allocation80_spill] sm:$0xff] }
 0x2a2   :  { %7875 = vst [vmem:[#allocation18_spill] sm:$0xff] %v6759_v22  ;;  %vm2760_vm12 = vcmp.gt.f32.partialorder %v2744_v37, 0.0  ;;  %v2776_v62 = vmul.f32 0.2, %v2744_v37  ;;  %v1032_v16 = vadd.f32 %v4916_v15, %v1031_v35  ;;  %4552 = vmatprep.subr.bf16.mxu1 %v7869_v42  ;;  %4921 = vpow2.f32 %v1333_v25  ;;  %2995 = vperm.xlu0 %4878, %v2981_v4  }
 0x2a3   :  { %v4918_v26 = vpop.eup %4917  ;;  %v6774_v12 = vadd.f32 %v6375_v14, %v2788_v55  ;;  %v988_v36 = vsub.f32 %v7877_v54, %v6655_v31  ;;  %v1011_v23 = vmul.f32 1.442695, %v987_v49  ;;  %v1613_v28 = vsub.f32 %v6725_v17, %v6767_v27  ;;  %v2394_v11 = vpop.permute.xlu1 %2393 }
 0x2a4   :  { %v2792_v35 = vsel %vm2760_vm12, %v2744_v37, %v2776_v62  ;;  %v6780_v47 = vadd.f32 %v4918_v26, %v1032_v16  ;;  %v4571_v45 = vpack.c.bf16 %v4918_v26, %v4916_v15  ;;  %v2436_v14 = vadd.f32 %v7841_v2, %v2394_v11  ;;  %v7880_v26 = vld [vmem:[#allocation62_spill] sm:$0xff] }
 0x2a5   :  { %v6785_v30 = vadd.f32 %v5212_v33, %v2792_v35  ;;  %4923 = vpow2.f32 %v707_v39  ;;  %v1013_v55 = vmul.f32 1.442695, %v988_v36  ;;  %v2826_v52 = vmax.f32 %v6763_v53, %v2824_v61  ;;  %v5213_v36 = vld [vmem:[%s7603_s10 + $0x40] sm:$0xff] }
 0x2a6   :  { %4572 = vmatpush3.bf16.msra.mxu0 %v4571_v45  ;;  %4925 = vpow2.f32 %v1011_v23  ;;  %v681_v17 = vsub.f32 %v6523_v9, %v6635_v21  ;;  %v682_v46 = vsub.f32 %v7878_v32, %v6635_v21  ;;  %vm2452_vm13 = vcmp.gt.f32.partialorder %v2436_v14, 0.0 }
 0x2a7   :  { %v2820_v37 = vmax.f32 %v6774_v12, %v6785_v30  ;;  %v2468_v39 = vmul.f32 0.2, %v2436_v14  ;;  %4573 = vmatprep.subr.bf16.mxu0 %v7869_v42  ;;  %4927 = vpow2.f32 %v1013_v55  ;;  %v6799_v61 = vmul.f32 1.442695, %v1613_v28  ;;  %v2402_v15 = vpop.permute.xlu1 %2401 }
 0x2a8   :  { %v709_v9 = vmul.f32 1.442695, %v681_v17  ;;  %v711_v25 = vmul.f32 1.442695, %v682_v46  ;;  %v989_v49 = vsub.f32 %v7879_v1, %v6655_v31  ;;  %v2438_v0 = vadd.f32 %v7841_v2, %v2402_v15 }
 0x2a9   :  { %v6803_v62 = vmax.f32 %v2820_v37, %v2826_v52  ;;  %v2484_v16 = vsel %vm2452_vm13, %v2436_v14, %v2468_v39  ;;  %v990_v54 = vsub.f32 %v7880_v26, %v6655_v31  ;;  %v684_v35 = vsub.f32 %v6541_v8, %v6635_v21  ;;  %v7882_v52 = vld [vmem:[#allocation77_spill] sm:$0xff]  ;;  %v7884_v8 = vld [vmem:[#allocation86_spill] sm:$0xff] }
 0x2aa   :  { %v6811_v23 = vadd.f32 %v5213_v36, %v2484_v16  ;;  %4929 = vpow2.f32 %v709_v9  ;;  %v1015_v28 = vmul.f32 1.442695, %v989_v49  ;;  %vm2454_vm14 = vcmp.gt.f32.partialorder %v2438_v0, 0.0  ;;  %v7885_v37 = vld [vmem:[#allocation78_spill] sm:$0xff] }
 0x2ab   :  { %v6815_v45 = vpop.eup %4919  ;;  %v2470_v11 = vmul.f32 0.2, %v2438_v0  ;;  %4931 = vpow2.f32 %v711_v25  ;;  %v1017_v33 = vmul.f32 1.442695, %v990_v54  ;;  %v715_v55 = vmul.f32 1.442695, %v684_v35 }
 0x2ac   :  { %7881 = vst [vmem:[#allocation19_spill] sm:$0xff] %v6815_v45  ;;  %v2517_v14 = vmax.f32 %v6811_v23, %v6709_v6  ;;  %4933 = vpow2.f32 %v1015_v28  ;;  %v991_v17 = vsub.f32 %v7882_v52, %v6655_v31  ;;  %v6821_v32 = vpop.eup %4921  ;;  %v1798_v4 = vpop.permute.xlu1 %1797  ;;  %v992_v21 = vsub.f32 %v7884_v8, %v6655_v31  ;;  %v6830_v6 = vld [vmem:[%s7603_s10 + $0x50] sm:$0xff]  ;;  %v7889_v8 = vld [vmem:[#allocation36_spill] sm:$0xff] }
 0x2ad   :  { %7883 = vst [vmem:[#allocation28_spill] sm:$0xff] %v6821_v32  ;;  %v2486_v46 = vsel %vm2454_vm14, %v2438_v0, %v2470_v11  ;;  %4935 = vpow2.f32 %v1017_v33  ;;  %v994_v39 = vsub.f32 %v7885_v37, %v6655_v31  ;;  %v1822_v9 = vadd.f32 %v5496_v58, %v1798_v4  ;;  %v7887_v0 = vld [vmem:[#allocation33_spill] sm:$0xff]  ;;  %v7888_v31 = vld [vmem:[#allocation34_spill] sm:$0xff] }
 0x2ae   :  { %v6833_v15 = vadd.f32 %v6830_v6, %v2486_v46  ;;  %4937 = vpow2.f32 %v715_v55  ;;  %v1019_v25 = vmul.f32 1.442695, %v991_v17  ;;  %v1021_v49 = vmul.f32 1.442695, %v992_v21 }
 0x2af   :  { %v6836_v1 = vpop.eup %4923  ;;  %v1025_v16 = vmul.f32 1.442695, %v994_v39  ;;  %v1289_v26 = vsub.f32 %v7887_v0, %v6753_v20  ;;  %v1290_v54 = vsub.f32 %v7888_v31, %v6753_v20  ;;  %vm1838_vm15 = vcmp.gt.f32.partialorder %v1822_v9, 0.0  ;;  %v7893_v0 = vld [vmem:[#allocation22_spill] sm:$0xff] }
 0x2b0   :  { %7886 = vst [vmem:[#allocation21_spill] sm:$0xff] %v6836_v1  ;;  %v4926_v36 = vpop.eup %4925  ;;  %v4553_v28 = vpack.c.bf16 %v6836_v1, %v6815_v45  ;;  %v6845_v35 = vmax.f32 %v6833_v15, %v2517_v14  ;;  %v1854_v58 = vmul.f32 0.2, %v1822_v9  ;;  %4939 = vpow2.f32 %v1019_v25 }
 0x2b1   :  { %v4928_v11 = vpop.eup %4927  ;;  %v1034_v33 = vadd.f32 %v4926_v36, %v6780_v47  ;;  %v1305_v55 = vmul.f32 1.442695, %v1289_v26  ;;  %v1307_v52 = vmul.f32 1.442695, %v1290_v54  ;;  %4941 = vpow2.f32 %v1021_v49  ;;  %v2108_v4 = vpop.permute.xlu1 %2107 }
 0x2b2   :  { %4554 = vmatpush3.bf16.msra.mxu1 %v4553_v28  ;;  %v4574_v17 = vpack.c.bf16 %v4928_v11, %v4926_v36  ;;  %v1870_v46 = vsel %vm1838_vm15, %v1822_v9, %v1854_v58  ;;  %v1291_v21 = vsub.f32 %v7889_v8, %v6753_v20  ;;  %4943 = vpow2.f32 %v1025_v16  ;;  %v7892_v9 = vld [vmem:[#allocation35_spill] sm:$0xff] }
 0x2b3   :  { %v6850_v37 = vadd.f32 %v4928_v11, %v1034_v33  ;;  %4555 = vmatprep.subr.bf16.mxu1 %v7869_v42  ;;  %v6854_v14 = vadd.f32 %v1870_v46, %v6553_v29  ;;  %v2132_v47 = vadd.f32 %v5499_v59, %v2108_v4  ;;  %4945 = vpow2.f32 %v1305_v55  ;;  %v7896_v58 = vld [vmem:[#allocation23_spill] sm:$0xff] }
 0x2b4   :  { %v6857_v39 = vpop.eup %4929  ;;  %4575 = vmatpush3.bf16.msra.mxu0 %v4574_v17  ;;  %v1292_v25 = vsub.f32 %v7892_v9, %v6753_v20  ;;  %v1309_v49 = vmul.f32 1.442695, %v1291_v21  ;;  %v1599_v26 = vsub.f32 %v7893_v0, %v6767_v27  ;;  %4947 = vpow2.f32 %v1307_v52 }
 0x2b5   :  { %7890 = vst [vmem:[#allocation89_spill] sm:$0xff] %v6850_v37  ;;  %7891 = vst [vmem:[#allocation48_spill] sm:$0xff] %v6857_v39  ;;  %v6863_v31 = vpop.eup %4931  ;;  %4576 = vmatprep.subr.bf16.mxu0 %v7869_v42  ;;  %v1902_v16 = vmax.f32 %v6854_v14, %v6560_v40  ;;  %vm2148_vm0 = vcmp.gt.f32.partialorder %v2132_v47, 0.0  ;;  %v2164_v59 = vmul.f32 0.2, %v2132_v47  ;;  %v1600_v11 = vsub.f32 %v7896_v58, %v6767_v27  ;;  %v7898_v40 = vld [vmem:[#allocation41_spill] sm:$0xff] }
 0x2b6   :  { %7894 = vst [vmem:[#allocation29_spill] sm:$0xff] %v6863_v31  ;;  %v6868_v54 = vpop.eup %4933  ;;  %v4556_v36 = vpack.c.bf16 %v6863_v31, %v6857_v39  ;;  %4949 = vpow2.f32 %v1309_v49  ;;  %v1311_v28 = vmul.f32 1.442695, %v1292_v25  ;;  %v2406_v46 = vpop.permute.xlu1 %2405  ;;  %v1615_v4 = vmul.f32 1.442695, %v1599_v26 }
 0x2b7   :  { %7895 = vst [vmem:[#allocation17_spill] sm:$0xff] %v6868_v54  ;;  %v6874_v33 = vpop.eup %4935  ;;  %v1903_v55 = vrot.slane %v1902_v16, 4  ;;  %v2180_v17 = vsel %vm2148_vm0, %v2132_v47, %v2164_v59  ;;  %v1293_v8 = vsub.f32 %v7898_v40, %v6753_v20  ;;  %v2439_v25 = vadd.f32 %v7841_v2, %v2406_v46 }
 0x2b8   :  { %7897 = vst [vmem:[#allocation57_spill] sm:$0xff] %v6874_v33  ;;  %v6878_v52 = vpop.eup %4937  ;;  %4557 = vmatpush3.bf16.msra.mxu1 %v4556_v36  ;;  %v4577_v21 = vpack.c.bf16 %v6874_v33, %v6868_v54  ;;  %v6883_v9 = vadd.f32 %v2180_v17, %v6553_v29  ;;  %4951 = vpow2.f32 %v1311_v28  ;;  %v1617_v0 = vmul.f32 1.442695, %v1600_v11  ;;  %v7900_v29 = vld [vmem:[#allocation44_spill] sm:$0xff] }
 0x2b9   :  { %7899 = vst [vmem:[#allocation45_spill] sm:$0xff] %v6878_v52  ;;  %4558 = vmatprep.subr.bf16.mxu1 %v7869_v42  ;;  %v4559_v47 = vpack.c.bf16 %v6878_v52, %v6693_v5  ;;  %v1904_v49 = vmax.f32 %v1902_v16, %v1903_v55  ;;  %4953 = vpow2.f32 %v1615_v4  ;;  %vm2455_vm2 = vcmp.gt.f32.partialorder %v2439_v25, 0.0  ;;  %v7902_v16 = vld [vmem:[#allocation31_spill] sm:$0xff]  ;;  %v2982_v52 = vld [vmem:[%s7598_s5 + $0x10] sm:$0xff] }
 0x2ba   :  { %4578 = vmatpush3.bf16.msra.mxu0 %v4577_v21  ;;  %v2212_v26 = vmax.f32 %v6883_v9, %v6623_v7  ;;  %v2471_v59 = vmul.f32 0.2, %v2439_v25  ;;  %v1294_v36 = vsub.f32 %v7900_v29, %v6753_v20  ;;  %v6893_v58 = vpop.eup %4939  ;;  %4955 = vpow2.f32 %v1617_v0  ;;  %v7904_v21 = vld [vmem:[#allocation24_spill] sm:$0xff]  ;;  %3000 = vperm.xlu1 %4877, %v2982_v52  }
 0x2bb   :  { %7901 = vst [vmem:[#allocation88_spill] sm:$0xff] %v6893_v58  ;;  %4579 = vmatprep.subr.bf16.mxu0 %v7869_v42  ;;  %v1905_v28 = vrot.slane %v1904_v49, 2  ;;  %v1313_v17 = vmul.f32 1.442695, %v1293_v8  ;;  %v1601_v55 = vsub.f32 %v7902_v16, %v6767_v27  ;;  %v6898_v11 = vpop.eup %4941  ;;  %v2708_v4 = vpop.permute.xlu1 %2707  ;;  %v1602_v29 = vsub.f32 %v7904_v21, %v6767_v27  ;;  %v2984_v8 = vld [vmem:[%s7598_s5 + $0x20] sm:$0xff] }
 0x2bc   :  { %7903 = vst [vmem:[#allocation58_spill] sm:$0xff] %v6898_v11  ;;  %4560 = vmatpush3.bf16.msra.mxu1 %v4559_v47  ;;  %v2213_v46 = vrot.slane %v2212_v26, 4  ;;  %v2487_v7 = vsel %vm2455_vm2, %v2439_v25, %v2471_v59  ;;  %v1315_v40 = vmul.f32 1.442695, %v1294_v36  ;;  %v6908_v0 = vpop.eup %4943  ;;  %v4580_v47 = vpack.c.bf16 %v6898_v11, %v6893_v58  ;;  %v5215_v25 = vld [vmem:[%s7603_s10 + $0x58] sm:$0xff]  ;;  %3010 = vperm.xlu0 %4878, %v2984_v8   ;;  %v7906_v58 = vld [vmem:[#allocation6_spill] sm:$0xff] }
 0x2bd   :  { %7905 = vst [vmem:[#allocation63_spill] sm:$0xff] %v6908_v0  ;;  %v1906_v16 = vmax.f32 %v1904_v49, %v1905_v28  ;;  %4585 = vmatprep.subr.bf16.mxu1 %v7869_v42  ;;  %v6916_v59 = vadd.f32 %v5215_v25, %v2487_v7  ;;  %v2747_v36 = vadd.f32 %v7848_v24, %v2708_v4  ;;  %v4946_v21 = vpop.eup %4945  ;;  %4957 = vpow2.f32 %v1313_v17  ;;  %v2983_v8 = vld [vmem:[%s7598_s5 + $0x18] sm:$0xff] }
 0x2be   :  { %v4583_v5 = vpack.c.bf16 %v6908_v0, %v6707_v57  ;;  %v2214_v31 = vmax.f32 %v2212_v26, %v2213_v46  ;;  %v1619_v49 = vmul.f32 1.442695, %v1601_v55  ;;  %v4948_v28 = vpop.eup %4947  ;;  %4581 = vmatpush3.bf16.msra.mxu0 %v4580_v47  ;;  %4959 = vpow2.f32 %v1315_v40  ;;  %v5216_v40 = vld [vmem:[%s7603_s10 + $0x48] sm:$0xff]  ;;  %3005 = vperm.xlu1 %4877, %v2983_v8  }
 0x2bf   :  { %v1907_v11 = vrot.slane %v1906_v16, 1  ;;  %4183 = vmatmul.mubr.f32.vlgmr.msra.gmra.mrb[24].mxu1 %v7906_v58  ;;  %vm2763_vm3 = vcmp.gt.f32.partialorder %v2747_v36, 0.0  ;;  %v2779_v25 = vmul.f32 0.2, %v2747_v36  ;;  %4582 = vmatprep.subr.bf16.mxu0 %v7869_v42  ;;  %v1337_v0 = vadd.f32 %v4948_v28, %v4946_v21  ;;  %v2712_v17 = vpop.permute.xlu1 %2711 }
 0x2c0   :  { %v4950_v4 = vpop.eup %4949  ;;  %v2215_v33 = vrot.slane %v2214_v31, 2  ;;  %v4586_v26 = vpack.c.bf16 %v4948_v28, %v4946_v21  ;;  %v7907_v52 = vmov 0.0   ;;  %4961 = vpow2.f32 %v1619_v49 }
 0x2c1   :  { %4252 = vmatprep.mubr.msk.f32.mxu1 %vm5262_vm1, %v7907_v52  ;;  %v6927_v55 = vmax.f32 %v1906_v16, %v1907_v11  ;;  %v2795_v46 = vsel %vm2763_vm3, %v2747_v36, %v2779_v25  ;;  %v1621_v58 = vmul.f32 1.442695, %v1602_v29  ;;  %v1338_v57 = vadd.f32 %v4950_v4, %v1337_v0  ;;  %v2986_v29 = vld [vmem:[%s7598_s5 + $0x30] sm:$0xff] }
 0x2c2   :  { %v4952_v47 = vpop.eup %4951  ;;  %v2216_v7 = vmax.f32 %v2214_v31, %v2215_v33  ;;  %4587 = vmatpush3.bf16.msra.mxu1 %v4586_v26  ;;  %v6935_v21 = vadd.f32 %v5216_v40, %v2795_v46  ;;  %v2748_v11 = vadd.f32 %v7848_v24, %v2712_v17  ;;  %4584 = vmatpush3.bf16.msra.mxu0 %v4583_v5  ;;  %v7908_v33 = vld [vmem:[#allocation50_spill] sm:$0xff]  ;;  %v2985_v5 = vld [vmem:[%s7598_s5 + $0x28] sm:$0xff]  ;;  %vm3077_vm3 = vcmask 523264  }
 0x2c3   :  { %v4954_v16 = vpop.eup %4953  ;;  %v1923_v36 = vsub.f32 %v6854_v14, %v6927_v55  ;;  %4588 = vmatprep.subr.bf16.mxu1 %v7869_v42  ;;  %v4589_v31 = vpack.c.bf16 %v4952_v47, %v4950_v4  ;;  %4963 = vpow2.f32 %v1621_v58  ;;  %v1295_v0 = vsub.f32 %v7908_v33, %v6753_v20  ;;  %4609 = vmatprep.subr.bf16.mxu0 %v7869_v42  ;;  %v7909_v17 = vld [vmem:[#allocation53_spill] sm:$0xff] }
 0x2c4   :  { %v2217_v49 = vrot.slane %v2216_v7, 1  ;;  %v1339_v28 = vadd.f32 %v4952_v47, %v1338_v57  ;;  %v2830_v25 = vmax.f32 %v6935_v21, %v6803_v62  ;;  %vm2764_vm4 = vcmp.gt.f32.partialorder %v2748_v11, 0.0  ;;  %v4956_v14 = vpop.eup %4955  ;;  %v2410_v40 = vpop.permute.xlu1 %2409  ;;  %3020 = vperm.xlu0 %4878, %v2986_v29   ;;  %v7910_v62 = vld [vmem:[#allocation5_spill] sm:$0xff]  ;;  %3015 = vperm.xlu1 %4877, %v2985_v5   ;;  %v7914_v5 = vld [vmem:[#allocation54_spill] sm:$0xff] }
 0x2c5   :  { %v1953_v26 = vmul.f32 1.442695, %v1923_v36  ;;  %v2780_v4 = vmul.f32 0.2, %v2748_v11  ;;  %v1296_v46 = vsub.f32 %v7909_v17, %v6753_v20  ;;  %v1317_v58 = vmul.f32 1.442695, %v1295_v0  ;;  %4218 = vmatmul.mubr.f32.vlgmr.msra.gmra.mrb[2].mxu0 %v7910_v62 }
 0x2c6   :  { %4965 = vpow2.f32 %v6799_v61  ;;  %v6955_v57 = vmax.f32 %v2216_v7, %v2217_v49  ;;  %4590 = vmatpush3.bf16.msra.mxu1 %v4589_v31  ;;  %v1647_v8 = vadd.f32 %v4956_v14, %v4954_v16  ;;  %v4610_v47 = vpack.c.bf16 %v4956_v14, %v4954_v16  ;;  %v7911_v17 = vld [vmem:[#allocation49_spill] sm:$0xff]  ;;  %4287 = vmatprep.mubr.msk.f32.mxu0 %vm5262_vm1, %v7907_v52 }
 0x2c7   :  { %4967 = vpow2.f32 %v1953_v26  ;;  %4591 = vmatprep.subr.bf16.mxu1 %v7869_v42  ;;  %v2796_v36 = vsel %vm2764_vm4, %v2748_v11, %v2780_v4  ;;  %v1319_v33 = vmul.f32 1.442695, %v1296_v46  ;;  %v1603_v0 = vsub.f32 %v7911_v17, %v6767_v27  ;;  %v4958_v61 = vpop.eup %4957  ;;  %v7912_v16 = vld [vmem:[#allocation73_spill] sm:$0xff] }
 0x2c8   :  { %v2233_v7 = vsub.f32 %v6883_v9, %v6955_v57  ;;  %4611 = vmatpush3.bf16.msra.mxu0 %v4610_v47  ;;  %v6967_v29 = vadd.f32 %v6830_v6, %v2796_v36  ;;  %4969 = vpow2.f32 %v1317_v58  ;;  %v1604_v31 = vsub.f32 %v7912_v16, %v6767_v27  ;;  %v7913_v14 = vld [vmem:[#allocation69_spill] sm:$0xff]  ;;  %v2987_v9 = vld [vmem:[%s7598_s5 + $0x38] sm:$0xff]  ;;  %v4960_v4 = vpop.eup %4959  ;;  %v2418_v62 = vpop.permute.xlu1 %2417 }
 0x2c9   :  { %v1340_v11 = vadd.f32 %v4958_v61, %v1339_v28  ;;  %4612 = vmatprep.subr.bf16.mxu0 %v7869_v42  ;;  %4971 = vpow2.f32 %v1319_v33  ;;  %v1623_v49 = vmul.f32 1.442695, %v1603_v0  ;;  %v1297_v26 = vsub.f32 %v7913_v14, %v6753_v20  ;;  %3025 = vperm.xlu1 %4877, %v2987_v9  }
 0x2ca   :  { %v2263_v6 = vmul.f32 1.442695, %v2233_v7  ;;  %v6978_v46 = vmax.f32 %v6967_v29, %v2830_v25  ;;  %v1625_v58 = vmul.f32 1.442695, %v1604_v31  ;;  %v1298_v28 = vsub.f32 %v7914_v5, %v6753_v20  ;;  %v4962_v47 = vpop.eup %4961  ;;  %v7915_v25 = vld [vmem:[#allocation59_spill] sm:$0xff]  ;;  %v7916_v5 = vld [vmem:[#allocation74_spill] sm:$0xff] }
 0x2cb   :  { %v1341_v36 = vadd.f32 %v4960_v4, %v1340_v11  ;;  %v4592_v33 = vpack.c.bf16 %v4960_v4, %v4958_v61  ;;  %4973 = vpow2.f32 %v1623_v49  ;;  %v1321_v17 = vmul.f32 1.442695, %v1297_v26  ;;  %v7917_v11 = vld [vmem:[#allocation82_spill] sm:$0xff] }
 0x2cc   :  { %4975 = vpow2.f32 %v2263_v6  ;;  %v1648_v0 = vadd.f32 %v4962_v47, %v1647_v8  ;;  %v1323_v16 = vmul.f32 1.442695, %v1298_v28  ;;  %v2440_v14 = vadd.f32 %v7841_v2, %v2410_v40  ;;  %v7919_v6 = vld [vmem:[#allocation72_spill] sm:$0xff] }
 0x2cd   :  { %v4964_v7 = vpop.eup %4963  ;;  %4593 = vmatpush3.bf16.msra.mxu1 %v4592_v33  ;;  %4977 = vpow2.f32 %v1625_v58  ;;  %v1605_v31 = vsub.f32 %v7915_v25, %v6767_v27  ;;  %v1606_v39 = vsub.f32 %v7916_v5, %v6767_v27  ;;  %v1299_v61 = vsub.f32 %v7917_v11, %v6753_v20 }
 0x2ce   :  { %v1649_v49 = vadd.f32 %v4964_v7, %v1648_v0  ;;  %v4613_v26 = vpack.c.bf16 %v4964_v7, %v4962_v47  ;;  %4594 = vmatprep.subr.bf16.mxu1 %v7869_v42  ;;  %4979 = vpow2.f32 %v1321_v17  ;;  %vm2456_vm5 = vcmp.gt.f32.partialorder %v2440_v14, 0.0  ;;  %v7920_v0 = vld [vmem:[#allocation76_spill] sm:$0xff]  ;;  %v2422_v7 = vpop.permute.xlu1 %2421 }
 0x2cf   :  { %4981 = vpow2.f32 %v1323_v16  ;;  %v2472_v40 = vmul.f32 0.2, %v2440_v14  ;;  %v1627_v8 = vmul.f32 1.442695, %v1605_v31  ;;  %v1629_v9 = vmul.f32 1.442695, %v1606_v39 }
 0x2d0   :  { %v6990_v4 = vpop.eup %4965  ;;  %4614 = vmatpush3.bf16.msra.mxu0 %v4613_v26  ;;  %v1300_v58 = vsub.f32 %v7919_v6, %v6753_v20  ;;  %v1325_v28 = vmul.f32 1.442695, %v1299_v61  ;;  %v2442_v33 = vadd.f32 %v7841_v2, %v2418_v62  ;;  %v1607_v47 = vsub.f32 %v7920_v0, %v6767_v27  ;;  %v7921_v39 = vld [vmem:[#allocation65_spill] sm:$0xff]  ;;  %v7922_v31 = vld [vmem:[#allocation14_spill] sm:$0xff]  ;;  %v5217_v62 = vld [vmem:[%s7603_s10 + $0x60] sm:$0xff] }
 0x2d1   :  { %7918 = vst [vmem:[#allocation90_spill] sm:$0xff] %v6990_v4  ;;  %v6997_v25 = vpop.eup %4967  ;;  %4615 = vmatprep.subr.bf16.mxu0 %v7869_v42  ;;  %v2488_v17 = vsel %vm2456_vm5, %v2440_v14, %v2472_v40  ;;  %4983 = vpow2.f32 %v1627_v8  ;;  %v1608_v16 = vsub.f32 %v7921_v39, %v6767_v27  ;;  %v1301_v5 = vsub.f32 %v7922_v31, %v6753_v20 }
 0x2d2   :  { %v4970_v11 = vpop.eup %4969  ;;  %v7007_v61 = vadd.f32 %v5217_v62, %v2488_v17  ;;  %4985 = vpow2.f32 %v1629_v9  ;;  %v1327_v26 = vmul.f32 1.442695, %v1300_v58  ;;  %vm2458_vm6 = vcmp.gt.f32.partialorder %v2442_v33, 0.0  ;;  %v7924_v9 = vld [vmem:[#allocation67_spill] sm:$0xff] }
 0x2d3   :  { %v4972_v6 = vpop.eup %4971  ;;  %v1342_v0 = vadd.f32 %v4970_v11, %v1341_v36  ;;  %4987 = vpow2.f32 %v1325_v28  ;;  %v2474_v14 = vmul.f32 0.2, %v2442_v33  ;;  %v1631_v40 = vmul.f32 1.442695, %v1607_v47  ;;  %v7020_v28 = vld [vmem:[%s7603_s10 + $0x70] sm:$0xff] }
 0x2d4   :  { %v4595_v8 = vpack.c.bf16 %v4972_v6, %v4970_v11  ;;  %v7923_v39 = vmax.f32 %v6916_v59, %v6845_v35  ;;  %4989 = vpow2.f32 %v1327_v26  ;;  %v1633_v54 = vmul.f32 1.442695, %v1608_v16  ;;  %v2724_v16 = vpop.permute.xlu1 %2723 }
 0x2d5   :  { %v4974_v37 = vpop.eup %4973  ;;  %v1343_v1 = vadd.f32 %v4972_v6, %v1342_v0  ;;  %v2490_v17 = vsel %vm2458_vm6, %v2442_v33, %v2474_v14  ;;  %4991 = vpow2.f32 %v1631_v40  ;;  %v1302_v58 = vsub.f32 %v7924_v9, %v6753_v20  ;;  %v7925_v6 = vld [vmem:[#allocation84_spill] sm:$0xff]  ;;  %v7926_v0 = vld [vmem:[#allocation79_spill] sm:$0xff] }
 0x2d6   :  { %v2519_v31 = vmax.f32 %v7007_v61, %v7923_v39  ;;  %v7015_v62 = vpop.eup %4975  ;;  %4596 = vmatpush3.bf16.msra.mxu1 %v4595_v8  ;;  %v1650_v36 = vadd.f32 %v4974_v37, %v1649_v49  ;;  %v7023_v35 = vadd.f32 %v7020_v28, %v2490_v17  ;;  %4993 = vpow2.f32 %v1633_v54 }
 0x2d7   :  { %v1329_v47 = vmul.f32 1.442695, %v1301_v5  ;;  %v4978_v33 = vpop.eup %4977  ;;  %4597 = vmatprep.subr.bf16.mxu1 %v7869_v42  ;;  %v1331_v11 = vmul.f32 1.442695, %v1302_v58  ;;  %v2443_v26 = vadd.f32 %v7841_v2, %v2422_v7  ;;  %v1609_v49 = vsub.f32 %v7925_v6, %v6767_v27  ;;  %v7927_v6 = vld [vmem:[#allocation15_spill] sm:$0xff] }
 0x2d8   :  { %v1610_v14 = vsub.f32 %v7926_v0, %v6767_v27  ;;  %v4980_v40 = vpop.eup %4979  ;;  %v1651_v8 = vadd.f32 %v4978_v33, %v1650_v36  ;;  %v4616_v39 = vpack.c.bf16 %v4978_v33, %v4974_v37  ;;  %v2521_v17 = vmax.f32 %v7023_v35, %v2519_v31  ;;  %v7929_v31 = vld [vmem:[#allocation81_spill] sm:$0xff] }
 0x2d9   :  { %4995 = vpow2.f32 %v1329_v47  ;;  %v4982_v54 = vpop.eup %4981  ;;  %v1344_v5 = vadd.f32 %v4980_v40, %v1343_v1  ;;  %vm2459_vm7 = vcmp.gt.f32.partialorder %v2443_v26, 0.0  ;;  %v2475_v9 = vmul.f32 0.2, %v2443_v26  ;;  %v7930_v1 = vld [vmem:[#allocation87_spill] sm:$0xff] }
 0x2da   :  { %4997 = vpow2.f32 %v1331_v11  ;;  %4617 = vmatpush3.bf16.msra.mxu0 %v4616_v39  ;;  %v4598_v58 = vpack.c.bf16 %v4982_v54, %v4980_v40  ;;  %v1635_v2 = vmul.f32 1.442695, %v1609_v49  ;;  %v1637_v7 = vmul.f32 1.442695, %v1610_v14  ;;  %v5219_v49 = vld [vmem:[%s7603_s10 + $0x78] sm:$0xff]  ;;  %v2728_v40 = vpop.permute.xlu1 %2727 }
 0x2db   :  { %v1304_v45 = vsub.f32 %v7927_v6, %v6753_v20  ;;  %v4984_v22 = vpop.eup %4983  ;;  %v7034_v0 = vadd.f32 %v4982_v54, %v1344_v5  ;;  %4618 = vmatprep.subr.bf16.mxu0 %v7869_v42  ;;  %v2491_v37 = vsel %vm2459_vm7, %v2443_v26, %v2475_v9  ;;  %v1611_v36 = vsub.f32 %v7929_v31, %v6767_v27 }
 0x2dc   :  { %v1612_v47 = vsub.f32 %v7930_v1, %v6767_v27  ;;  %v4986_v33 = vpop.eup %4985  ;;  %4599 = vmatpush3.bf16.msra.mxu1 %v4598_v58  ;;  %v1652_v11 = vadd.f32 %v4984_v22, %v1651_v8  ;;  %v7044_v20 = vadd.f32 %v5219_v49, %v2491_v37  ;;  %4999 = vpow2.f32 %v1635_v2  ;;  %v7935_v49 = vld [vmem:[#allocation37_spill] sm:$0xff] }
 0x2dd   :  { %7928 = vst [vmem:[#allocation80_spill] sm:$0xff] %v7034_v0  ;;  %v1335_v14 = vmul.f32 1.442695, %v1304_v45  ;;  %v7046_v39 = vpop.eup %4987  ;;  %v4619_v26 = vpack.c.bf16 %v4986_v33, %v4984_v22  ;;  %4600 = vmatprep.subr.bf16.mxu1 %v7869_v42  ;;  %5001 = vpow2.f32 %v1637_v7  ;;  %v1639_v54 = vmul.f32 1.442695, %v1611_v36  ;;  %v7933_v22 = vld [vmem:[#allocation83_spill] sm:$0xff] }
 0x2de   :  { %7931 = vst [vmem:[#allocation62_spill] sm:$0xff] %v7046_v39  ;;  %v1641_v5 = vmul.f32 1.442695, %v1612_v47  ;;  %v7049_v9 = vpop.eup %4989  ;;  %v1653_v8 = vadd.f32 %v4986_v33, %v1652_v11  ;;  %v2522_v58 = vmax.f32 %v7044_v20, %v2521_v17  ;;  %v2751_v6 = vadd.f32 %v7848_v24, %v2724_v16 }
 0x2df   :  { %7932 = vst [vmem:[#allocation77_spill] sm:$0xff] %v7049_v9  ;;  %5003 = vpow2.f32 %v1335_v14  ;;  %v4992_v37 = vpop.eup %4991  ;;  %4620 = vmatpush3.bf16.msra.mxu0 %v4619_v26  ;;  %v4601_v45 = vpack.c.bf16 %v7049_v9, %v7046_v39  ;;  %v1614_v2 = vsub.f32 %v7933_v22, %v6767_v27  ;;  %v2752_v7 = vadd.f32 %v7848_v24, %v2728_v40  ;;  %v5220_v22 = vld [vmem:[%s7603_s10 + $0x68] sm:$0xff] }
 0x2e0   :  { %5005 = vpow2.f32 %v1639_v54  ;;  %v4994_v31 = vpop.eup %4993  ;;  %4621 = vmatprep.subr.bf16.mxu0 %v7869_v42  ;;  %v1654_v36 = vadd.f32 %v4992_v37, %v1653_v8  ;;  %v2523_v1 = vrot.slane %v2522_v58, 4  ;;  %vm2767_vm8 = vcmp.gt.f32.partialorder %v2751_v6, 0.0  ;;  %v7937_v54 = vld [vmem:[#allocation38_spill] sm:$0xff] }
 0x2e1   :  { %5007 = vpow2.f32 %v1641_v5  ;;  %4602 = vmatpush3.bf16.msra.mxu1 %v4601_v45  ;;  %v4622_v16 = vpack.c.bf16 %v4994_v31, %v4992_v37  ;;  %v2783_v17 = vmul.f32 0.2, %v2751_v6  ;;  %v1645_v47 = vmul.f32 1.442695, %v1614_v2  ;;  %v7938_v8 = vld [vmem:[#allocation42_spill] sm:$0xff] }
 0x2e2   :  { %vm2768_vm9 = vcmp.gt.f32.partialorder %v2752_v7, 0.0  ;;  %v7061_v11 = vadd.f32 %v4994_v31, %v1654_v36  ;;  %4603 = vmatprep.subr.bf16.mxu1 %v7869_v42  ;;  %v2524_v27 = vmax.f32 %v2522_v58, %v2523_v1  ;;  %v2784_v24 = vmul.f32 0.2, %v2752_v7 }
 0x2e3   :  { %v7059_v33 = vpop.eup %4995  ;;  %v1909_v14 = vsub.f32 %v7935_v49, %v6927_v55  ;;  %4623 = vmatpush3.bf16.msra.mxu0 %v4622_v16  ;;  %v2799_v26 = vsel %vm2767_vm8, %v2751_v6, %v2783_v17  ;;  %5009 = vpow2.f32 %v1645_v47  ;;  %v1910_v5 = vsub.f32 %v7937_v54, %v6927_v55  ;;  %v7939_v16 = vld [vmem:[#allocation39_spill] sm:$0xff] }
 0x2e4   :  { %7934 = vst [vmem:[#allocation86_spill] sm:$0xff] %v7059_v33  ;;  %v7066_v40 = vpop.eup %4997  ;;  %v1911_v37 = vsub.f32 %v7938_v8, %v6927_v55  ;;  %4624 = vmatprep.subr.bf16.mxu0 %v7869_v42  ;;  %v2525_v58 = vrot.slane %v2524_v27, 2  ;;  %v7078_v2 = vadd.f32 %v5220_v22, %v2799_v26  ;;  %v2800_v6 = vsel %vm2768_vm9, %v2752_v7, %v2784_v24  ;;  %v7940_v26 = vld [vmem:[#allocation25_spill] sm:$0xff]  ;;  %v7941_v24 = vld [vmem:[#allocation26_spill] sm:$0xff] }
 0x2e5   :  { %7936 = vst [vmem:[#allocation78_spill] sm:$0xff] %v7066_v40  ;;  %v4604_v45 = vpack.c.bf16 %v7066_v40, %v7059_v33  ;;  %v7082_v31 = vadd.f32 %v7020_v28, %v2800_v6  ;;  %v1925_v36 = vmul.f32 1.442695, %v1909_v14  ;;  %v1927_v1 = vmul.f32 1.442695, %v1910_v5  ;;  %v7942_v5 = vld [vmem:[#allocation43_spill] sm:$0xff] }
 0x2e6   :  { %v1912_v17 = vsub.f32 %v7939_v16, %v6927_v55  ;;  %v7086_v47 = vpop.eup %4999  ;;  %v2526_v49 = vmax.f32 %v2524_v27, %v2525_v58  ;;  %v2831_v54 = vmax.f32 %v6978_v46, %v7078_v2  ;;  %v1929_v8 = vmul.f32 1.442695, %v1911_v37  ;;  %v7946_v40 = vld [vmem:[#allocation46_spill] sm:$0xff] }
 0x2e7   :  { %4605 = vmatpush3.bf16.msra.mxu1 %v4604_v45  ;;  %v2219_v22 = vsub.f32 %v7940_v26, %v6955_v57  ;;  %v7092_v7 = vpop.eup %5001  ;;  %5011 = vpow2.f32 %v1925_v36  ;;  %v2220_v14 = vsub.f32 %v7941_v24, %v6955_v57  ;;  %v1913_v45 = vsub.f32 %v7942_v5, %v6927_v55 }
 0x2e8   :  { %4606 = vmatprep.subr.bf16.mxu1 %v7869_v42  ;;  %v1931_v28 = vmul.f32 1.442695, %v1912_v17  ;;  %v2527_v58 = vrot.slane %v2526_v49, 1  ;;  %v4625_v46 = vpack.c.bf16 %v7092_v7, %v7086_v47  ;;  %v2832_v37 = vmax.f32 %v7082_v31, %v2831_v54 }
 0x2e9   :  { %v7099_v27 = vpop.eup %5003  ;;  %5013 = vpow2.f32 %v1927_v1  ;;  %v2235_v16 = vmul.f32 1.442695, %v2219_v22  ;;  %v2237_v17 = vmul.f32 1.442695, %v2220_v14  ;;  %v1914_v33 = vsub.f32 %v7946_v40, %v6927_v55 }
 0x2ea   :  { %7943 = vst [vmem:[#allocation33_spill] sm:$0xff] %v7099_v27  ;;  %v7104_v6 = vpop.eup %5005  ;;  %v4607_v36 = vpack.c.bf16 %v7099_v27, %v6821_v32  ;;  %5015 = vpow2.f32 %v1929_v8  ;;  %v7110_v24 = vmax.f32 %v2526_v49, %v2527_v58  ;;  %4626 = vmatpush3.bf16.msra.mxu0 %v4625_v46  ;;  %v2833_v5 = vrot.slane %v2832_v37, 4  ;;  %v7947_v8 = vld [vmem:[#allocation40_spill] sm:$0xff]  ;;  %v7949_v58 = vld [vmem:[#allocation27_spill] sm:$0xff] }
 0x2eb   :  { %7944 = vst [vmem:[#allocation34_spill] sm:$0xff] %v7104_v6  ;;  %v7108_v26 = vpop.eup %5007  ;;  %5017 = vpow2.f32 %v1931_v28  ;;  %4627 = vmatprep.subr.bf16.mxu0 %v7869_v42  ;;  %v1933_v54 = vmul.f32 1.442695, %v1913_v45  ;;  %v2221_v22 = vsub.f32 %v7947_v8, %v6955_v57  ;;  %v1935_v28 = vmul.f32 1.442695, %v1914_v33  ;;  %v7950_v45 = vld [vmem:[#allocation52_spill] sm:$0xff] }
 0x2ec   :  { %7945 = vst [vmem:[#allocation36_spill] sm:$0xff] %v7108_v26  ;;  %4608 = vmatpush3.bf16.msra.mxu1 %v4607_v36  ;;  %v4628_v1 = vpack.c.bf16 %v7108_v26, %v7104_v6  ;;  %5019 = vpow2.f32 %v2235_v16  ;;  %v2544_v49 = vsub.f32 %v7044_v20, %v7110_v24  ;;  %v2834_v14 = vmax.f32 %v2832_v37, %v2833_v5  ;;  %v7951_v8 = vld [vmem:[#allocation8_spill] sm:$0xff]  ;;  %v7952_v37 = vld [vmem:[#allocation55_spill] sm:$0xff] }
 0x2ed   :  { %4633 = vmatprep.subr.bf16.mxu1 %v7869_v42  ;;  %5021 = vpow2.f32 %v2237_v17  ;;  %v7122_v40 = vpop.eup %5009  ;;  %v2222_v46 = vsub.f32 %v7949_v58, %v6955_v57  ;;  %v2239_v36 = vmul.f32 1.442695, %v2221_v22  ;;  %v1915_v16 = vsub.f32 %v7950_v45, %v6927_v55 }
 0x2ee   :  { %7948 = vst [vmem:[#allocation35_spill] sm:$0xff] %v7122_v40  ;;  %5023 = vpow2.f32 %v1933_v54  ;;  %v2575_v27 = vmul.f32 1.442695, %v2544_v49  ;;  %4629 = vmatpush3.bf16.msra.mxu0 %v4628_v1  ;;  %v2835_v20 = vrot.slane %v2834_v14, 2  ;;  %v1916_v17 = vsub.f32 %v7952_v37, %v6927_v55  ;;  %v7953_v1 = vld [vmem:[#allocation51_spill] sm:$0xff]  ;;  %v7954_v49 = vld [vmem:[#allocation32_spill] sm:$0xff] }
 0x2ef   :  { %4253 = vmatmul.mubr.f32.vlgmr.msra.gmra.mrb[26].mxu1 %v7951_v8  ;;  %5025 = vpow2.f32 %v1935_v28  ;;  %4630 = vmatprep.subr.bf16.mxu0 %v7869_v42  ;;  %v2241_v33 = vmul.f32 1.442695, %v2222_v46  ;;  %v1937_v5 = vmul.f32 1.442695, %v1915_v16  ;;  %v4631_v54 = vpack.c.bf16 %v7122_v40, %v6990_v4  ;;  %v7956_v16 = vld [vmem:[#allocation56_spill] sm:$0xff]  ;;  %v7958_v4 = vld [vmem:[#allocation7_spill] sm:$0xff] }
 0x2f0   :  { %5027 = vpow2.f32 %v2239_v36  ;;  %4322 = vmatprep.mubr.msk.f32.mxu1 %vm5262_vm1, %v7907_v52  ;;  %v2223_v22 = vsub.f32 %v7953_v1, %v6955_v57  ;;  %v2224_v28 = vsub.f32 %v7954_v49, %v6955_v57  ;;  %v1939_v46 = vmul.f32 1.442695, %v1916_v17  ;;  %v7955_v36 = vld [vmem:[#allocation70_spill] sm:$0xff] }
 0x2f1   :  { %5029 = vpow2.f32 %v2575_v27  ;;  %v5012_v58 = vpop.eup %5011  ;;  %v1917_v45 = vsub.f32 %v7955_v36, %v6927_v55  ;;  %v1918_v8 = vsub.f32 %v7956_v16, %v6927_v55  ;;  %v2836_v27 = vmax.f32 %v2834_v14, %v2835_v20  ;;  %v7957_v36 = vld [vmem:[#allocation61_spill] sm:$0xff] }
 0x2f2   :  { %5031 = vpow2.f32 %v2241_v33  ;;  %4632 = vmatpush3.bf16.msra.mxu0 %v4631_v54  ;;  %v2243_v40 = vmul.f32 1.442695, %v2223_v22  ;;  %v2245_v32 = vmul.f32 1.442695, %v2224_v28  ;;  %v2225_v0 = vsub.f32 %v7957_v36, %v6955_v57 }
 0x2f3   :  { %v5014_v37 = vpop.eup %5013  ;;  %5033 = vpow2.f32 %v1937_v5  ;;  %4657 = vmatprep.subr.bf16.mxu0 %v7869_v42  ;;  %v1941_v33 = vmul.f32 1.442695, %v1917_v45  ;;  %v1943_v49 = vmul.f32 1.442695, %v1918_v8  ;;  %v7959_v5 = vld [vmem:[#allocation47_spill] sm:$0xff]  ;;  %v2837_v28 = vrot.slane %v2836_v27, 1 }
 0x2f4   :  { %v5016_v9 = vpop.eup %5015  ;;  %v1957_v1 = vadd.f32 %v5014_v37, %v5012_v58  ;;  %v4634_v39 = vpack.c.bf16 %v5014_v37, %v5012_v58  ;;  %5035 = vpow2.f32 %v1939_v46  ;;  %v2226_v54 = vsub.f32 %v7959_v5, %v6955_v57  ;;  %v7960_v58 = vld [vmem:[#allocation20_spill] sm:$0xff]  ;;  %v7961_v37 = vld [vmem:[#allocation75_spill] sm:$0xff] }
 0x2f5   :  { %v5018_v17 = vpop.eup %5017  ;;  %5037 = vpow2.f32 %v2243_v40  ;;  %4288 = vmatmul.mubr.f32.vlgmr.msra.gmra.mrb[4].mxu0 %v7958_v4  ;;  %v2247_v40 = vmul.f32 1.442695, %v2225_v0  ;;  %v1919_v46 = vsub.f32 %v7960_v58, %v6927_v55  ;;  %v7962_v58 = vld [vmem:[#allocation60_spill] sm:$0xff]  ;;  %vm3184_vm4 = vcmask 64512  }
 0x2f6   :  { %v5020_v16 = vpop.eup %5019  ;;  %4635 = vmatpush3.bf16.msra.mxu1 %v4634_v39  ;;  %v1958_v14 = vadd.f32 %v5016_v9, %v1957_v1  ;;  %v4637_v20 = vpack.c.bf16 %v5018_v17, %v5016_v9  ;;  %5039 = vpow2.f32 %v2245_v32  ;;  %4357 = vmatprep.mubr.msk.f32.mxu0 %vm5262_vm1, %v7907_v52  ;;  %v2249_v8 = vmul.f32 1.442695, %v2226_v54 }
 0x2f7   :  { %v5022_v22 = vpop.eup %5021  ;;  %4636 = vmatprep.subr.bf16.mxu1 %v7869_v42  ;;  %5041 = vpow2.f32 %v1941_v33  ;;  %v1920_v1 = vsub.f32 %v7961_v37, %v6927_v55  ;;  %v1945_v5 = vmul.f32 1.442695, %v1919_v46  ;;  %v2227_v26 = vsub.f32 %v7962_v58, %v6955_v57  ;;  %v7965_v46 = vld [vmem:[#allocation91_spill] sm:$0xff] }
 0x2f8   :  { %v5024_v4 = vpop.eup %5023  ;;  %v1959_v39 = vadd.f32 %v5018_v17, %v1958_v14  ;;  %v2267_v45 = vadd.f32 %v5022_v22, %v5020_v16  ;;  %v4658_v9 = vpack.c.bf16 %v5022_v22, %v5020_v16  ;;  %5043 = vpow2.f32 %v1943_v49  ;;  %v7964_v14 = vld [vmem:[#allocation66_spill] sm:$0xff] }
 0x2f9   :  { %v5026_v32 = vpop.eup %5025  ;;  %5045 = vpow2.f32 %v2247_v40  ;;  %v7161_v17 = vmax.f32 %v2836_v27, %v2837_v28  ;;  %v1947_v16 = vmul.f32 1.442695, %v1920_v1  ;;  %v2251_v40 = vmul.f32 1.442695, %v2227_v26 }
 0x2fa   :  { %v5028_v36 = vpop.eup %5027  ;;  %4638 = vmatpush3.bf16.msra.mxu1 %v4637_v20  ;;  %4659 = vmatpush3.bf16.msra.mxu0 %v4658_v9  ;;  %v1960_v0 = vadd.f32 %v5024_v4, %v1959_v39  ;;  %v4640_v33 = vpack.c.bf16 %v5026_v32, %v5024_v4  ;;  %v2228_v20 = vsub.f32 %v7964_v14, %v6955_v57  ;;  %5047 = vpow2.f32 %v2249_v8  ;;  %v7967_v8 = vld [vmem:[#allocation64_spill] sm:$0xff] }
 0x2fb   :  { %v7159_v6 = vpop.eup %5029  ;;  %4639 = vmatprep.subr.bf16.mxu1 %v7869_v42  ;;  %4660 = vmatprep.subr.bf16.mxu0 %v7869_v42  ;;  %v2268_v49 = vadd.f32 %v5028_v36, %v2267_v45  ;;  %v1921_v4 = vsub.f32 %v7965_v46, %v6927_v55  ;;  %5049 = vpow2.f32 %v1945_v5  ;;  %v7966_v45 = vld [vmem:[#allocation68_spill] sm:$0xff] }
 0x2fc   :  { %7963 = vst [vmem:[#allocation22_spill] sm:$0xff] %v7159_v6  ;;  %v5032_v54 = vpop.eup %5031  ;;  %v1961_v22 = vadd.f32 %v5026_v32, %v1960_v0  ;;  %v2253_v28 = vmul.f32 1.442695, %v2228_v20  ;;  %5051 = vpow2.f32 %v1947_v16  ;;  %v1922_v1 = vsub.f32 %v7966_v45, %v6927_v55 }
 0x2fd   :  { %v5034_v39 = vpop.eup %5033  ;;  %v2269_v9 = vadd.f32 %v5032_v54, %v2268_v49  ;;  %v4661_v27 = vpack.c.bf16 %v5032_v54, %v5028_v36  ;;  %v1949_v14 = vmul.f32 1.442695, %v1921_v4  ;;  %5053 = vpow2.f32 %v2251_v40 }
 0x2fe   :  { %v5036_v37 = vpop.eup %5035  ;;  %4641 = vmatpush3.bf16.msra.mxu1 %v4640_v33  ;;  %v1962_v58 = vadd.f32 %v5034_v39, %v1961_v22  ;;  %v2229_v32 = vsub.f32 %v7855_v43, %v6955_v57  ;;  %v2230_v36 = vsub.f32 %v7967_v8, %v6955_v57  ;;  %5055 = vpow2.f32 %v2253_v28  ;;  %v7968_v43 = vld [vmem:[#allocation95_spill] sm:$0xff] }
 0x2ff   :  { %v5038_v6 = vpop.eup %5037  ;;  %4662 = vmatpush3.bf16.msra.mxu0 %v4661_v27  ;;  %4642 = vmatprep.subr.bf16.mxu1 %v7869_v42  ;;  %v4643_v26 = vpack.c.bf16 %v5036_v37, %v5034_v39  ;;  %v1951_v49 = vmul.f32 1.442695, %v1922_v1  ;;  %5057 = vpow2.f32 %v1949_v14  ;;  %v1924_v39 = vsub.f32 %v7968_v43, %v6927_v55  ;;  %v7969_v28 = vld [vmem:[#allocation71_spill] sm:$0xff] }
 0x300   :  { %v5040_v0 = vpop.eup %5039  ;;  %v1963_v33 = vadd.f32 %v5036_v37, %v1962_v58  ;;  %4663 = vmatprep.subr.bf16.mxu0 %v7869_v42  ;;  %v2270_v5 = vadd.f32 %v5038_v6, %v2269_v9  ;;  %v2255_v54 = vmul.f32 1.442695, %v2229_v32  ;;  %v2257_v22 = vmul.f32 1.442695, %v2230_v36  ;;  %v7970_v32 = vld [vmem:[#allocation93_spill] sm:$0xff] }
 0x301   :  { %v5042_v16 = vpop.eup %5041  ;;  %v4664_v20 = vpack.c.bf16 %v5040_v0, %v5038_v6  ;;  %5059 = vpow2.f32 %v1951_v49  ;;  %v2231_v6 = vsub.f32 %v7969_v28, %v6955_v57  ;;  %v2232_v37 = vsub.f32 %v6608_v38, %v6955_v57  ;;  %v7971_v38 = vld [vmem:[#allocation85_spill] sm:$0xff] }
 0x302   :  { %v5044_v46 = vpop.eup %5043  ;;  %4644 = vmatpush3.bf16.msra.mxu1 %v4643_v26  ;;  %v2271_v40 = vadd.f32 %v5040_v0, %v2270_v5  ;;  %v1964_v4 = vadd.f32 %v5042_v16, %v1963_v33  ;;  %5061 = vpow2.f32 %v2255_v54  ;;  %v1955_v1 = vmul.f32 1.442695, %v1924_v39 }
 0x303   :  { %v5046_v27 = vpop.eup %5045  ;;  %4665 = vmatpush3.bf16.msra.mxu0 %v4664_v20  ;;  %4645 = vmatprep.subr.bf16.mxu1 %v7869_v42  ;;  %v4646_v9 = vpack.c.bf16 %v5044_v46, %v5042_v16  ;;  %5063 = vpow2.f32 %v2257_v22  ;;  %v2259_v55 = vmul.f32 1.442695, %v2231_v6  ;;  %v2261_v14 = vmul.f32 1.442695, %v2232_v37 }
 0x304   :  { %v7184_v58 = vadd.f32 %v5044_v46, %v1964_v4  ;;  %4666 = vmatprep.subr.bf16.mxu0 %v7869_v42  ;;  %v2272_v45 = vadd.f32 %v5046_v27, %v2271_v40  ;;  %v2529_v26 = vsub.f32 %v6643_v19, %v7110_v24  ;;  %v2530_v8 = vsub.f32 %v7970_v32, %v7110_v24  ;;  %v5048_v36 = vpop.eup %5047  ;;  %v7972_v4 = vld [vmem:[#allocation92_spill] sm:$0xff] }
 0x305   :  { %5065 = vpow2.f32 %v1955_v1  ;;  %v2234_v0 = vsub.f32 %v7971_v38, %v6955_v57  ;;  %v2531_v33 = vsub.f32 %v6658_v3, %v7110_v24  ;;  %v2532_v5 = vsub.f32 %v6671_v60, %v7110_v24  ;;  %v7197_v49 = vpop.eup %5049 }
 0x306   :  { %4647 = vmatpush3.bf16.msra.mxu1 %v4646_v9  ;;  %v2273_v16 = vadd.f32 %v5048_v36, %v2272_v45  ;;  %v4667_v20 = vpack.c.bf16 %v5048_v36, %v5046_v27  ;;  %5067 = vpow2.f32 %v2259_v55  ;;  %v2545_v19 = vmul.f32 1.442695, %v2529_v26  ;;  %v7200_v54 = vpop.eup %5051  ;;  %v7973_v36 = vld [vmem:[#allocation94_spill] sm:$0xff] }
 0x307   :  { %4648 = vmatprep.subr.bf16.mxu1 %v7869_v42  ;;  %5069 = vpow2.f32 %v2261_v14  ;;  %v2547_v22 = vmul.f32 1.442695, %v2530_v8  ;;  %v2265_v46 = vmul.f32 1.442695, %v2234_v0  ;;  %v2549_v57 = vmul.f32 1.442695, %v2531_v33  ;;  %v5054_v40 = vpop.eup %5053 }
 0x308   :  { %4668 = vmatpush3.bf16.msra.mxu0 %v4667_v20  ;;  %v4649_v3 = vpack.c.bf16 %v7200_v54, %v7197_v49  ;;  %5071 = vpow2.f32 %v2545_v19  ;;  %v2551_v60 = vmul.f32 1.442695, %v2532_v5  ;;  %v2533_v43 = vsub.f32 %v7972_v4, %v7110_v24  ;;  %v5056_v39 = vpop.eup %5055 }
 0x309   :  { %4669 = vmatprep.subr.bf16.mxu0 %v7869_v42  ;;  %v2274_v27 = vadd.f32 %v5054_v40, %v2273_v16  ;;  %5073 = vpow2.f32 %v2547_v22  ;;  %v2534_v9 = vsub.f32 %v6683_v41, %v7110_v24  ;;  %v2839_v28 = vsub.f32 %v6573_v13, %v7161_v17  ;;  %v7211_v6 = vpop.eup %5057 }
 0x30a   :  { %4650 = vmatpush3.bf16.msra.mxu1 %v4649_v3  ;;  %v4670_v37 = vpack.c.bf16 %v5056_v39, %v5054_v40  ;;  %5075 = vpow2.f32 %v2265_v46  ;;  %v2553_v45 = vmul.f32 1.442695, %v2533_v43  ;;  %v2840_v1 = vsub.f32 %v6743_v18, %v7161_v17 }
 0x30b   :  { %v7215_v55 = vpop.eup %5059  ;;  %v7217_v14 = vadd.f32 %v5056_v39, %v2274_v27  ;;  %4651 = vmatprep.subr.bf16.mxu1 %v7869_v42  ;;  %5077 = vpow2.f32 %v2549_v57  ;;  %v2555_v41 = vmul.f32 1.442695, %v2534_v9  ;;  %v2855_v26 = vmul.f32 1.442695, %v2839_v28 }
 0x30c   :  { %v7220_v32 = vpop.eup %5061  ;;  %4671 = vmatpush3.bf16.msra.mxu0 %v4670_v37  ;;  %v4652_v13 = vpack.c.bf16 %v7215_v55, %v7211_v6  ;;  %5079 = vpow2.f32 %v2551_v60  ;;  %v2857_v8 = vmul.f32 1.442695, %v2840_v1  ;;  %v2535_v18 = vsub.f32 %v7973_v36, %v7110_v24 }
 0x30d   :  { %v7226_v38 = vpop.eup %5063  ;;  %4672 = vmatprep.subr.bf16.mxu0 %v7869_v42  ;;  %5081 = vpow2.f32 %v2553_v45  ;;  %v2536_v0 = vsub.f32 %v6698_v44, %v7110_v24  ;;  %v2841_v33 = vsub.f32 %v6774_v12, %v7161_v17  ;;  %v2842_v5 = vsub.f32 %v6597_v50, %v7161_v17 }
 0x30e   :  { %4653 = vmatpush3.bf16.msra.mxu1 %v4652_v13  ;;  %v4673_v16 = vpack.c.bf16 %v7226_v38, %v7220_v32  ;;  %5083 = vpow2.f32 %v2555_v41  ;;  %v2557_v20 = vmul.f32 1.442695, %v2535_v18  ;;  %v2537_v19 = vsub.f32 %v6811_v23, %v7110_v24  ;;  %v7974_v13 = vld [vmem:[#allocation10_spill] sm:$0xff] }
 0x30f   :  { %v7239_v22 = vpop.eup %5065  ;;  %4654 = vmatprep.subr.bf16.mxu1 %v7869_v42  ;;  %5085 = vpow2.f32 %v2855_v26  ;;  %v2559_v44 = vmul.f32 1.442695, %v2536_v0  ;;  %v2859_v46 = vmul.f32 1.442695, %v2841_v33  ;;  %v2861_v12 = vmul.f32 1.442695, %v2842_v5 }
 0x310   :  { %v7242_v57 = vpop.eup %5067  ;;  %4674 = vmatpush3.bf16.msra.mxu0 %v4673_v16  ;;  %v4655_v50 = vpack.c.bf16 %v7239_v22, %v6997_v25  ;;  %5087 = vpow2.f32 %v2857_v8  ;;  %v2538_v40 = vsub.f32 %v6513_v10, %v7110_v24  ;;  %v2561_v3 = vmul.f32 1.442695, %v2537_v19 }
 0x311   :  { %v7248_v23 = vpop.eup %5069  ;;  %4675 = vmatprep.subr.bf16.mxu0 %v7869_v42  ;;  %5089 = vpow2.f32 %v2557_v20  ;;  %v2843_v60 = vsub.f32 %v6763_v53, %v7161_v17  ;;  %v2844_v4 = vsub.f32 %v6584_v56, %v7161_v17  ;;  %v2539_v43 = vsub.f32 %v6833_v15, %v7110_v24 }
 0x312   :  { %v5072_v39 = vpop.eup %5071  ;;  %4656 = vmatpush3.bf16.msra.mxu1 %v4655_v50  ;;  %v4676_v10 = vpack.c.bf16 %v7248_v23, %v7242_v57  ;;  %5091 = vpow2.f32 %v2559_v44  ;;  %v2563_v27 = vmul.f32 1.442695, %v2538_v40  ;;  %v2540_v9 = vsub.f32 %v6916_v59, %v7110_v24 }
 0x313   :  { %v5074_v28 = vpop.eup %5073  ;;  %4681 = vmatprep.subr.bf16.mxu1 %v7869_v42  ;;  %5093 = vpow2.f32 %v2859_v46  ;;  %v2863_v53 = vmul.f32 1.442695, %v2843_v60  ;;  %v2865_v37 = vmul.f32 1.442695, %v2844_v4  ;;  %v2565_v56 = vmul.f32 1.442695, %v2539_v43 }
 0x314   :  { %v7262_v45 = vpop.eup %5075  ;;  %4677 = vmatpush3.bf16.msra.mxu0 %v4676_v10  ;;  %v2577_v15 = vadd.f32 %v5074_v28, %v5072_v39  ;;  %v4682_v1 = vpack.c.bf16 %v5074_v28, %v5072_v39  ;;  %5095 = vpow2.f32 %v2861_v12  ;;  %v2567_v41 = vmul.f32 1.442695, %v2540_v9 }
 0x315   :  { %v5078_v26 = vpop.eup %5077  ;;  %4323 = vmatmul.mubr.f32.vlgmr.msra.gmra.mrb[28].mxu1 %v7974_v13  ;;  %4678 = vmatprep.subr.bf16.mxu0 %v7869_v42  ;;  %v4679_v59 = vpack.c.bf16 %v7262_v45, %v7015_v62  ;;  %5097 = vpow2.f32 %v2561_v3  ;;  %v2845_v8 = vsub.f32 %v6785_v30, %v7161_v17  ;;  %v2846_v36 = vsub.f32 %v6592_v51, %v7161_v17 }
 0x316   :  { %v5080_v18 = vpop.eup %5079  ;;  %4683 = vmatpush3.bf16.msra.mxu1 %v4682_v1  ;;  %v2578_v0 = vadd.f32 %v5078_v26, %v2577_v15  ;;  %5099 = vpow2.f32 %v2563_v27  ;;  %v2541_v33 = vsub.f32 %v7007_v61, %v7110_v24  ;;  %v2542_v5 = vsub.f32 %v6570_v63, %v7110_v24  ;;  %4392 = vmatprep.mubr.msk.f32.mxu1 %vm5262_vm1, %v7907_v52  ;;  %v7975_v63 = vld [vmem:[#allocation96_spill] sm:$0xff]  ;;  %v7976_v27 = vld [vmem:[#allocation9_spill] sm:$0xff] }
 0x317   :  { %v5082_v16 = vpop.eup %5081  ;;  %4684 = vmatprep.subr.bf16.mxu1 %v7869_v42  ;;  %v4685_v30 = vpack.c.bf16 %v5080_v18, %v5078_v26  ;;  %5101 = vpow2.f32 %v2863_v53  ;;  %v2867_v20 = vmul.f32 1.442695, %v2845_v8  ;;  %v2869_v51 = vmul.f32 1.442695, %v2846_v36 }
 0x318   :  { %v5084_v19 = vpop.eup %5083  ;;  %4680 = vmatpush3.bf16.msra.mxu0 %v4679_v59  ;;  %v2579_v44 = vadd.f32 %v5080_v18, %v2578_v0  ;;  %5103 = vpow2.f32 %v2865_v37  ;;  %v2569_v46 = vmul.f32 1.442695, %v2541_v33  ;;  %v2571_v12 = vmul.f32 1.442695, %v2542_v5 }
 0x319   :  { %v5086_v61 = vpop.eup %5085  ;;  %v4688_v50 = vpack.c.bf16 %v5084_v19, %v5082_v16  ;;  %4705 = vmatprep.subr.bf16.mxu0 %v7869_v42  ;;  %5105 = vpow2.f32 %v2565_v56  ;;  %v2847_v40 = vsub.f32 %v7975_v63, %v7161_v17  ;;  %v2848_v3 = vsub.f32 %v6935_v21, %v7161_v17 }
 0x31a   :  { %v5088_v60 = vpop.eup %5087  ;;  %4686 = vmatpush3.bf16.msra.mxu1 %v4685_v30  ;;  %v2580_v4 = vadd.f32 %v5082_v16, %v2579_v44  ;;  %5107 = vpow2.f32 %v2567_v41  ;;  %v2543_v43 = vsub.f32 %v7023_v35, %v7110_v24  ;;  %v2849_v39 = vsub.f32 %v6967_v29, %v7161_v17  ;;  %v7977_v24 = vld [vmem:[#allocation97_spill] sm:$0xff] }
 0x31b   :  { %v5090_v10 = vpop.eup %5089  ;;  %4358 = vmatmul.mubr.f32.vlgmr.msra.gmra.mrb[6].mxu0 %v7976_v27  ;;  %4687 = vmatprep.subr.bf16.mxu1 %v7869_v42  ;;  %v2887_v9 = vadd.f32 %v5088_v60, %v5086_v61  ;;  %v4706_v28 = vpack.c.bf16 %v5088_v60, %v5086_v61  ;;  %5109 = vpow2.f32 %v2867_v20  ;;  %v2871_v53 = vmul.f32 1.442695, %v2847_v40 }
 0x31c   :  { %v5092_v21 = vpop.eup %5091  ;;  %v2581_v37 = vadd.f32 %v5084_v19, %v2580_v4  ;;  %5111 = vpow2.f32 %v2869_v51  ;;  %v2873_v56 = vmul.f32 1.442695, %v2848_v3  ;;  %v2573_v15 = vmul.f32 1.442695, %v2543_v43  ;;  %4427 = vmatprep.mubr.msk.f32.mxu0 %vm5262_vm1, %v7907_v52 }
 0x31d   :  { %v5094_v35 = vpop.eup %5093  ;;  %4707 = vmatpush3.bf16.msra.mxu0 %v4706_v28  ;;  %v4691_v29 = vpack.c.bf16 %v5092_v21, %v5090_v10  ;;  %5113 = vpow2.f32 %v2569_v46  ;;  %v2850_v1 = vsub.f32 %v7977_v24, %v7161_v17  ;;  %v2875_v41 = vmul.f32 1.442695, %v2849_v39 }
 0x31e   :  { %v5096_v26 = vpop.eup %5095  ;;  %4689 = vmatpush3.bf16.msra.mxu1 %v4688_v50  ;;  %v2582_v13 = vadd.f32 %v5090_v10, %v2581_v37  ;;  %4708 = vmatprep.subr.bf16.mxu0 %v7869_v42  ;;  %v2888_v59 = vadd.f32 %v5094_v35, %v2887_v9  ;;  %5115 = vpow2.f32 %v2571_v12  ;;  %v2851_v8 = vsub.f32 %v6614_v34, %v7161_v17 }
 0x31f   :  { %v5098_v36 = vpop.eup %5097  ;;  %4690 = vmatprep.subr.bf16.mxu1 %v7869_v42  ;;  %v4709_v18 = vpack.c.bf16 %v5096_v26, %v5094_v35  ;;  %5117 = vpow2.f32 %v2871_v53  ;;  %v2877_v0 = vmul.f32 1.442695, %v2850_v1  ;;  %v2852_v33 = vsub.f32 %v7078_v2, %v7161_v17 }
 0x320   :  { %v5100_v5 = vpop.eup %5099  ;;  %v2853_v16 = vsub.f32 %v7082_v31, %v7161_v17  ;;  %v2583_v30 = vadd.f32 %v5092_v21, %v2582_v13  ;;  %v2889_v20 = vadd.f32 %v5096_v26, %v2888_v59  ;;  %5119 = vpow2.f32 %v2873_v56  ;;  %v7980_v13 = vld [vmem:[#allocation36_spill] sm:$0xff] }
 0x321   :  { %v5102_v51 = vpop.eup %5101  ;;  %4710 = vmatpush3.bf16.msra.mxu0 %v4709_v18  ;;  %v4694_v19 = vpack.c.bf16 %v5100_v5, %v5098_v36  ;;  %5121 = vpow2.f32 %v2573_v15  ;;  %v2879_v34 = vmul.f32 1.442695, %v2851_v8  ;;  %v2881_v44 = vmul.f32 1.442695, %v2852_v33  ;;  %v7981_v18 = vld [vmem:[#allocation90_spill] sm:$0xff] }
 0x322   :  { %v5104_v46 = vpop.eup %5103  ;;  %4692 = vmatpush3.bf16.msra.mxu1 %v4691_v29  ;;  %v2584_v12 = vadd.f32 %v5098_v36, %v2583_v30  ;;  %4711 = vmatprep.subr.bf16.mxu0 %v7869_v42  ;;  %v2890_v61 = vadd.f32 %v5102_v51, %v2889_v20  ;;  %5123 = vpow2.f32 %v2875_v41  ;;  %v2854_v2 = vsub.f32 %v6617_v48, %v7161_v17  ;;  %v7979_v41 = vld [vmem:[#allocation22_spill] sm:$0xff] }
 0x323   :  { %v5106_v31 = vpop.eup %5105  ;;  %4693 = vmatprep.subr.bf16.mxu1 %v7869_v42  ;;  %v4712_v50 = vpack.c.bf16 %v5104_v46, %v5102_v51  ;;  %5125 = vpow2.f32 %v2877_v0  ;;  %v2883_v4 = vmul.f32 1.442695, %v2853_v16  ;;  %v1656_v17 = vadd.f32 %v7086_v47, %v7061_v11 }
 0x324   :  { %v5108_v63 = vpop.eup %5107  ;;  %v2585_v40 = vadd.f32 %v5100_v5, %v2584_v12  ;;  %v2891_v3 = vadd.f32 %v5104_v46, %v2890_v61  ;;  %5127 = vpow2.f32 %v2879_v34  ;;  %v2885_v48 = vmul.f32 1.442695, %v2854_v2  ;;  %v7982_v61 = vld [vmem:[#allocation13_spill] sm:$0xff] }
 0x325   :  { %v5110_v60 = vpop.eup %5109  ;;  %4713 = vmatpush3.bf16.msra.mxu0 %v4712_v50  ;;  %v4697_v43 = vpack.c.bf16 %v5108_v63, %v5106_v31  ;;  %5129 = vpow2.f32 %v2881_v44  ;;  %v1966_v28 = vadd.f32 %v7197_v49, %v7184_v58  ;;  %v1657_v37 = vadd.f32 %v7092_v7, %v1656_v17  ;;  %v7978_v58 = vld [vmem:[#allocation34_spill] sm:$0xff]  ;;  %v7988_v17 = vld [vmem:[#allocation17_spill] sm:$0xff] }
 0x326   :  { %v5112_v39 = vpop.eup %5111  ;;  %4695 = vmatpush3.bf16.msra.mxu1 %v4694_v19  ;;  %4714 = vmatprep.subr.bf16.mxu0 %v7869_v42  ;;  %v2892_v10 = vadd.f32 %v5110_v60, %v2891_v3  ;;  %v2276_v56 = vadd.f32 %v7220_v32, %v7217_v14  ;;  %5131 = vpow2.f32 %v2883_v4  ;;  %v2586_v33 = vadd.f32 %v5106_v31, %v2585_v40  ;;  %v7983_v3 = vld [vmem:[#allocation11_spill] sm:$0xff]  ;;  %v7984_v4 = vld [vmem:[#allocation18_spill] sm:$0xff] }
 0x327   :  { %v5114_v27 = vpop.eup %5113  ;;  %4696 = vmatprep.subr.bf16.mxu1 %v7869_v42  ;;  %v4715_v9 = vpack.c.bf16 %v5112_v39, %v5110_v60  ;;  %v1967_v11 = vadd.f32 %v7200_v54, %v1966_v28  ;;  %5133 = vpow2.f32 %v2885_v48  ;;  %v1658_v49 = vadd.f32 %v7978_v58, %v1657_v37  ;;  %v7987_v48 = vld [vmem:[#allocation89_spill] sm:$0xff] }
 0x328   :  { %v5116_v53 = vpop.eup %5115  ;;  %v2893_v21 = vadd.f32 %v5112_v39, %v2892_v10  ;;  %v2277_v36 = vadd.f32 %v7226_v38, %v2276_v56  ;;  %v2587_v51 = vadd.f32 %v5108_v63, %v2586_v33  ;;  %v7986_v39 = vld [vmem:[#allocation21_spill] sm:$0xff] }
 0x329   :  { %v5118_v15 = vpop.eup %5117  ;;  %4716 = vmatpush3.bf16.msra.mxu0 %v4715_v9  ;;  %v4700_v35 = vpack.c.bf16 %v5116_v53, %v5114_v27  ;;  %v1968_v14 = vadd.f32 %v7211_v6, %v1967_v11  ;;  %v1659_v54 = vadd.f32 %v7980_v13, %v1658_v49  ;;  %v7989_v9 = vld [vmem:[#allocation48_spill] sm:$0xff]  ;;  %v7991_v37 = vld [vmem:[#allocation29_spill] sm:$0xff]  ;;  %v7993_v11 = vld [vmem:[#allocation30_spill] sm:$0xff] }
 0x32a   :  { %v5120_v47 = vpop.eup %5119  ;;  %4698 = vmatpush3.bf16.msra.mxu1 %v4697_v43  ;;  %4717 = vmatprep.subr.bf16.mxu0 %v7869_v42  ;;  %v2894_v29 = vadd.f32 %v5118_v15, %v2893_v21  ;;  %v2278_v30 = vadd.f32 %v7242_v57, %v2277_v36  ;;  %v2588_v19 = vadd.f32 %v5114_v27, %v2587_v51  ;;  %v7985_v43 = vld [vmem:[#allocation19_spill] sm:$0xff]  ;;  %v7995_v49 = vld [vmem:[#allocation45_spill] sm:$0xff] }
 0x32b   :  { %v5122_v24 = vpop.eup %5121  ;;  %4699 = vmatprep.subr.bf16.mxu1 %v7869_v42  ;;  %v4718_v7 = vpack.c.bf16 %v5120_v47, %v5118_v15  ;;  %v1969_v8 = vadd.f32 %v7215_v55, %v1968_v14  ;;  %v7326_v0 = vadd.f32 %v7981_v18, %v1659_v54  ;;  %v1036_v27 = vadd.f32 %v7988_v17, %v7987_v48  ;;  %v7992_v15 = vld [vmem:[#allocation88_spill] sm:$0xff] }
 0x32c   :  { %v5124_v32 = vpop.eup %5123  ;;  %v2895_v1 = vadd.f32 %v5120_v47, %v2894_v29  ;;  %v4703_v26 = vpack.c.bf16 %v7979_v41, %v5122_v24  ;;  %v2279_v38 = vadd.f32 %v7248_v23, %v2278_v30  ;;  %v2589_v12 = vadd.f32 %v5116_v53, %v2588_v19  ;;  %v7990_v53 = vld [vmem:[#allocation57_spill] sm:$0xff]  ;;  %v7994_v29 = vld [vmem:[#allocation58_spill] sm:$0xff] }
 0x32d   :  { %v5126_v59 = vpop.eup %5125  ;;  %4719 = vmatpush3.bf16.msra.mxu0 %v4718_v7  ;;  %v1970_v16 = vadd.f32 %v6997_v25, %v1969_v8  ;;  %v1037_v21 = vadd.f32 %v7990_v53, %v1036_v27  ;;  %v7996_v7 = vld [vmem:[#allocation16_spill] sm:$0xff]  ;;  %v7999_v30 = vld [vmem:[#allocation62_spill] sm:$0xff] }
 0x32e   :  { %4701 = vmatpush3.bf16.msra.mxu1 %v4700_v35  ;;  %4720 = vmatprep.subr.bf16.mxu0 %v7869_v42  ;;  %v5128_v6 = vpop.eup %5127  ;;  %v4721_v5 = vpack.c.bf16 %v5126_v59, %v5124_v32  ;;  %v2896_v46 = vadd.f32 %v5124_v32, %v2895_v1  ;;  %v2280_v57 = vadd.f32 %v7015_v62, %v2279_v38  ;;  %v7997_v1 = vld [vmem:[#allocation63_spill] sm:$0xff]  ;;  %v8000_v38 = vld [vmem:[#allocation77_spill] sm:$0xff] }
 0x32f   :  { %4702 = vmatprep.subr.bf16.mxu1 %v7869_v42  ;;  %v5130_v20 = vpop.eup %5129  ;;  %v7332_v55 = vadd.f32 %v7239_v22, %v1970_v16  ;;  %v2590_v23 = vadd.f32 %v5122_v24, %v2589_v12  ;;  %v1038_v35 = vadd.f32 %v7992_v15, %v1037_v21  ;;  %v7998_v16 = vld [vmem:[#allocation80_spill] sm:$0xff] }
 0x330   :  { %v5132_v34 = vpop.eup %5131  ;;  %v4724_v44 = vpack.c.bf16 %v5130_v20, %v5128_v6  ;;  %v2897_v22 = vadd.f32 %v5126_v59, %v2896_v46  ;;  %v7341_v2 = vadd.f32 %v7262_v45, %v2280_v57  ;;  %v726_v45 = vadd.f32 %v7985_v43, %v7984_v4  ;;  %v2991_v57 = vpop.permute.xlu1 %2990 }
 0x331   :  { %4722 = vmatpush3.bf16.msra.mxu0 %v4721_v5  ;;  %v5134_v25 = vpop.eup %5133  ;;  %v7346_v63 = vadd.f32 %v7979_v41, %v2590_v23  ;;  %v1039_v58 = vadd.f32 %v7994_v29, %v1038_v35  ;;  %v2996_v43 = vpop.permute.xlu0 %2995 }
 0x332   :  { %4704 = vmatpush3.bf16.msra.mxu1 %v4703_v26  ;;  %4723 = vmatprep.subr.bf16.mxu0 %v7869_v42  ;;  %v4727_v31 = vpack.c.bf16 %v5134_v25, %v5132_v34  ;;  %v2898_v50 = vadd.f32 %v5128_v6, %v2897_v22  ;;  %v727_v10 = vadd.f32 %v7986_v39, %v726_v45  ;;  %v8002_v22 = vld [vmem:[#allocation78_spill] sm:$0xff] }
 0x333   :  { %4729 = vmatprep.subr.bf16.mxu1 %v7869_v42  ;;  %v1040_v14 = vadd.f32 %v7996_v7, %v1039_v58 }
 0x334   :  { %v2899_v62 = vadd.f32 %v5130_v20, %v2898_v50  ;;  %v728_v28 = vadd.f32 %v7989_v9, %v727_v10  ;;  %v1346_v20 = vadd.f32 %v7999_v30, %v7998_v16  ;;  %v8003_v50 = vld [vmem:[#allocation28_spill] sm:$0xff]  ;;  %v8004_v10 = vld [vmem:[#allocation33_spill] sm:$0xff] }
 0x335   :  { %4393 = vmatmul.mubr.f32.vlgmr.msra.gmra.mrb[30].mxu1 %v7982_v61  ;;  %4725 = vmatpush3.bf16.msra.mxu0 %v4724_v44  ;;  %v1041_v41 = vadd.f32 %v7997_v1, %v1040_v14 }
 0x336   :  { %4726 = vmatprep.subr.bf16.mxu0 %v7869_v42  ;;  %4446 = vmatprep.mubr.msk.f32.mxu1 %vm5262_vm1, %v7907_v52  ;;  %v2900_v40 = vadd.f32 %v5132_v34, %v2899_v62  ;;  %v729_v56 = vadd.f32 %v7991_v37, %v728_v28  ;;  %v1347_v19 = vadd.f32 %v8000_v38, %v1346_v20  ;;  %v8001_v34 = vld [vmem:[#allocation86_spill] sm:$0xff]  ;;  %v8005_v28 = vld [vmem:[#allocation35_spill] sm:$0xff] }
 0x337   :  { %v1042_v13 = vrot.slane %v1041_v41, 4  ;;  %v1661_v53 = vadd.f32 %v8005_v28, %v7326_v0 }
 0x338   :  { %v7349_v60 = vadd.f32 %v5134_v25, %v2900_v40  ;;  %v730_v47 = vadd.f32 %v7993_v11, %v729_v56  ;;  %v1348_v44 = vadd.f32 %v8001_v34, %v1347_v19  ;;  %v2282_v34 = vrot.slane %v7341_v2, 4 }
 0x339   :  { %4728 = vmatpush3.bf16.msra.mxu0 %v4727_v31  ;;  %v1043_v59 = vadd.f32 %v1042_v13, %v1041_v41  ;;  %v1662_v56 = vrot.slane %v1661_v53, 4 }
 0x33a   :  { %v731_v24 = vadd.f32 %v7995_v49, %v730_v47  ;;  %v1349_v23 = vadd.f32 %v8002_v22, %v1348_v44 }
 0x33b   :  { %v1044_v36 = vrot.slane %v1043_v59, 2  ;;  %v1663_v47 = vadd.f32 %v1662_v56, %v1661_v53 }
 0x33c   :  { %4428 = vmatmul.mubr.f32.vlgmr.msra.gmra.mrb[8].mxu0 %v7983_v3  ;;  %v732_v32 = vrot.slane %v731_v24, 4  ;;  %v1350_v62 = vadd.f32 %v8003_v50, %v1349_v23 }
 0x33d   :  { %v1045_v33 = vadd.f32 %v1044_v36, %v1043_v59  ;;  %v1664_v14 = vrot.slane %v1663_v47, 2  ;;  %v3001_v59 = vpop.permute.xlu1 %3000 }
 0x33e   :  { %v733_v26 = vadd.f32 %v732_v32, %v731_v24  ;;  %v1351_v48 = vadd.f32 %v8004_v10, %v1350_v62 }
 0x33f   :  { %v1046_v5 = vrot.slane %v1045_v33, 1  ;;  %v1665_v0 = vadd.f32 %v1664_v14, %v1663_v47 }
 0x340   :  { %v734_v54 = vrot.slane %v733_v26, 2  ;;  %v1352_v9 = vrot.slane %v1351_v48, 4 }
 0x341   :  { %v1047_v51 = vadd.f32 %v1046_v5, %v1045_v33  ;;  %v1666_v41 = vrot.slane %v1665_v0, 1  ;;  %v1972_v33 = vrot.slane %v7332_v55, 4  ;;  %v3006_v30 = vpop.permute.xlu1 %3005 }
 0x342   :  { %v735_v8 = vadd.f32 %v734_v54, %v733_v26  ;;  %v1353_v21 = vadd.f32 %v1352_v9, %v1351_v48  ;;  %v3011_v48 = vpop.permute.xlu0 %3010 }
 0x343   :  { %v1667_v26 = vadd.f32 %v1666_v41, %v1665_v0  ;;  %v1973_v38 = vadd.f32 %v1972_v33, %v7332_v55 }
 0x344   :  { %v736_v18 = vrot.slane %v735_v8, 1  ;;  %v1354_v15 = vrot.slane %v1353_v21, 2 }
 0x346   :  { %v737_v6 = vadd.f32 %v736_v18, %v735_v8  ;;  %v1355_v58 = vadd.f32 %v1354_v15, %v1353_v21  ;;  %v2902_v21 = vrot.slane %v7349_v60, 4  ;;  %v3016_v15 = vpop.permute.xlu1 %3015 }
 0x348   :  { %5135 = vrcp.f32 %v737_v6  ;;  %v1356_v32 = vrot.slane %v1355_v58, 1 }
 0x349   :  { %5137 = vrcp.f32 %v1047_v51 }
 0x34a   :  { %v1357_v1 = vadd.f32 %v1356_v32, %v1355_v58  ;;  %v2903_v58 = vadd.f32 %v2902_v21, %v7349_v60 }
 0x352   :  { %v5136_v46 = vpop.eup %5135 }
 0x353   :  { %v5138_v3 = vpop.eup %5137 }
 0x392   :  { %v804_v25 = vpop.f32.mrb[24].mxu1 }
 0x393   :  { %v809_v12 = vmul.f32 %v5136_v46, %v804_v25  ;;  %v4184_v61 = vpop.f32.mrb[25].mxu1  ;;  %v1974_v46 = vrot.slane %v1973_v38, 2  ;;  %v2283_v25 = vadd.f32 %v2282_v34, %v7341_v2  ;;  %v2592_v2 = vrot.slane %v7346_v63, 4  ;;  %v3026_v34 = vpop.permute.xlu1 %3025 }
 0x395   :  { %v3028_v31 = vadd.f32 %v2991_v57, %v809_v12  ;;  %v1975_v57 = vadd.f32 %v1974_v46, %v1973_v38  ;;  %v2284_v12 = vrot.slane %v2283_v25, 2  ;;  %v2593_v9 = vadd.f32 %v2592_v2, %v7346_v63 }
 0x397   :  { %v3044_v40 = vmul.f32 1.442695, %v3028_v31  ;;  %vm3036_vm10 = vcmp.gt.f32.partialorder %v3028_v31, 0.0  ;;  %v1976_v22 = vrot.slane %v1975_v57, 1 }
 0x398   :  { %v1114_v4 = vpop.f32.mrb[2].mxu0 }
 0x399   :  { %v1119_v45 = vmul.f32 %v5138_v3, %v1114_v4  ;;  %v4219_v39 = vpop.f32.mrb[3].mxu0  ;;  %5139 = vpow2.f32 %v3044_v40  ;;  %v1977_v40 = vadd.f32 %v1976_v22, %v1975_v57 }
 0x39b   :  { %v3029_v17 = vadd.f32 %v2996_v43, %v1119_v45 }
 0x39d   :  { %v3046_v27 = vmul.f32 1.442695, %v3029_v17  ;;  %vm3037_vm11 = vcmp.gt.f32.partialorder %v3029_v17, 0.0 }
 0x39f   :  { %5141 = vpow2.f32 %v3046_v27 }
 0x3a0   :  { %5143 = vrcp.f32 %v1357_v1 }
 0x3a1   :  { %5145 = vrcp.f32 %v1667_v26 }
 0x3a3   :  { %v5140_v37 = vpop.eup %5139 }
 0x3a4   :  { %v3843_v35 = vadd.f32 -1.0, %v5140_v37 }
 0x3a6   :  { %v3068_v49 = vsel %vm3036_vm10, %v3028_v31, %v3843_v35  ;;  %v2285_v31 = vadd.f32 %v2284_v12, %v2283_v25  ;;  %v2594_v35 = vrot.slane %v2593_v9, 2 }
 0x3a8   :  { %v2286_v4 = vrot.slane %v2285_v31, 1 }
 0x3a9   :  { %v5142_v11 = vpop.eup %5141 }
 0x3aa   :  { %v3844_v29 = vadd.f32 -1.0, %v5142_v11  ;;  %v5144_v13 = vpop.eup %5143  ;;  %v2287_v45 = vadd.f32 %v2286_v4, %v2285_v31 }
 0x3ab   :  { %v5146_v5 = vpop.eup %5145 }
 0x3ac   :  { %v3069_v24 = vsel %vm3037_vm11, %v3029_v17, %v3844_v29 }
 0x3ad   :  { %v4730_v7 = vpack.c.bf16 %v3069_v24, %v3068_v49  ;;  %v2595_v49 = vadd.f32 %v2594_v35, %v2593_v9 }
 0x3af   :  { %4731 = vmatpush3.bf16.msra.mxu1 %v4730_v7  ;;  %v2904_v7 = vrot.slane %v2903_v58, 2  ;;  %v2596_v14 = vrot.slane %v2595_v49, 1 }
 0x3b0   :  { %4732 = vmatprep.subr.bf16.mxu1 %v7869_v42 }
 0x3b1   :  { %v2905_v63 = vadd.f32 %v2904_v7, %v2903_v58  ;;  %v2597_v32 = vadd.f32 %v2596_v14, %v2595_v49 }
 0x3b3   :  { %v2906_v1 = vrot.slane %v2905_v63, 1 }
 0x3c2   :  { %v1424_v54 = vpop.f32.mrb[26].mxu1 }
 0x3c3   :  { %v1429_v8 = vmul.f32 %v5144_v13, %v1424_v54  ;;  %v4254_v36 = vpop.f32.mrb[27].mxu1  ;;  %v2907_v54 = vadd.f32 %v2906_v1, %v2905_v63 }
 0x3c5   :  { %v3030_v18 = vadd.f32 %v3001_v59, %v1429_v8 }
 0x3c7   :  { %v3048_v6 = vmul.f32 1.442695, %v3030_v18  ;;  %vm3038_vm12 = vcmp.gt.f32.partialorder %v3030_v18, 0.0 }
 0x3c8   :  { %v1734_v16 = vpop.f32.mrb[4].mxu0 }
 0x3c9   :  { %v1739_v20 = vmul.f32 %v5146_v5, %v1734_v16  ;;  %v4289_v51 = vpop.f32.mrb[5].mxu0  ;;  %5147 = vpow2.f32 %v3048_v6  ;;  %v3021_v5 = vpop.permute.xlu0 %3020 }
 0x3cb   :  { %v3031_v19 = vadd.f32 %v3006_v30, %v1739_v20 }
 0x3cd   :  { %v3050_v44 = vmul.f32 1.442695, %v3031_v19  ;;  %vm3039_vm13 = vcmp.gt.f32.partialorder %v3031_v19, 0.0 }
 0x3cf   :  { %5149 = vpow2.f32 %v3050_v44 }
 0x3d0   :  { %5151 = vrcp.f32 %v1977_v40 }
 0x3d1   :  { %5153 = vrcp.f32 %v2287_v45 }
 0x3d3   :  { %v5148_v61 = vpop.eup %5147 }
 0x3d4   :  { %v3845_v23 = vadd.f32 -1.0, %v5148_v61 }
 0x3d6   :  { %v3070_v55 = vsel %vm3038_vm12, %v3030_v18, %v3845_v23 }
 0x3d9   :  { %v5150_v50 = vpop.eup %5149 }
 0x3da   :  { %v3846_v62 = vadd.f32 -1.0, %v5150_v50  ;;  %v5152_v39 = vpop.eup %5151  ;;  %v3076_v50 = vld [vmem:[%s7599_s6] sm:$0xff] }
 0x3db   :  { %v5154_v37 = vpop.eup %5153 }
 0x3dc   :  { %v3071_v3 = vsel %vm3039_vm13, %v3031_v19, %v3846_v62 }
 0x3dd   :  { %v4733_v43 = vpack.c.bf16 %v3071_v3, %v3070_v55  ;;  %v3183_v55 = vld [vmem:[%s7600_s7] sm:$0xff] }
 0x3de   :  { %4449 = vmatprep.subr.mxu0 %v3183_v55  ;;  %v3378_v3 = vld [vmem:[%s7601_s8] sm:$0x1] }
 0x3df   :  { %4734 = vmatpush3.bf16.msra.mxu1 %v4733_v43  ;;  %4450 = vmatpush3.msra.mxu0 %v3183_v55 }
 0x3e0   :  { %4735 = vmatprep.subr.bf16.mxu1 %v7869_v42  ;;  %4741 = vmatprep.subr.bf16.mxu0 %v7869_v42 }
 0x3e8   :  { %v2044_v10 = vpop.f32.mrb[28].mxu1 }
 0x3e9   :  { %v2049_v17 = vmul.f32 %v5152_v39, %v2044_v10  ;;  %v4324_v27 = vpop.f32.mrb[29].mxu1 }
 0x3eb   :  { %v3032_v28 = vadd.f32 %v3011_v48, %v2049_v17 }
 0x3ed   :  { %v3052_v53 = vmul.f32 1.442695, %v3032_v28  ;;  %vm3040_vm14 = vcmp.gt.f32.partialorder %v3032_v28, 0.0 }
 0x3ee   :  { %v2354_v56 = vpop.f32.mrb[6].mxu0 }
 0x3ef   :  { %v2359_v11 = vmul.f32 %v5154_v37, %v2354_v56  ;;  %v4359_v47 = vpop.f32.mrb[7].mxu0  ;;  %5155 = vpow2.f32 %v3052_v53 }
 0x3f1   :  { %v3033_v29 = vadd.f32 %v3016_v15, %v2359_v11 }
 0x3f3   :  { %v3054_v24 = vmul.f32 1.442695, %v3033_v29  ;;  %vm3041_vm15 = vcmp.gt.f32.partialorder %v3033_v29, 0.0 }
 0x3f5   :  { %5157 = vpow2.f32 %v3054_v24 }
 0x3f6   :  { %5159 = vrcp.f32 %v2597_v32 }
 0x3f7   :  { %5161 = vrcp.f32 %v2907_v54 }
 0x3f9   :  { %v5156_v0 = vpop.eup %5155 }
 0x3fa   :  { %v3847_v41 = vadd.f32 -1.0, %v5156_v0 }
 0x3fc   :  { %v3072_v59 = vsel %vm3040_vm14, %v3032_v28, %v3847_v41 }
 0x3ff   :  { %v5158_v26 = vpop.eup %5157 }
 0x400   :  { %v3848_v13 = vadd.f32 -1.0, %v5158_v26  ;;  %v5160_v60 = vpop.eup %5159 }
 0x401   :  { %v5162_v20 = vpop.eup %5161 }
 0x402   :  { %v3073_v8 = vsel %vm3041_vm15, %v3033_v29, %v3848_v13 }
 0x403   :  { %v4736_v36 = vpack.c.bf16 %v3073_v8, %v3072_v59  ;;  %v3778_v59 = vld [vmem:[%s7602_s9] sm:$0xff] }
 0x405   :  { %4737 = vmatpush3.bf16.msra.mxu1 %v4736_v36 }
 0x406   :  { %4738 = vmatprep.subr.bf16.mxu1 %v7869_v42 }
 0x408   :  { %v2664_v18 = vpop.f32.mrb[30].mxu1 }
 0x409   :  { %v2669_v33 = vmul.f32 %v5160_v60, %v2664_v18  ;;  %v4394_v6 = vpop.f32.mrb[31].mxu1 }
 0x40b   :  { %v3034_v16 = vadd.f32 %v3021_v5, %v2669_v33 }
 0x40d   :  { %v3056_v30 = vmul.f32 1.442695, %v3034_v16  ;;  %vm3042_vm0 = vcmp.gt.f32.partialorder %v3034_v16, 0.0 }
 0x40f   :  { %v2974_v51 = vpop.f32.mrb[8].mxu0  ;;  %5163 = vpow2.f32 %v3056_v30  ;;  %v8006_v30 = vld [vmem:[#allocation12_spill] sm:$0xff] }
 0x410   :  { %v2979_v38 = vmul.f32 %v5162_v20, %v2974_v51  ;;  %v4429_v19 = vpop.f32.mrb[9].mxu0  ;;  %v8007_v20 = vsub.s32 0, %v8006_v30 }
 0x412   :  { %v3035_v44 = vadd.f32 %v3026_v34, %v2979_v38 }
 0x414   :  { %v3058_v46 = vmul.f32 1.442695, %v3035_v44  ;;  %vm3043_vm2 = vcmp.gt.f32.partialorder %v3035_v44, 0.0 }
 0x416   :  { %5165 = vpow2.f32 %v3058_v46 }
 0x419   :  { %v5164_v25 = vpop.eup %5163 }
 0x41a   :  { %v3849_v57 = vadd.f32 -1.0, %v5164_v25 }
 0x41c   :  { %v3074_v22 = vsel %vm3042_vm0, %v3034_v16, %v3849_v57 }
 0x420   :  { %v5166_v12 = vpop.eup %5165 }
 0x421   :  { %v3850_v61 = vadd.f32 -1.0, %v5166_v12 }
 0x423   :  { %v3075_v23 = vsel %vm3043_vm2, %v3035_v44, %v3850_v61 }
 0x424   :  { %v4739_v31 = vpack.c.bf16 %v3075_v23, %v3074_v22 }
 0x426   :  { %4740 = vmatpush3.bf16.msra.mxu1 %v4739_v31 }
 0x427   :  { %4475 = vmatprep.subr.mxu1 %v7907_v52 }
 0x429   :  { %4447 = vmatmul.mubr.msk.f32.vlgmr.msra.gmra.mrb[32].mxu1 %vm3077_vm3, %v3076_v50 }
 0x42a   :  { %4477 = vmatprep.mubr.msk.f32.mxu1 %vm5262_vm1, %v7907_v52 }
 0x4fc   :  { %v7391_v62 = vpop.f32.mrb[32].mxu1 }
 0x4fd   :  { %3151 = vxpose.xlu0.b32.start.end [1/1] (short) %v7391_v62, 128  ;;  %v4448_v40 = vpop.f32.mrb[33].mxu1  ;;  %4476 = vmatpush3.msra.mxu1 %v7391_v62 }
 0x4fe   :  { %4478 = vmatmul.mubr.msk.f32.vlgmr.msra.gmra.mrb[34].mxu1 %vm3184_vm4, %v3378_v3 }
 0x57d   :  { %v3167_v4 = vpop.trf.xlu0 }
 0x57e   :  { %4451 = vmatprep.mubr.msk.f32.mxu0 %vm3184_vm4, %v3167_v4 }
 0x581   :  { %v3168_v43 = vpop.trf.xlu0 }
 0x582   :  { %4452 = vmatmul.mubr.msk.f32.vlgmr.msra.gmra.mrb[10].mxu0 %vm3184_vm4, %v3168_v43 }
 0x585   :  { %v3169_v45 = vpop.trf.xlu0 }
 0x586   :  { %4454 = vmatprep.mubr.msk.f32.mxu0 %vm3184_vm4, %v3169_v45 }
 0x589   :  { %v3170_v2 = vpop.trf.xlu0 }
 0x58a   :  { %4455 = vmatmul.mubr.msk.f32.gmra.mrb[12].mxu0 %vm3184_vm4, %v3170_v2 }
 0x58d   :  { %v3171_v39 = vpop.trf.xlu0 }
 0x58e   :  { %4457 = vmatprep.mubr.msk.f32.mxu0 %vm3184_vm4, %v3171_v39 }
 0x591   :  { %v3172_v10 = vpop.trf.xlu0 }
 0x592   :  { %4458 = vmatmul.mubr.msk.f32.gmra.mrb[14].mxu0 %vm3184_vm4, %v3172_v10 }
 0x595   :  { %v3173_v48 = vpop.trf.xlu0 }
 0x596   :  { %4460 = vmatprep.mubr.msk.f32.mxu0 %vm3184_vm4, %v3173_v48 }
 0x599   :  { %v3174_v17 = vpop.trf.xlu0 }
 0x59a   :  { %4461 = vmatmul.mubr.msk.f32.gmra.mrb[16].mxu0 %vm3184_vm4, %v3174_v17 }
 0x59d   :  { %v3175_v27 = vpop.trf.xlu0 }
 0x59e   :  { %4463 = vmatprep.mubr.msk.f32.mxu0 %vm3184_vm4, %v3175_v27 }
 0x5a1   :  { %v3176_v9 = vpop.trf.xlu0 }
 0x5a2   :  { %4464 = vmatmul.mubr.msk.f32.gmra.mrb[18].mxu0 %vm3184_vm4, %v3176_v9  ;;  %v5221_v9 = vld [vmem:[%s7603_s10 + $0x8] sm:$0xff] }
 0x5a5   :  { %v3177_v28 = vpop.trf.xlu0 }
 0x5a6   :  { %4466 = vmatprep.mubr.msk.f32.mxu0 %vm3184_vm4, %v3177_v28 }
 0x5a9   :  { %v3178_v53 = vpop.trf.xlu0 }
 0x5aa   :  { %4467 = vmatmul.mubr.msk.f32.gmra.mrb[20].mxu0 %vm3184_vm4, %v3178_v53  ;;  %v5222_v53 = vld [vmem:[%s7603_s10] sm:$0xff] }
 0x5ad   :  { %v3179_v21 = vpop.trf.xlu0 }
 0x5ae   :  { %4469 = vmatprep.mubr.msk.f32.mxu0 %vm3184_vm4, %v3179_v21 }
 0x5b1   :  { %v3180_v37 = vpop.trf.xlu0 }
 0x5b2   :  { %4470 = vmatmul.mubr.msk.f32.gmra.mrb[22].mxu0 %vm3184_vm4, %v3180_v37 }
 0x5b5   :  { %v3181_v56 = vpop.trf.xlu0 }
 0x5b6   :  { %4472 = vmatprep.mubr.msk.f32.mxu0 %vm3184_vm4, %v3181_v56 }
 0x5b9   :  { %v3182_v15 = vpop.trf.xlu0 }
 0x5ba   :  { %4473 = vmatmul.mubr.msk.f32.gmra.mrb[24].mxu0 %vm3184_vm4, %v3182_v15 }
 0x5bb   :  { %4512 = vmatprep.mubr.msk.f32.mxu0 %vm5262_vm1, %v7907_v52 }
 0x5d1   :  { %v3448_v35 = vpop.f32.mrb[34].mxu1 }
 0x5d2   :  { %v4479_v11 = vpop.f32.mrb[35].mxu1  ;;  %v7426_v51 = vrot.slane %v3448_v35, %v8007_v20  ;;  %v5226_v20 = vld [vmem:[%s7603_s10 + $0x18] sm:$0xff] }
 0x655   :  { %v4453_v47 = vpop.f32.mrb[10].mxu0 }
 0x656   :  { %3459 = vperm.xlu1 %4877, %v4453_v47   ;;  %v3299_v29 = vpop.f32.mrb[11].mxu0 }
 0x65a   :  { %3454 = vperm.xlu1 %4877, %v3299_v29  }
 0x65d   :  { %v4456_v58 = vpop.f32.mrb[12].mxu0 }
 0x65e   :  { %3469 = vperm.xlu1 %4877, %v4456_v58   ;;  %v3309_v49 = vpop.f32.mrb[13].mxu0 }
 0x662   :  { %3464 = vperm.xlu1 %4877, %v3309_v49  }
 0x665   :  { %v4459_v24 = vpop.f32.mrb[14].mxu0 }
 0x666   :  { %3479 = vperm.xlu1 %4877, %v4459_v24   ;;  %v3319_v7 = vpop.f32.mrb[15].mxu0 }
 0x66a   :  { %3474 = vperm.xlu1 %4877, %v3319_v7  }
 0x66d   :  { %v4462_v14 = vpop.f32.mrb[16].mxu0 }
 0x66e   :  { %3489 = vperm.xlu1 %4877, %v4462_v14   ;;  %v3329_v63 = vpop.f32.mrb[17].mxu0 }
 0x672   :  { %3484 = vperm.xlu1 %4877, %v3329_v63  }
 0x675   :  { %v4465_v32 = vpop.f32.mrb[18].mxu0 }
 0x676   :  { %3499 = vperm.xlu1 %4877, %v4465_v32   ;;  %v3339_v52 = vpop.f32.mrb[19].mxu0 }
 0x677   :  { %3494 = vperm.xlu0 %4878, %v3339_v52  }
 0x67d   :  { %v4468_v0 = vpop.f32.mrb[20].mxu0 }
 0x67e   :  { %3509 = vperm.xlu1 %4877, %v4468_v0   ;;  %v3349_v1 = vpop.f32.mrb[21].mxu0  ;;  %v5223_v0 = vld [vmem:[%s7603_s10 + $0x28] sm:$0xff] }
 0x682   :  { %3504 = vperm.xlu1 %4877, %v3349_v1  }
 0x685   :  { %v4471_v41 = vpop.f32.mrb[22].mxu0 }
 0x686   :  { %3519 = vperm.xlu1 %4877, %v4471_v41   ;;  %v3359_v26 = vpop.f32.mrb[23].mxu0  ;;  %v5224_v41 = vld [vmem:[%s7603_s10 + $0x20] sm:$0xff] }
 0x68a   :  { %3514 = vperm.xlu1 %4877, %v3359_v26  }
 0x68d   :  { %v4474_v13 = vpop.f32.mrb[24].mxu0 }
 0x68e   :  { %v3369_v54 = vpop.f32.mrb[25].mxu0 }
 0x68f   :  { %3524 = vperm.xlu1 %4877, %v3369_v54  }
 0x693   :  { %3529 = vperm.xlu1 %4877, %v4474_v13  }
 0x697   :  { %3781 = vperm.xlu1 %4877, %v3778_v59  }
 0x6d5   :  { %v3460_v8 = vpop.permute.xlu1 %3459 }
 0x6d6   :  { %v3537_v19 = vadd.f32 %v7426_v51, %v3460_v8 }
 0x6d8   :  { %v3569_v46 = vmul.f32 0.2, %v3537_v19  ;;  %vm3553_vm1 = vcmp.gt.f32.partialorder %v3537_v19, 0.0 }
 0x6d9   :  { %v3455_v36 = vpop.permute.xlu1 %3454 }
 0x6da   :  { %v3536_v34 = vadd.f32 %v7426_v51, %v3455_v36  ;;  %v3585_v50 = vsel %vm3553_vm1, %v3537_v19, %v3569_v46  ;;  %v5227_v19 = vld [vmem:[%s7603_s10 + $0x10] sm:$0xff] }
 0x6db   :  { %v7442_v28 = vadd.f32 %v5221_v9, %v3585_v50 }
 0x6dc   :  { %v3568_v25 = vmul.f32 0.2, %v3536_v34  ;;  %vm3552_vm5 = vcmp.gt.f32.partialorder %v3536_v34, 0.0 }
 0x6dd   :  { %v3470_v60 = vpop.permute.xlu1 %3469 }
 0x6de   :  { %v3539_v57 = vadd.f32 %v7426_v51, %v3470_v60  ;;  %v3584_v55 = vsel %vm3552_vm5, %v3536_v34, %v3568_v25  ;;  %v5225_v60 = vld [vmem:[%s7603_s10 + $0x38] sm:$0xff]  ;;  %v5229_v25 = vld [vmem:[%s7603_s10 + $0x40] sm:$0xff] }
 0x6df   :  { %v7447_v21 = vadd.f32 %v5222_v53, %v3584_v55  ;;  %v5231_v55 = vld [vmem:[%s7603_s10 + $0x58] sm:$0xff]  ;;  %v5235_v53 = vld [vmem:[%s7603_s10 + $0x70] sm:$0xff] }
 0x6e0   :  { %vm3555_vm6 = vcmp.gt.f32.partialorder %v3539_v57, 0.0  ;;  %v3571_v3 = vmul.f32 0.2, %v3539_v57 }
 0x6e1   :  { %v3465_v18 = vpop.permute.xlu1 %3464 }
 0x6e2   :  { %v3538_v12 = vadd.f32 %v7426_v51, %v3465_v18  ;;  %v3587_v37 = vsel %vm3555_vm6, %v3539_v57, %v3571_v3 }
 0x6e4   :  { %v3570_v4 = vmul.f32 0.2, %v3538_v12  ;;  %vm3554_vm7 = vcmp.gt.f32.partialorder %v3538_v12, 0.0 }
 0x6e5   :  { %v3480_v33 = vpop.permute.xlu1 %3479 }
 0x6e6   :  { %v3541_v22 = vadd.f32 %v7426_v51, %v3480_v33  ;;  %v3586_v35 = vsel %vm3554_vm7, %v3538_v12, %v3570_v4  ;;  %v5232_v4 = vld [vmem:[%s7603_s10 + $0x50] sm:$0xff] }
 0x6e7   :  { %v3602_v34 = vadd.f32 %v5227_v19, %v3586_v35 }
 0x6e8   :  { %vm3557_vm8 = vcmp.gt.f32.partialorder %v3541_v22, 0.0  ;;  %v3573_v45 = vmul.f32 0.2, %v3541_v22 }
 0x6e9   :  { %v3475_v6 = vpop.permute.xlu1 %3474 }
 0x6ea   :  { %v3540_v23 = vadd.f32 %v7426_v51, %v3475_v6  ;;  %v3589_v11 = vsel %vm3557_vm8, %v3541_v22, %v3573_v45  ;;  %v5233_v45 = vld [vmem:[%s7603_s10 + $0x60] sm:$0xff] }
 0x6eb   :  { %v7459_v1 = vadd.f32 %v5223_v0, %v3589_v11 }
 0x6ec   :  { %v3572_v2 = vmul.f32 0.2, %v3540_v23  ;;  %vm3556_vm9 = vcmp.gt.f32.partialorder %v3540_v23, 0.0 }
 0x6ed   :  { %v3490_v5 = vpop.permute.xlu1 %3489 }
 0x6ee   :  { %v3543_v31 = vadd.f32 %v7426_v51, %v3490_v5  ;;  %v3588_v47 = vsel %vm3556_vm9, %v3540_v23, %v3572_v2  ;;  %v3617_v2 = vmax.f32 %v7442_v28, %v7459_v1 }
 0x6ef   :  { %v7464_v26 = vadd.f32 %v5224_v41, %v3588_v47 }
 0x6f0   :  { %v3575_v39 = vmul.f32 0.2, %v3543_v31  ;;  %vm3559_vm10 = vcmp.gt.f32.partialorder %v3543_v31, 0.0 }
 0x6f1   :  { %v3485_v16 = vpop.permute.xlu1 %3484 }
 0x6f2   :  { %v3542_v10 = vadd.f32 %v7426_v51, %v3485_v16  ;;  %v3591_v58 = vsel %vm3559_vm10, %v3543_v31, %v3575_v39 }
 0x6f3   :  { %v7470_v18 = vadd.f32 %v5225_v60, %v3591_v58 }
 0x6f4   :  { %v3574_v49 = vmul.f32 0.2, %v3542_v10  ;;  %vm3558_vm11 = vcmp.gt.f32.partialorder %v3542_v10, 0.0 }
 0x6f5   :  { %v3500_v38 = vpop.permute.xlu1 %3499 }
 0x6f6   :  { %v3495_v40 = vpop.permute.xlu0 %3494  ;;  %v3545_v17 = vadd.f32 %v7426_v51, %v3500_v38  ;;  %v3590_v54 = vsel %vm3558_vm11, %v3542_v10, %v3574_v49  ;;  %v3603_v38 = vadd.f32 %v5226_v20, %v3587_v37 }
 0x6f7   :  { %v3544_v48 = vadd.f32 %v7426_v51, %v3495_v40  ;;  %v3616_v40 = vmax.f32 %v7447_v21, %v7464_v26 }
 0x6f8   :  { %v3577_v14 = vmul.f32 0.2, %v3545_v17  ;;  %vm3561_vm13 = vcmp.gt.f32.partialorder %v3545_v17, 0.0  ;;  %v3619_v39 = vmax.f32 %v3603_v38, %v7470_v18 }
 0x6f9   :  { %v3576_v24 = vmul.f32 0.2, %v3544_v48  ;;  %vm3560_vm12 = vcmp.gt.f32.partialorder %v3544_v48, 0.0 }
 0x6fa   :  { %v3593_v33 = vsel %vm3561_vm13, %v3545_v17, %v3577_v14 }
 0x6fb   :  { %v3592_v59 = vsel %vm3560_vm12, %v3544_v48, %v3576_v24 }
 0x6fc   :  { %v7488_v57 = vadd.f32 %v5229_v25, %v3592_v59 }
 0x6fd   :  { %v3510_v44 = vpop.permute.xlu1 %3509 }
 0x6fe   :  { %v3547_v27 = vadd.f32 %v7426_v51, %v3510_v44  ;;  %v5228_v44 = vld [vmem:[%s7603_s10 + $0x30] sm:$0xff]  ;;  %v3620_v17 = vmax.f32 %v3616_v40, %v7488_v57 }
 0x6ff   :  { %v7483_v46 = vadd.f32 %v5228_v44, %v3590_v54 }
 0x700   :  { %v3579_v63 = vmul.f32 0.2, %v3547_v27  ;;  %vm3563_vm14 = vcmp.gt.f32.partialorder %v3547_v27, 0.0 }
 0x701   :  { %v3505_v61 = vpop.permute.xlu1 %3504  ;;  %v3618_v48 = vmax.f32 %v3602_v34, %v7483_v46 }
 0x702   :  { %v3546_v56 = vadd.f32 %v7426_v51, %v3505_v61  ;;  %v3595_v6 = vsel %vm3563_vm14, %v3547_v27, %v3579_v63  ;;  %v5230_v61 = vld [vmem:[%s7603_s10 + $0x48] sm:$0xff] }
 0x703   :  { %v7493_v22 = vadd.f32 %v5230_v61, %v3593_v33  ;;  %v7502_v3 = vadd.f32 %v5231_v55, %v3595_v6  ;;  %v5234_v27 = vld [vmem:[%s7603_s10 + $0x68] sm:$0xff] }
 0x704   :  { %v3578_v32 = vmul.f32 0.2, %v3546_v56  ;;  %vm3562_vm15 = vcmp.gt.f32.partialorder %v3546_v56, 0.0 }
 0x705   :  { %v3520_v43 = vpop.permute.xlu1 %3519  ;;  %v3623_v35 = vmax.f32 %v3619_v39, %v7502_v3 }
 0x706   :  { %v3549_v7 = vadd.f32 %v7426_v51, %v3520_v43  ;;  %v3594_v5 = vsel %vm3562_vm15, %v3546_v56, %v3578_v32  ;;  %v3621_v56 = vmax.f32 %v3617_v2, %v7493_v22 }
 0x707   :  { %v7507_v43 = vadd.f32 %v5232_v4, %v3594_v5 }
 0x708   :  { %v3581_v8 = vmul.f32 0.2, %v3549_v7  ;;  %vm3565_vm2 = vcmp.gt.f32.partialorder %v3549_v7, 0.0 }
 0x709   :  { %v3515_v15 = vpop.permute.xlu1 %3514  ;;  %v3622_v11 = vmax.f32 %v3618_v48, %v7507_v43 }
 0x70a   :  { %v3548_v29 = vadd.f32 %v7426_v51, %v3515_v15  ;;  %v3597_v23 = vsel %vm3565_vm2, %v3549_v7, %v3581_v8 }
 0x70b   :  { %v7522_v9 = vadd.f32 %v5234_v27, %v3597_v23 }
 0x70c   :  { %v3580_v52 = vmul.f32 0.2, %v3548_v29  ;;  %vm3564_vm0 = vcmp.gt.f32.partialorder %v3548_v29, 0.0 }
 0x70d   :  { %v3625_v49 = vmax.f32 %v3621_v56, %v7522_v9 }
 0x70e   :  { %v3525_v13 = vpop.permute.xlu1 %3524  ;;  %v3596_v16 = vsel %vm3564_vm0, %v3548_v29, %v3580_v52  ;;  %v5236_v29 = vld [vmem:[%s7603_s10 + $0x78] sm:$0xff]  ;;  %s5272_s10 = smov [#allocation2]  }
 0x70f   :  { %v3550_v36 = vadd.f32 %v7426_v51, %v3525_v13  ;;  %s3810_s28 = sshll.u32 %s5272_s10, 4  ;;  %s3811_s28 = int_to_ptr.vmem [resolvable:$true] %s3810_s28 }
 0x710   :  { %s5237_s29 = scalar_lea.vmem %s3811_s28, 128  ;;  %p5242_p1 = scmp.lt.s32.totalorder %s3811_s28, %s3811_s28 }
 0x711   :  { %vm3566_vm3 = vcmp.gt.f32.partialorder %v3550_v36, 0.0  ;;  %v3582_v30 = vmul.f32 0.2, %v3550_v36  ;;  %p5238_p0 = scmp.ne.s32.totalorder %s3811_s28, %s5237_s29  ;;  %p5243_p2 = scmp.lt.s32.totalorder %s5237_s29, %s5237_s29 }
 0x712   :  { %v3530_v12 = vpop.permute.xlu1 %3529 }
 0x713   :  { %v3598_v31 = vsel %vm3566_vm3, %v3550_v36, %v3582_v30  ;;  %v3551_v50 = vadd.f32 %v7426_v51, %v3530_v12  ;;  %v7512_v51 = vadd.f32 %v5233_v45, %v3596_v16  ;;  %p5244_p3 = por %p5243_p2, %p5242_p1 }
 0x714   :  { %v7527_v37 = vadd.f32 %v5235_v53, %v3598_v31 }
 0x715   :  { %vm3567_vm4 = vcmp.gt.f32.partialorder %v3551_v50, 0.0  ;;  %v3583_v10 = vmul.f32 0.2, %v3551_v50  ;;  %v3624_v47 = vmax.f32 %v3620_v17, %v7512_v51  ;;  %p5245_p4 = pnand %p5244_p3, %p5238_p0 }
 0x716   :  { %v3626_v24 = vmax.f32 %v3622_v11, %v7527_v37 }
 0x717   :  { %v3599_v15 = vsel %vm3567_vm4, %v3551_v50, %v3583_v10  ;;  %v3628_v14 = vmax.f32 %v3624_v47, %v3625_v49 }
 0x718   :  { %v7536_v58 = vadd.f32 %v5236_v29, %v3599_v15 }
 0x71a   :  { %v3627_v7 = vmax.f32 %v3623_v35, %v7536_v58 }
 0x71c   :  { %v3629_v63 = vmax.f32 %v3626_v24, %v3627_v7 }
 0x71e   :  { %v3630_v32 = vmax.f32 %v3628_v14, %v3629_v63 }
 0x720   :  { %v3631_v52 = vrot.slane %v3630_v32, 4 }
 0x722   :  { %v3632_v0 = vmax.f32 %v3630_v32, %v3631_v52 }
 0x724   :  { %v3633_v41 = vrot.slane %v3632_v0, 2 }
 0x726   :  { %v3634_v13 = vmax.f32 %v3632_v0, %v3633_v41 }
 0x728   :  { %v3635_v54 = vrot.slane %v3634_v13, 1 }
 0x72a   :  { %v7541_v59 = vmax.f32 %v3634_v13, %v3635_v54 }
 0x72c   :  { %v3637_v8 = vsub.f32 %v7447_v21, %v7541_v59  ;;  %v3638_v36 = vsub.f32 %v7442_v28, %v7541_v59  ;;  %v3639_v60 = vsub.f32 %v3602_v34, %v7541_v59  ;;  %v3640_v33 = vsub.f32 %v3603_v38, %v7541_v59 }
 0x72d   :  { %v3641_v30 = vsub.f32 %v7464_v26, %v7541_v59  ;;  %v3642_v19 = vsub.f32 %v7459_v1, %v7541_v59  ;;  %v3643_v28 = vsub.f32 %v7483_v46, %v7541_v59  ;;  %v3644_v38 = vsub.f32 %v7470_v18, %v7541_v59 }
 0x72e   :  { %v3653_v6 = vmul.f32 1.442695, %v3637_v8  ;;  %v3655_v5 = vmul.f32 1.442695, %v3638_v36  ;;  %v3657_v16 = vmul.f32 1.442695, %v3639_v60  ;;  %v3645_v26 = vsub.f32 %v7488_v57, %v7541_v59 }
 0x72f   :  { %v3659_v20 = vmul.f32 1.442695, %v3640_v33  ;;  %v3661_v21 = vmul.f32 1.442695, %v3641_v30  ;;  %v3663_v34 = vmul.f32 1.442695, %v3642_v19  ;;  %v3646_v1 = vsub.f32 %v7493_v22, %v7541_v59 }
 0x730   :  { %5167 = vpow2.f32 %v3653_v6  ;;  %v3665_v44 = vmul.f32 1.442695, %v3643_v28  ;;  %v3667_v25 = vmul.f32 1.442695, %v3644_v38  ;;  %v3669_v61 = vmul.f32 1.442695, %v3645_v26 }
 0x731   :  { %5169 = vpow2.f32 %v3655_v5  ;;  %v3647_v46 = vsub.f32 %v7507_v43, %v7541_v59  ;;  %v3671_v31 = vmul.f32 1.442695, %v3646_v1  ;;  %v3648_v18 = vsub.f32 %v7502_v3, %v7541_v59 }
 0x732   :  { %5171 = vpow2.f32 %v3657_v16  ;;  %v3649_v45 = vsub.f32 %v7512_v51, %v7541_v59  ;;  %v3650_v2 = vsub.f32 %v7522_v9, %v7541_v59  ;;  %v3652_v17 = vsub.f32 %v7536_v58, %v7541_v59 }
 0x733   :  { %5173 = vpow2.f32 %v3659_v20  ;;  %v3673_v22 = vmul.f32 1.442695, %v3647_v46  ;;  %v3675_v43 = vmul.f32 1.442695, %v3648_v18  ;;  %v3651_v56 = vsub.f32 %v7527_v37, %v7541_v59 }
 0x734   :  { %5175 = vpow2.f32 %v3661_v21  ;;  %v3677_v53 = vmul.f32 1.442695, %v3649_v45  ;;  %v3679_v51 = vmul.f32 1.442695, %v3650_v2  ;;  %v3683_v47 = vmul.f32 1.442695, %v3652_v17 }
 0x735   :  { %5177 = vpow2.f32 %v3663_v34  ;;  %v3681_v58 = vmul.f32 1.442695, %v3651_v56 }
 0x736   :  { %5179 = vpow2.f32 %v3665_v44 }
 0x737   :  { %5181 = vpow2.f32 %v3667_v25 }
 0x738   :  { %5183 = vpow2.f32 %v3669_v61  ;;  %v3782_v61 = vpop.permute.xlu1 %3781 }
 0x739   :  { %5185 = vpow2.f32 %v3671_v31 }
 0x73a   :  { %v5168_v12 = vpop.eup %5167  ;;  %5187 = vpow2.f32 %v3673_v22 }
 0x73b   :  { %v5170_v23 = vpop.eup %5169  ;;  %5189 = vpow2.f32 %v3675_v43 }
 0x73c   :  { %v5172_v50 = vpop.eup %5171  ;;  %v3685_v40 = vadd.f32 %v5170_v23, %v5168_v12  ;;  %v4742_v57 = vpack.c.bf16 %v5170_v23, %v5168_v12  ;;  %5191 = vpow2.f32 %v3677_v53 }
 0x73d   :  { %v5174_v55 = vpop.eup %5173  ;;  %5193 = vpow2.f32 %v3679_v51 }
 0x73e   :  { %4743 = vmatpush3.bf16.msra.mxu0 %v4742_v57  ;;  %v3686_v4 = vadd.f32 %v5172_v50, %v3685_v40  ;;  %v5176_v39 = vpop.eup %5175  ;;  %v4745_v10 = vpack.c.bf16 %v5174_v55, %v5172_v50  ;;  %5195 = vpow2.f32 %v3683_v47 }
 0x73f   :  { %4744 = vmatprep.subr.bf16.mxu0 %v7869_v42  ;;  %v5178_v48 = vpop.eup %5177  ;;  %5197 = vpow2.f32 %v3681_v58 }
 0x740   :  { %v3687_v3 = vadd.f32 %v5174_v55, %v3686_v4  ;;  %v5180_v15 = vpop.eup %5179  ;;  %v4748_v35 = vpack.c.bf16 %v5178_v48, %v5176_v39 }
 0x741   :  { %v5182_v11 = vpop.eup %5181 }
 0x742   :  { %4746 = vmatpush3.bf16.msra.mxu0 %v4745_v10  ;;  %v3688_v27 = vadd.f32 %v5176_v39, %v3687_v3  ;;  %v5184_v49 = vpop.eup %5183  ;;  %v4751_v7 = vpack.c.bf16 %v5182_v11, %v5180_v15 }
 0x743   :  { %4747 = vmatprep.subr.bf16.mxu0 %v7869_v42  ;;  %v5186_v14 = vpop.eup %5185 }
 0x744   :  { %v3689_v9 = vadd.f32 %v5178_v48, %v3688_v27  ;;  %v5188_v37 = vpop.eup %5187  ;;  %v4754_v52 = vpack.c.bf16 %v5186_v14, %v5184_v49 }
 0x745   :  { %v5190_v0 = vpop.eup %5189 }
 0x746   :  { %4749 = vmatpush3.bf16.msra.mxu0 %v4748_v35  ;;  %v3690_v29 = vadd.f32 %v5180_v15, %v3689_v9  ;;  %v5192_v13 = vpop.eup %5191  ;;  %v4757_v54 = vpack.c.bf16 %v5190_v0, %v5188_v37 }
 0x747   :  { %4750 = vmatprep.subr.bf16.mxu0 %v7869_v42  ;;  %v5194_v8 = vpop.eup %5193 }
 0x748   :  { %v3691_v24 = vadd.f32 %v5182_v11, %v3690_v29  ;;  %v5196_v60 = vpop.eup %5195  ;;  %v4760_v33 = vpack.c.bf16 %v5194_v8, %v5192_v13 }
 0x749   :  { %v5198_v5 = vpop.eup %5197 }
 0x74a   :  { %4752 = vmatpush3.bf16.msra.mxu0 %v4751_v7  ;;  %v3692_v63 = vadd.f32 %v5184_v49, %v3691_v24  ;;  %v4763_v30 = vpack.c.bf16 %v5196_v60, %v5198_v5 }
 0x74b   :  { %4753 = vmatprep.subr.bf16.mxu0 %v7869_v42 }
 0x74c   :  { %v3693_v32 = vadd.f32 %v5186_v14, %v3692_v63 }
 0x74e   :  { %4755 = vmatpush3.bf16.msra.mxu0 %v4754_v52  ;;  %v3694_v41 = vadd.f32 %v5188_v37, %v3693_v32 }
 0x74f   :  { %4756 = vmatprep.subr.bf16.mxu0 %v7869_v42 }
 0x750   :  { %v3695_v59 = vadd.f32 %v5190_v0, %v3694_v41 }
 0x752   :  { %4758 = vmatpush3.bf16.msra.mxu0 %v4757_v54  ;;  %v3696_v36 = vadd.f32 %v5192_v13, %v3695_v59 }
 0x753   :  { %4759 = vmatprep.subr.bf16.mxu0 %v7869_v42 }
 0x754   :  { %v3697_v6 = vadd.f32 %v5194_v8, %v3696_v36 }
 0x756   :  { %4761 = vmatpush3.bf16.msra.mxu0 %v4760_v33  ;;  %v3698_v16 = vadd.f32 %v5198_v5, %v3697_v6 }
 0x757   :  { %4762 = vmatprep.subr.bf16.mxu0 %v7869_v42 }
 0x758   :  { %v3699_v20 = vadd.f32 %v5196_v60, %v3698_v16 }
 0x75a   :  { %4764 = vmatpush3.bf16.msra.mxu0 %v4763_v30  ;;  %v3700_v19 = vrot.slane %v3699_v20, 4 }
 0x75c   :  { %v3701_v21 = vadd.f32 %v3700_v19, %v3699_v20 }
 0x75d   :  { %4513 = vmatmul.mubr.f32.vlgmr.msra.gmra.mrb[26].mxu0 %v7391_v62 }
 0x75e   :  { %v3702_v28 = vrot.slane %v3701_v21, 2 }
 0x760   :  { %v3703_v34 = vadd.f32 %v3702_v28, %v3701_v21 }
 0x762   :  { %v3704_v38 = vrot.slane %v3703_v34, 1 }
 0x764   :  { %v3705_v44 = vadd.f32 %v3704_v38, %v3703_v34 }
 0x766   :  { %5199 = vrcp.f32 %v3705_v44 }
 0x770   :  { %v5200_v26 = vpop.eup %5199 }
 0x830   :  { %v3772_v25 = vpop.f32.mrb[26].mxu0 }
 0x831   :  { %v3777_v1 = vmul.f32 %v5200_v26, %v3772_v25  ;;  %v4514_v12 = vpop.f32.mrb[27].mxu0 }
 0x833   :  { %v3784_v46 = vadd.f32 %v3782_v61, %v3777_v1 }
 0x835   :  { %v3785_v23 = vrot.slane %v3784_v46, 4 }
 0x837   :  { %v3786_v42 = vmax.f32 %v3784_v46, %v3785_v23 }
 0x839   :  { %v3787_v31 = vrot.slane %v3786_v42, 2 }
 0x83b   :  { %v3788_v18 = vmax.f32 %v3786_v42, %v3787_v31 }
 0x83d   :  { %v3789_v50 = vrot.slane %v3788_v18, 1 }
 0x83f   :  { %v3790_v40 = vmax.f32 %v3788_v18, %v3789_v50 }
 0x841   :  { %v3791_v62 = vsub.f32 %v3784_v46, %v3790_v40 }
 0x843   :  { %v3792_v57 = vmul.f32 1.442695, %v3791_v62 }
 0x845   :  { %5201 = vpow2.f32 %v3792_v57 }
 0x84f   :  { %v5202_v55 = vpop.eup %5201 }
 0x850   :  { %v3794_v4 = vrot.slane %v5202_v55, 4 }
 0x852   :  { %v3795_v22 = vadd.f32 %v5202_v55, %v3794_v4 }
 0x854   :  { %v3796_v45 = vrot.slane %v3795_v22, 2 }
 0x856   :  { %v3797_v43 = vadd.f32 %v3796_v45, %v3795_v22 }
 0x858   :  { %v3798_v2 = vrot.slane %v3797_v43, 1 }
 0x85a   :  { %v3799_v39 = vadd.f32 %v3798_v2, %v3797_v43 }
 0x85c   :  { %5203 = vlog2.f32 %v3799_v39 }
 0x866   :  { %v5204_v3 = vpop.eup %5203 }
 0x867   :  { %v3801_v10 = vmul.f32 0.6931472, %v5204_v3 }
 0x869   :  { %v3802_v48 = vsub.f32 %v3791_v62, %v3801_v10 }
 0x86b   :  { %3803 = vst [vmem:[#allocation2] sm:$0xff] %v3802_v48 }
 0x86c   :  { %5248 = shalt.err (!%p5245_p4)
}
 0x86d   :  { %s5249_s12 = scalar_lea.hbm %s7604_s11, 128 }
 0x86e   :  { %p5250_p5 = scmp.ne.s32.totalorder %s7604_s11, %s5249_s12  ;;  %p5253_p6 = scmp.lt.u32.totalorder %s5249_s12, %s7604_s11 }
 0x870   :  { %p5255_p7 = pnand %p5253_p6, %p5250_p5 }
 0x872   :  { %5258 = shalt.err (!%p5255_p7)
}
 0x873   :  { %3813 = dma.vmem_to_hbm [thread:$0]  %s3811_s28, 128, %s7604_s11, [#allocation3]  }
 0x874   :  { %5259 = dma.done.wait [#allocation3], 128  }
 0x875   :  { %5260 = vsyncadd [#allocation3], 4294967168 }
 0x876   :  { %3817 = vsyncpa [#allocation3], 1 }

</bundles_post_ra>
